<compile_context>
chip_gen: v5e
topology: v5e:2x2
jax: 0.10.0
libtpu: 0.0.40
codegen_flags: <defaults>
</compile_context>

<pallas_src>
import jax
import jax.numpy as jnp
from jax import lax
from jax.experimental import pallas as pl
from jax.experimental.pallas import tpu as pltpu

# ---- model hyper-parameters (small, from the module __init__) ----
INPUT_DIM  = 3     # input_dim
SEQ_LEN    = 17    # seq_len
D_MODEL    = 16    # d_model
NHEAD      = 2     # nhead
NUM_LAYERS = 2     # num_layers
OUTPUT_DIM = 2     # output_dim
DIM_FF     = D_MODEL * 4
HEAD_DIM   = D_MODEL // NHEAD
LN_EPS     = 1e-5
BATCH      = 2
NEG_INF    = -1e30


# ----------------------------- in-kernel helpers ---------------------------
def _layer_norm(x, gamma, beta):
    # PyTorch LayerNorm: biased variance, eps inside sqrt.
    mean = jnp.mean(x, axis=-1, keepdims=True)
    var = jnp.mean((x - mean) ** 2, axis=-1, keepdims=True)
    return (x - mean) * lax.rsqrt(var + LN_EPS) * gamma + beta


def _softmax(x):
    m = jnp.max(x, axis=-1, keepdims=True)
    e = jnp.exp(x - m)
    return e * pl.reciprocal(jnp.sum(e, axis=-1, keepdims=True), approx=True)


def _dot(a, b):
    return jnp.dot(a, b, preferred_element_type=jnp.float32)


def _qkt(q, k):
    # q @ k^T without an explicit transpose (contract last dims of both).
    return lax.dot_general(q, k, (((1,), (1,)), ((), ())),
                           preferred_element_type=jnp.float32)


# --------------------------------- kernel ----------------------------------
def transformer_projector_kernel(
    x_ref, pos_ref, mask_ref, pool_ref, emb_w_ref, emb_b_ref,
    wq_ref, bq_ref, wk_ref, bk_ref, wv_ref, bv_ref,
    wo_ref, bo_ref, ln1_g_ref, ln1_b_ref,
    w1_ref, b1_ref, w2_ref, b2_ref, ln2_g_ref, ln2_b_ref,
    fc_w_ref, fc_b_ref, out_ref,
):
    x = x_ref[0]                                      # (BT*S, input_dim)
    mask = mask_ref[...]                              # (BT*S, BT*S) block-diag additive mask

    # embedding + positional embedding (pos pre-tiled/flattened in the wrapper)
    h = _dot(x, emb_w_ref[...]) + emb_b_ref[...] + pos_ref[...]    # (BT*S, d)

    for l in range(NUM_LAYERS):                       # static unroll (2 layers)
        # ---- multi-head self-attention (batch_first, post-LN) ----
        attn_out = bo_ref[l]                          # (1, d), broadcasts
        for hd in range(NHEAD):                       # static unroll (2 heads)
            # per-head projections via statically pre-split weights
            # (1/sqrt(head_dim) scale is folded into wq/bq)
            q = _dot(h, wq_ref[l, hd]) + bq_ref[l, hd]     # (BT*S, hd)
            k = _dot(h, wk_ref[l, hd]) + bk_ref[l, hd]
            v = _dot(h, wv_ref[l, hd]) + bv_ref[l, hd]
            attn = _softmax(_qkt(q, k) + mask)             # (BT*S, BT*S)
            # row-split out-proj: head merge is a plain add, no concatenate
            attn_out = attn_out + _dot(_dot(attn, v), wo_ref[l, hd])

        h = _layer_norm(h + attn_out, ln1_g_ref[l], ln1_b_ref[l])

        # ---- feed-forward: linear -> ReLU -> linear ----
        ff = jnp.maximum(_dot(h, w1_ref[l]) + b1_ref[l], 0.0)   # (BT*S, dim_ff)
        ff = _dot(ff, w2_ref[l]) + b2_ref[l]                    # (BT*S, d)

        h = _layer_norm(h + ff, ln2_g_ref[l], ln2_b_ref[l])

    # mean over seq fused before fc, pooled on the MXU: (BT, BT*S) @ (BT*S, d)
    pooled = _dot(pool_ref[...], h)                   # (BT, d)
    out_ref[0] = _dot(pooled, fc_w_ref[...]) + fc_b_ref[...]    # (BT, out)


# ------------------------------- wrapper ------------------------------------
def transformer_projector(x, params, batch_tile=None):
    """batch_tile=None collapses the whole batch into one grid step (best on
    v5e/v6e).  On v7x, pass batch_tile=B//2 so each TensorCore gets one step."""
    B = x.shape[0]
    BT = B if batch_tile is None else batch_tile
    assert B % BT == 0
    n_tiles = B // BT
    N = BT * SEQ_LEN
    scale = 1.0 / (HEAD_DIM ** 0.5)
    p = params

    # ---- static weight-layout preparation (trace-time, no kernel work) ----
    def split_heads(w3, b3, sel, s=1.0):
        w = w3[:, :, sel * D_MODEL:(sel + 1) * D_MODEL]
        w = w.reshape(NUM_LAYERS, D_MODEL, NHEAD, HEAD_DIM).transpose(0, 2, 1, 3)
        b = b3[:, :, sel * D_MODEL:(sel + 1) * D_MODEL]
        b = b.reshape(NUM_LAYERS, 1, NHEAD, HEAD_DIM).transpose(0, 2, 1, 3)
        return w * s, b * s

    wq, bq = split_heads(p["wqkv"], p["bqkv"], 0, scale)   # scale folded into q
    wk, bk = split_heads(p["wqkv"], p["bqkv"], 1)
    wv, bv = split_heads(p["wqkv"], p["bqkv"], 2)
    wo_h = p["wo"].reshape(NUM_LAYERS, NHEAD, HEAD_DIM, D_MODEL)   # row-split per head

    pos_flat = jnp.tile(p["pos"][0], (BT, 1))                      # (BT*S, d)
    row_b = jnp.arange(N, dtype=jnp.int32) // SEQ_LEN
    mask = jnp.where(row_b[:, None] == row_b[None, :],
                     0.0, NEG_INF).astype(jnp.float32)             # (BT*S, BT*S)
    pool_mat = jnp.where(jnp.arange(BT, dtype=jnp.int32)[:, None] == row_b[None, :],
                         1.0 / SEQ_LEN, 0.0).astype(jnp.float32)   # (BT, BT*S)

    ordered = [
        pos_flat, mask, pool_mat, p["emb_w"], p["emb_b"],
        wq, bq, wk, bk, wv, bv, wo_h, p["bo"],
        p["ln1_g"], p["ln1_b"], p["w1"], p["b1"], p["w2"], p["b2"],
        p["ln2_g"], p["ln2_b"], p["fc_w"], p["fc_b"],
    ]

    def full_spec(a):
        return pl.BlockSpec(a.shape, lambda i, _nd=a.ndim: (0,) * _nd)

    in_specs = [pl.BlockSpec((1, N, INPUT_DIM), lambda i: (i, 0, 0))]
    in_specs += [full_spec(a) for a in ordered]

    x2 = x.reshape(n_tiles, N, INPUT_DIM)   # flatten (B, S) -> (tiles, BT*S)

    out = pl.pallas_call(
        transformer_projector_kernel,
        out_shape=jax.ShapeDtypeStruct((n_tiles, BT, OUTPUT_DIM), jnp.float32),
        grid_spec=pltpu.PrefetchScalarGridSpec(
            num_scalar_prefetch=0,
            grid=(n_tiles,),
            in_specs=in_specs,
            out_specs=pl.BlockSpec((1, BT, OUTPUT_DIM), lambda i: (i, 0, 0)),
        ),
        compiler_params=pltpu.CompilerParams(
            dimension_semantics=("parallel",)),
    )(x2, *ordered)

    # glue: (tiles, BT, out) -> (B, out, 1), matching PyTorch output layout
    return out.reshape(B, OUTPUT_DIM)[:, :, None]


# --------------------------- pure-JAX reference ------------------------------
def transformer_projector_ref(x, p):
    h = x @ p["emb_w"] + p["emb_b"]                     # (B, S, d)
    h = h + p["pos"]
    scale = 1.0 / (HEAD_DIM ** 0.5)
    for l in range(NUM_LAYERS):
        qkv = h @ p["wqkv"][l] + p["bqkv"][l]
        q, k, v = jnp.split(qkv, 3, axis=-1)
        outs = []
        for hidx in range(NHEAD):
            lo, hi = hidx * HEAD_DIM, (hidx + 1) * HEAD_DIM
            s = jnp.einsum("bqd,bkd->bqk", q[..., lo:hi] * scale, k[..., lo:hi])
            a = jax.nn.softmax(s, axis=-1)
            outs.append(jnp.einsum("bqk,bkd->bqd", a, v[..., lo:hi]))
        attn = jnp.concatenate(outs, axis=-1) @ p["wo"][l] + p["bo"][l]

        def ln(z, g, b):
            m = jnp.mean(z, -1, keepdims=True)
            var = jnp.mean((z - m) ** 2, -1, keepdims=True)
            return (z - m) / jnp.sqrt(var + LN_EPS) * g + b

        h = ln(h + attn, p["ln1_g"][l], p["ln1_b"][l])
        ff = jnp.maximum(h @ p["w1"][l] + p["b1"][l], 0.0) @ p["w2"][l] + p["b2"][l]
        h = ln(h + ff, p["ln2_g"][l], p["ln2_b"][l])
    proj = h @ p["fc_w"] + p["fc_b"]                    # (B, S, out)
    return jnp.mean(jnp.transpose(proj, (0, 2, 1)), axis=2, keepdims=True)


# ----------------------------- parameter init --------------------------------
def init_params(key):
    ks = jax.random.split(key, 20)
    f = jnp.float32
    s = 0.1  # keep activations well-scaled
    return {
        "pos":   jax.random.normal(ks[0], (1, SEQ_LEN, D_MODEL), f) * s,
        "emb_w": jax.random.normal(ks[1], (INPUT_DIM, D_MODEL), f) * s,
        "emb_b": jax.random.normal(ks[2], (1, D_MODEL), f) * s,
        "wqkv":  jax.random.normal(ks[3], (NUM_LAYERS, D_MODEL, 3 * D_MODEL), f) * s,
        "bqkv":  jax.random.normal(ks[4], (NUM_LAYERS, 1, 3 * D_MODEL), f) * s,
        "wo":    jax.random.normal(ks[5], (NUM_LAYERS, D_MODEL, D_MODEL), f) * s,
        "bo":    jax.random.normal(ks[6], (NUM_LAYERS, 1, D_MODEL), f) * s,
        "ln1_g": jnp.ones((NUM_LAYERS, 1, D_MODEL), f),
        "ln1_b": jnp.zeros((NUM_LAYERS, 1, D_MODEL), f),
        "w1":    jax.random.normal(ks[7], (NUM_LAYERS, D_MODEL, DIM_FF), f) * s,
        "b1":    jax.random.normal(ks[8], (NUM_LAYERS, 1, DIM_FF), f) * s,
        "w2":    jax.random.normal(ks[9], (NUM_LAYERS, DIM_FF, D_MODEL), f) * s,
        "b2":    jax.random.normal(ks[10], (NUM_LAYERS, 1, D_MODEL), f) * s,
        "ln2_g": jnp.ones((NUM_LAYERS, 1, D_MODEL), f),
        "ln2_b": jnp.zeros((NUM_LAYERS, 1, D_MODEL), f),
        "fc_w":  jax.random.normal(ks[11], (D_MODEL, OUTPUT_DIM), f) * s,
        "fc_b":  jax.random.normal(ks[12], (1, OUTPUT_DIM), f) * s,
    }


if __name__ == "__main__":
    key = jax.random.PRNGKey(0)
    k_x, k_p = jax.random.split(key)
    x = jax.random.normal(k_x, (BATCH, SEQ_LEN, INPUT_DIM), jnp.float32)
    params = init_params(k_p)

    out = transformer_projector(x, params)   # on v7x: batch_tile=BATCH // 2
    out = jax.block_until_ready(out)
    assert out.shape == (BATCH, OUTPUT_DIM, 1), out.shape

    ref = jax.block_until_ready(transformer_projector_ref(x, params))
    assert jnp.allclose(out, ref, atol=1e-3, rtol=1e-3), (out, ref)

    print("KERNEL_OK")
</pallas_src>

<mosaic_0001>
module attributes {stable_mosaic.version = 11 : i64} {
  func.func @transformer_projector_kernel(%arg0: i32, %arg1: memref<1x34x3xf32, #tpu.memory_space<vmem>>, %arg2: memref<34x16xf32, #tpu.memory_space<vmem>>, %arg3: memref<34x34xf32, #tpu.memory_space<vmem>>, %arg4: memref<2x34xf32, #tpu.memory_space<vmem>>, %arg5: memref<3x16xf32, #tpu.memory_space<vmem>>, %arg6: memref<1x16xf32, #tpu.memory_space<vmem>>, %arg7: memref<2x2x16x8xf32, #tpu.memory_space<vmem>>, %arg8: memref<2x2x1x8xf32, #tpu.memory_space<vmem>>, %arg9: memref<2x2x16x8xf32, #tpu.memory_space<vmem>>, %arg10: memref<2x2x1x8xf32, #tpu.memory_space<vmem>>, %arg11: memref<2x2x16x8xf32, #tpu.memory_space<vmem>>, %arg12: memref<2x2x1x8xf32, #tpu.memory_space<vmem>>, %arg13: memref<2x2x8x16xf32, #tpu.memory_space<vmem>>, %arg14: memref<2x1x16xf32, #tpu.memory_space<vmem>>, %arg15: memref<2x1x16xf32, #tpu.memory_space<vmem>>, %arg16: memref<2x1x16xf32, #tpu.memory_space<vmem>>, %arg17: memref<2x16x64xf32, #tpu.memory_space<vmem>>, %arg18: memref<2x1x64xf32, #tpu.memory_space<vmem>>, %arg19: memref<2x64x16xf32, #tpu.memory_space<vmem>>, %arg20: memref<2x1x16xf32, #tpu.memory_space<vmem>>, %arg21: memref<2x1x16xf32, #tpu.memory_space<vmem>>, %arg22: memref<2x1x16xf32, #tpu.memory_space<vmem>>, %arg23: memref<16x2xf32, #tpu.memory_space<vmem>>, %arg24: memref<1x2xf32, #tpu.memory_space<vmem>>, %arg25: memref<1x2x2xf32, #tpu.memory_space<vmem>>) attributes {dimension_semantics = [#tpu.dimension_semantics<parallel>], iteration_bounds = array<i64: 1>, scalar_prefetch = 0 : i64, scratch_operands = 0 : i64, tpu.core_type = #tpu.core_type<tc>, window_params = [{transform_indices = @transform_0, window_bounds = array<i64: 1, 34, 3>}, {pipeline_mode = #tpu.pipeline_mode<synchronous>, transform_indices = @transform_1, window_bounds = array<i64: 34, 16>}, {pipeline_mode = #tpu.pipeline_mode<synchronous>, transform_indices = @transform_2, window_bounds = array<i64: 34, 34>}, {pipeline_mode = #tpu.pipeline_mode<synchronous>, transform_indices = @transform_3, window_bounds = array<i64: 2, 34>}, {pipeline_mode = #tpu.pipeline_mode<synchronous>, transform_indices = @transform_4, window_bounds = array<i64: 3, 16>}, {pipeline_mode = #tpu.pipeline_mode<synchronous>, transform_indices = @transform_5, window_bounds = array<i64: 1, 16>}, {pipeline_mode = #tpu.pipeline_mode<synchronous>, transform_indices = @transform_6, window_bounds = array<i64: 2, 2, 16, 8>}, {pipeline_mode = #tpu.pipeline_mode<synchronous>, transform_indices = @transform_7, window_bounds = array<i64: 2, 2, 1, 8>}, {pipeline_mode = #tpu.pipeline_mode<synchronous>, transform_indices = @transform_8, window_bounds = array<i64: 2, 2, 16, 8>}, {pipeline_mode = #tpu.pipeline_mode<synchronous>, transform_indices = @transform_9, window_bounds = array<i64: 2, 2, 1, 8>}, {pipeline_mode = #tpu.pipeline_mode<synchronous>, transform_indices = @transform_10, window_bounds = array<i64: 2, 2, 16, 8>}, {pipeline_mode = #tpu.pipeline_mode<synchronous>, transform_indices = @transform_11, window_bounds = array<i64: 2, 2, 1, 8>}, {pipeline_mode = #tpu.pipeline_mode<synchronous>, transform_indices = @transform_12, window_bounds = array<i64: 2, 2, 8, 16>}, {pipeline_mode = #tpu.pipeline_mode<synchronous>, transform_indices = @transform_13, window_bounds = array<i64: 2, 1, 16>}, {pipeline_mode = #tpu.pipeline_mode<synchronous>, transform_indices = @transform_14, window_bounds = array<i64: 2, 1, 16>}, {pipeline_mode = #tpu.pipeline_mode<synchronous>, transform_indices = @transform_15, window_bounds = array<i64: 2, 1, 16>}, {pipeline_mode = #tpu.pipeline_mode<synchronous>, transform_indices = @transform_16, window_bounds = array<i64: 2, 16, 64>}, {pipeline_mode = #tpu.pipeline_mode<synchronous>, transform_indices = @transform_17, window_bounds = array<i64: 2, 1, 64>}, {pipeline_mode = #tpu.pipeline_mode<synchronous>, transform_indices = @transform_18, window_bounds = array<i64: 2, 64, 16>}, {pipeline_mode = #tpu.pipeline_mode<synchronous>, transform_indices = @transform_19, window_bounds = array<i64: 2, 1, 16>}, {pipeline_mode = #tpu.pipeline_mode<synchronous>, transform_indices = @transform_20, window_bounds = array<i64: 2, 1, 16>}, {pipeline_mode = #tpu.pipeline_mode<synchronous>, transform_indices = @transform_21, window_bounds = array<i64: 2, 1, 16>}, {pipeline_mode = #tpu.pipeline_mode<synchronous>, transform_indices = @transform_22, window_bounds = array<i64: 16, 2>}, {pipeline_mode = #tpu.pipeline_mode<synchronous>, transform_indices = @transform_23, window_bounds = array<i64: 1, 2>}, {transform_indices = @transform_24, window_bounds = array<i64: 1, 2, 2>}]} {
    %c0 = arith.constant 0 : index
    %c0_0 = arith.constant 0 : index
    %c0_1 = arith.constant 0 : index
    %0 = vector.load %arg1[%c0, %c0_0, %c0_1] : memref<1x34x3xf32, #tpu.memory_space<vmem>>, vector<1x34x3xf32>
    %1 = vector.shape_cast %0 : vector<1x34x3xf32> to vector<34x3xf32>
    %c0_2 = arith.constant 0 : index
    %c0_3 = arith.constant 0 : index
    %2 = vector.load %arg3[%c0_2, %c0_3] : memref<34x34xf32, #tpu.memory_space<vmem>>, vector<34x34xf32>
    %c0_4 = arith.constant 0 : index
    %c0_5 = arith.constant 0 : index
    %3 = vector.load %arg5[%c0_4, %c0_5] : memref<3x16xf32, #tpu.memory_space<vmem>>, vector<3x16xf32>
    %cst = arith.constant dense<0.000000e+00> : vector<34x16xf32>
    %4 = tpu.matmul %1, %3, %cst {dimension_numbers = #tpu.dot_dimension_numbers<[1], [0], [0], [1], [0, 0, 1, 1], [], []>} : vector<34x3xf32>, vector<3x16xf32>, vector<34x16xf32> -> vector<34x16xf32>
    %c0_6 = arith.constant 0 : index
    %c0_7 = arith.constant 0 : index
    %5 = vector.load %arg6[%c0_6, %c0_7] : memref<1x16xf32, #tpu.memory_space<vmem>>, vector<1x16xf32>
    %6 = vector.broadcast %5 : vector<1x16xf32> to vector<34x16xf32>
    %7 = arith.addf %4, %6 : vector<34x16xf32>
    %c0_8 = arith.constant 0 : index
    %c0_9 = arith.constant 0 : index
    %8 = vector.load %arg2[%c0_8, %c0_9] : memref<34x16xf32, #tpu.memory_space<vmem>>, vector<34x16xf32>
    %9 = arith.addf %7, %8 : vector<34x16xf32>
    %c0_10 = arith.constant 0 : index
    %c0_11 = arith.constant 0 : index
    %c0_12 = arith.constant 0 : index
    %10 = vector.load %arg14[%c0_10, %c0_11, %c0_12] : memref<2x1x16xf32, #tpu.memory_space<vmem>>, vector<1x1x16xf32>
    %11 = vector.shape_cast %10 : vector<1x1x16xf32> to vector<1x16xf32>
    %c0_13 = arith.constant 0 : index
    %c0_14 = arith.constant 0 : index
    %c0_15 = arith.constant 0 : index
    %c0_16 = arith.constant 0 : index
    %12 = vector.load %arg7[%c0_13, %c0_14, %c0_15, %c0_16] : memref<2x2x16x8xf32, #tpu.memory_space<vmem>>, vector<1x1x16x8xf32>
    %13 = vector.shape_cast %12 : vector<1x1x16x8xf32> to vector<16x8xf32>
    %cst_17 = arith.constant dense<0.000000e+00> : vector<34x8xf32>
    %14 = tpu.matmul %9, %13, %cst_17 {dimension_numbers = #tpu.dot_dimension_numbers<[1], [0], [0], [1], [0, 0, 1, 1], [], []>} : vector<34x16xf32>, vector<16x8xf32>, vector<34x8xf32> -> vector<34x8xf32>
    %c0_18 = arith.constant 0 : index
    %c0_19 = arith.constant 0 : index
    %c0_20 = arith.constant 0 : index
    %c0_21 = arith.constant 0 : index
    %15 = vector.load %arg8[%c0_18, %c0_19, %c0_20, %c0_21] : memref<2x2x1x8xf32, #tpu.memory_space<vmem>>, vector<1x1x1x8xf32>
    %16 = vector.shape_cast %15 : vector<1x1x1x8xf32> to vector<1x8xf32>
    %17 = vector.broadcast %16 : vector<1x8xf32> to vector<34x8xf32>
    %18 = arith.addf %14, %17 : vector<34x8xf32>
    %c0_22 = arith.constant 0 : index
    %c0_23 = arith.constant 0 : index
    %c0_24 = arith.constant 0 : index
    %c0_25 = arith.constant 0 : index
    %19 = vector.load %arg9[%c0_22, %c0_23, %c0_24, %c0_25] : memref<2x2x16x8xf32, #tpu.memory_space<vmem>>, vector<1x1x16x8xf32>
    %20 = vector.shape_cast %19 : vector<1x1x16x8xf32> to vector<16x8xf32>
    %cst_26 = arith.constant dense<0.000000e+00> : vector<34x8xf32>
    %21 = tpu.matmul %9, %20, %cst_26 {dimension_numbers = #tpu.dot_dimension_numbers<[1], [0], [0], [1], [0, 0, 1, 1], [], []>} : vector<34x16xf32>, vector<16x8xf32>, vector<34x8xf32> -> vector<34x8xf32>
    %c0_27 = arith.constant 0 : index
    %c0_28 = arith.constant 0 : index
    %c0_29 = arith.constant 0 : index
    %c0_30 = arith.constant 0 : index
    %22 = vector.load %arg10[%c0_27, %c0_28, %c0_29, %c0_30] : memref<2x2x1x8xf32, #tpu.memory_space<vmem>>, vector<1x1x1x8xf32>
    %23 = vector.shape_cast %22 : vector<1x1x1x8xf32> to vector<1x8xf32>
    %24 = vector.broadcast %23 : vector<1x8xf32> to vector<34x8xf32>
    %25 = arith.addf %21, %24 : vector<34x8xf32>
    %c0_31 = arith.constant 0 : index
    %c0_32 = arith.constant 0 : index
    %c0_33 = arith.constant 0 : index
    %c0_34 = arith.constant 0 : index
    %26 = vector.load %arg11[%c0_31, %c0_32, %c0_33, %c0_34] : memref<2x2x16x8xf32, #tpu.memory_space<vmem>>, vector<1x1x16x8xf32>
    %27 = vector.shape_cast %26 : vector<1x1x16x8xf32> to vector<16x8xf32>
    %cst_35 = arith.constant dense<0.000000e+00> : vector<34x8xf32>
    %28 = tpu.matmul %9, %27, %cst_35 {dimension_numbers = #tpu.dot_dimension_numbers<[1], [0], [0], [1], [0, 0, 1, 1], [], []>} : vector<34x16xf32>, vector<16x8xf32>, vector<34x8xf32> -> vector<34x8xf32>
    %c0_36 = arith.constant 0 : index
    %c0_37 = arith.constant 0 : index
    %c0_38 = arith.constant 0 : index
    %c0_39 = arith.constant 0 : index
    %29 = vector.load %arg12[%c0_36, %c0_37, %c0_38, %c0_39] : memref<2x2x1x8xf32, #tpu.memory_space<vmem>>, vector<1x1x1x8xf32>
    %30 = vector.shape_cast %29 : vector<1x1x1x8xf32> to vector<1x8xf32>
    %31 = vector.broadcast %30 : vector<1x8xf32> to vector<34x8xf32>
    %32 = arith.addf %28, %31 : vector<34x8xf32>
    %cst_40 = arith.constant dense<0.000000e+00> : vector<34x34xf32>
    %33 = tpu.matmul %18, %25, %cst_40 {dimension_numbers = #tpu.dot_dimension_numbers<[1], [1], [0], [0], [0, 0, 1, 0], [], []>} : vector<34x8xf32>, vector<34x8xf32>, vector<34x34xf32> -> vector<34x34xf32>
    %34 = arith.addf %33, %2 : vector<34x34xf32>
    %cst_41 = arith.constant dense<0xFF800000> : vector<34xf32>
    %35 = vector.multi_reduction <maximumf>, %34, %cst_41 [1] : vector<34x34xf32> to vector<34xf32>
    %36 = vector.shape_cast %35 : vector<34xf32> to vector<34x1xf32>
    %37 = vector.broadcast %36 : vector<34x1xf32> to vector<34x34xf32>
    %38 = arith.subf %34, %37 : vector<34x34xf32>
    %39 = math.exp %38 : vector<34x34xf32>
    %cst_42 = arith.constant dense<0.000000e+00> : vector<34xf32>
    %40 = vector.multi_reduction <add>, %39, %cst_42 [1] : vector<34x34xf32> to vector<34xf32>
    %41 = vector.shape_cast %40 : vector<34xf32> to vector<34x1xf32>
    %42 = tpu.reciprocal %41 {approx = true} : vector<34x1xf32> -> vector<34x1xf32>
    %43 = vector.broadcast %42 : vector<34x1xf32> to vector<34x34xf32>
    %44 = arith.mulf %39, %43 : vector<34x34xf32>
    %cst_43 = arith.constant dense<0.000000e+00> : vector<34x8xf32>
    %45 = tpu.matmul %44, %32, %cst_43 {dimension_numbers = #tpu.dot_dimension_numbers<[1], [0], [0], [1], [0, 0, 1, 1], [], []>} : vector<34x34xf32>, vector<34x8xf32>, vector<34x8xf32> -> vector<34x8xf32>
    %c0_44 = arith.constant 0 : index
    %c0_45 = arith.constant 0 : index
    %c0_46 = arith.constant 0 : index
    %c0_47 = arith.constant 0 : index
    %46 = vector.load %arg13[%c0_44, %c0_45, %c0_46, %c0_47] : memref<2x2x8x16xf32, #tpu.memory_space<vmem>>, vector<1x1x8x16xf32>
    %47 = vector.shape_cast %46 : vector<1x1x8x16xf32> to vector<8x16xf32>
    %cst_48 = arith.constant dense<0.000000e+00> : vector<34x16xf32>
    %48 = tpu.matmul %45, %47, %cst_48 {dimension_numbers = #tpu.dot_dimension_numbers<[1], [0], [0], [1], [0, 0, 1, 1], [], []>} : vector<34x8xf32>, vector<8x16xf32>, vector<34x16xf32> -> vector<34x16xf32>
    %49 = vector.broadcast %11 : vector<1x16xf32> to vector<34x16xf32>
    %50 = arith.addf %49, %48 : vector<34x16xf32>
    %c0_49 = arith.constant 0 : index
    %c1 = arith.constant 1 : index
    %c0_50 = arith.constant 0 : index
    %c0_51 = arith.constant 0 : index
    %51 = vector.load %arg7[%c0_49, %c1, %c0_50, %c0_51] : memref<2x2x16x8xf32, #tpu.memory_space<vmem>>, vector<1x1x16x8xf32>
    %52 = vector.shape_cast %51 : vector<1x1x16x8xf32> to vector<16x8xf32>
    %cst_52 = arith.constant dense<0.000000e+00> : vector<34x8xf32>
    %53 = tpu.matmul %9, %52, %cst_52 {dimension_numbers = #tpu.dot_dimension_numbers<[1], [0], [0], [1], [0, 0, 1, 1], [], []>} : vector<34x16xf32>, vector<16x8xf32>, vector<34x8xf32> -> vector<34x8xf32>
    %c0_53 = arith.constant 0 : index
    %c1_54 = arith.constant 1 : index
    %c0_55 = arith.constant 0 : index
    %c0_56 = arith.constant 0 : index
    %54 = vector.load %arg8[%c0_53, %c1_54, %c0_55, %c0_56] : memref<2x2x1x8xf32, #tpu.memory_space<vmem>>, vector<1x1x1x8xf32>
    %55 = vector.shape_cast %54 : vector<1x1x1x8xf32> to vector<1x8xf32>
    %56 = vector.broadcast %55 : vector<1x8xf32> to vector<34x8xf32>
    %57 = arith.addf %53, %56 : vector<34x8xf32>
    %c0_57 = arith.constant 0 : index
    %c1_58 = arith.constant 1 : index
    %c0_59 = arith.constant 0 : index
    %c0_60 = arith.constant 0 : index
    %58 = vector.load %arg9[%c0_57, %c1_58, %c0_59, %c0_60] : memref<2x2x16x8xf32, #tpu.memory_space<vmem>>, vector<1x1x16x8xf32>
    %59 = vector.shape_cast %58 : vector<1x1x16x8xf32> to vector<16x8xf32>
    %cst_61 = arith.constant dense<0.000000e+00> : vector<34x8xf32>
    %60 = tpu.matmul %9, %59, %cst_61 {dimension_numbers = #tpu.dot_dimension_numbers<[1], [0], [0], [1], [0, 0, 1, 1], [], []>} : vector<34x16xf32>, vector<16x8xf32>, vector<34x8xf32> -> vector<34x8xf32>
    %c0_62 = arith.constant 0 : index
    %c1_63 = arith.constant 1 : index
    %c0_64 = arith.constant 0 : index
    %c0_65 = arith.constant 0 : index
    %61 = vector.load %arg10[%c0_62, %c1_63, %c0_64, %c0_65] : memref<2x2x1x8xf32, #tpu.memory_space<vmem>>, vector<1x1x1x8xf32>
    %62 = vector.shape_cast %61 : vector<1x1x1x8xf32> to vector<1x8xf32>
    %63 = vector.broadcast %62 : vector<1x8xf32> to vector<34x8xf32>
    %64 = arith.addf %60, %63 : vector<34x8xf32>
    %c0_66 = arith.constant 0 : index
    %c1_67 = arith.constant 1 : index
    %c0_68 = arith.constant 0 : index
    %c0_69 = arith.constant 0 : index
    %65 = vector.load %arg11[%c0_66, %c1_67, %c0_68, %c0_69] : memref<2x2x16x8xf32, #tpu.memory_space<vmem>>, vector<1x1x16x8xf32>
    %66 = vector.shape_cast %65 : vector<1x1x16x8xf32> to vector<16x8xf32>
    %cst_70 = arith.constant dense<0.000000e+00> : vector<34x8xf32>
    %67 = tpu.matmul %9, %66, %cst_70 {dimension_numbers = #tpu.dot_dimension_numbers<[1], [0], [0], [1], [0, 0, 1, 1], [], []>} : vector<34x16xf32>, vector<16x8xf32>, vector<34x8xf32> -> vector<34x8xf32>
    %c0_71 = arith.constant 0 : index
    %c1_72 = arith.constant 1 : index
    %c0_73 = arith.constant 0 : index
    %c0_74 = arith.constant 0 : index
    %68 = vector.load %arg12[%c0_71, %c1_72, %c0_73, %c0_74] : memref<2x2x1x8xf32, #tpu.memory_space<vmem>>, vector<1x1x1x8xf32>
    %69 = vector.shape_cast %68 : vector<1x1x1x8xf32> to vector<1x8xf32>
    %70 = vector.broadcast %69 : vector<1x8xf32> to vector<34x8xf32>
    %71 = arith.addf %67, %70 : vector<34x8xf32>
    %cst_75 = arith.constant dense<0.000000e+00> : vector<34x34xf32>
    %72 = tpu.matmul %57, %64, %cst_75 {dimension_numbers = #tpu.dot_dimension_numbers<[1], [1], [0], [0], [0, 0, 1, 0], [], []>} : vector<34x8xf32>, vector<34x8xf32>, vector<34x34xf32> -> vector<34x34xf32>
    %73 = arith.addf %72, %2 : vector<34x34xf32>
    %cst_76 = arith.constant dense<0xFF800000> : vector<34xf32>
    %74 = vector.multi_reduction <maximumf>, %73, %cst_76 [1] : vector<34x34xf32> to vector<34xf32>
    %75 = vector.shape_cast %74 : vector<34xf32> to vector<34x1xf32>
    %76 = vector.broadcast %75 : vector<34x1xf32> to vector<34x34xf32>
    %77 = arith.subf %73, %76 : vector<34x34xf32>
    %78 = math.exp %77 : vector<34x34xf32>
    %cst_77 = arith.constant dense<0.000000e+00> : vector<34xf32>
    %79 = vector.multi_reduction <add>, %78, %cst_77 [1] : vector<34x34xf32> to vector<34xf32>
    %80 = vector.shape_cast %79 : vector<34xf32> to vector<34x1xf32>
    %81 = tpu.reciprocal %80 {approx = true} : vector<34x1xf32> -> vector<34x1xf32>
    %82 = vector.broadcast %81 : vector<34x1xf32> to vector<34x34xf32>
    %83 = arith.mulf %78, %82 : vector<34x34xf32>
    %cst_78 = arith.constant dense<0.000000e+00> : vector<34x8xf32>
    %84 = tpu.matmul %83, %71, %cst_78 {dimension_numbers = #tpu.dot_dimension_numbers<[1], [0], [0], [1], [0, 0, 1, 1], [], []>} : vector<34x34xf32>, vector<34x8xf32>, vector<34x8xf32> -> vector<34x8xf32>
    %c0_79 = arith.constant 0 : index
    %c1_80 = arith.constant 1 : index
    %c0_81 = arith.constant 0 : index
    %c0_82 = arith.constant 0 : index
    %85 = vector.load %arg13[%c0_79, %c1_80, %c0_81, %c0_82] : memref<2x2x8x16xf32, #tpu.memory_space<vmem>>, vector<1x1x8x16xf32>
    %86 = vector.shape_cast %85 : vector<1x1x8x16xf32> to vector<8x16xf32>
    %cst_83 = arith.constant dense<0.000000e+00> : vector<34x16xf32>
    %87 = tpu.matmul %84, %86, %cst_83 {dimension_numbers = #tpu.dot_dimension_numbers<[1], [0], [0], [1], [0, 0, 1, 1], [], []>} : vector<34x8xf32>, vector<8x16xf32>, vector<34x16xf32> -> vector<34x16xf32>
    %88 = arith.addf %50, %87 : vector<34x16xf32>
    %89 = arith.addf %9, %88 : vector<34x16xf32>
    %c0_84 = arith.constant 0 : index
    %c0_85 = arith.constant 0 : index
    %c0_86 = arith.constant 0 : index
    %90 = vector.load %arg15[%c0_84, %c0_85, %c0_86] : memref<2x1x16xf32, #tpu.memory_space<vmem>>, vector<1x1x16xf32>
    %91 = vector.shape_cast %90 : vector<1x1x16xf32> to vector<1x16xf32>
    %c0_87 = arith.constant 0 : index
    %c0_88 = arith.constant 0 : index
    %c0_89 = arith.constant 0 : index
    %92 = vector.load %arg16[%c0_87, %c0_88, %c0_89] : memref<2x1x16xf32, #tpu.memory_space<vmem>>, vector<1x1x16xf32>
    %93 = vector.shape_cast %92 : vector<1x1x16xf32> to vector<1x16xf32>
    %cst_90 = arith.constant dense<0.000000e+00> : vector<34xf32>
    %94 = vector.multi_reduction <add>, %89, %cst_90 [1] : vector<34x16xf32> to vector<34xf32>
    %95 = vector.shape_cast %94 : vector<34xf32> to vector<34x1xf32>
    %cst_91 = arith.constant 1.600000e+01 : f32
    %96 = vector.broadcast %cst_91 : f32 to vector<34x1xf32>
    %97 = arith.divf %95, %96 : vector<34x1xf32>
    %98 = vector.broadcast %97 : vector<34x1xf32> to vector<34x16xf32>
    %99 = arith.subf %89, %98 : vector<34x16xf32>
    %100 = arith.mulf %99, %99 : vector<34x16xf32>
    %cst_92 = arith.constant dense<0.000000e+00> : vector<34xf32>
    %101 = vector.multi_reduction <add>, %100, %cst_92 [1] : vector<34x16xf32> to vector<34xf32>
    %102 = vector.shape_cast %101 : vector<34xf32> to vector<34x1xf32>
    %cst_93 = arith.constant 1.600000e+01 : f32
    %103 = vector.broadcast %cst_93 : f32 to vector<34x1xf32>
    %104 = arith.divf %102, %103 : vector<34x1xf32>
    %105 = vector.broadcast %97 : vector<34x1xf32> to vector<34x16xf32>
    %106 = arith.subf %89, %105 : vector<34x16xf32>
    %cst_94 = arith.constant 9.99999974E-6 : f32
    %107 = vector.broadcast %cst_94 : f32 to vector<34x1xf32>
    %108 = arith.addf %104, %107 : vector<34x1xf32>
    %109 = math.rsqrt %108 : vector<34x1xf32>
    %110 = vector.broadcast %109 : vector<34x1xf32> to vector<34x16xf32>
    %111 = arith.mulf %106, %110 : vector<34x16xf32>
    %112 = vector.broadcast %91 : vector<1x16xf32> to vector<34x16xf32>
    %113 = arith.mulf %111, %112 : vector<34x16xf32>
    %114 = vector.broadcast %93 : vector<1x16xf32> to vector<34x16xf32>
    %115 = arith.addf %113, %114 : vector<34x16xf32>
    %c0_95 = arith.constant 0 : index
    %c0_96 = arith.constant 0 : index
    %c0_97 = arith.constant 0 : index
    %116 = vector.load %arg17[%c0_95, %c0_96, %c0_97] : memref<2x16x64xf32, #tpu.memory_space<vmem>>, vector<1x16x64xf32>
    %117 = vector.shape_cast %116 : vector<1x16x64xf32> to vector<16x64xf32>
    %cst_98 = arith.constant dense<0.000000e+00> : vector<34x64xf32>
    %118 = tpu.matmul %115, %117, %cst_98 {dimension_numbers = #tpu.dot_dimension_numbers<[1], [0], [0], [1], [0, 0, 1, 1], [], []>} : vector<34x16xf32>, vector<16x64xf32>, vector<34x64xf32> -> vector<34x64xf32>
    %c0_99 = arith.constant 0 : index
    %c0_100 = arith.constant 0 : index
    %c0_101 = arith.constant 0 : index
    %119 = vector.load %arg18[%c0_99, %c0_100, %c0_101] : memref<2x1x64xf32, #tpu.memory_space<vmem>>, vector<1x1x64xf32>
    %120 = vector.shape_cast %119 : vector<1x1x64xf32> to vector<1x64xf32>
    %121 = vector.broadcast %120 : vector<1x64xf32> to vector<34x64xf32>
    %122 = arith.addf %118, %121 : vector<34x64xf32>
    %cst_102 = arith.constant 0.000000e+00 : f32
    %123 = vector.broadcast %cst_102 : f32 to vector<34x64xf32>
    %124 = arith.maximumf %122, %123 : vector<34x64xf32>
    %c0_103 = arith.constant 0 : index
    %c0_104 = arith.constant 0 : index
    %c0_105 = arith.constant 0 : index
    %125 = vector.load %arg19[%c0_103, %c0_104, %c0_105] : memref<2x64x16xf32, #tpu.memory_space<vmem>>, vector<1x64x16xf32>
    %126 = vector.shape_cast %125 : vector<1x64x16xf32> to vector<64x16xf32>
    %cst_106 = arith.constant dense<0.000000e+00> : vector<34x16xf32>
    %127 = tpu.matmul %124, %126, %cst_106 {dimension_numbers = #tpu.dot_dimension_numbers<[1], [0], [0], [1], [0, 0, 1, 1], [], []>} : vector<34x64xf32>, vector<64x16xf32>, vector<34x16xf32> -> vector<34x16xf32>
    %c0_107 = arith.constant 0 : index
    %c0_108 = arith.constant 0 : index
    %c0_109 = arith.constant 0 : index
    %128 = vector.load %arg20[%c0_107, %c0_108, %c0_109] : memref<2x1x16xf32, #tpu.memory_space<vmem>>, vector<1x1x16xf32>
    %129 = vector.shape_cast %128 : vector<1x1x16xf32> to vector<1x16xf32>
    %130 = vector.broadcast %129 : vector<1x16xf32> to vector<34x16xf32>
    %131 = arith.addf %127, %130 : vector<34x16xf32>
    %132 = arith.addf %115, %131 : vector<34x16xf32>
    %c0_110 = arith.constant 0 : index
    %c0_111 = arith.constant 0 : index
    %c0_112 = arith.constant 0 : index
    %133 = vector.load %arg21[%c0_110, %c0_111, %c0_112] : memref<2x1x16xf32, #tpu.memory_space<vmem>>, vector<1x1x16xf32>
    %134 = vector.shape_cast %133 : vector<1x1x16xf32> to vector<1x16xf32>
    %c0_113 = arith.constant 0 : index
    %c0_114 = arith.constant 0 : index
    %c0_115 = arith.constant 0 : index
    %135 = vector.load %arg22[%c0_113, %c0_114, %c0_115] : memref<2x1x16xf32, #tpu.memory_space<vmem>>, vector<1x1x16xf32>
    %136 = vector.shape_cast %135 : vector<1x1x16xf32> to vector<1x16xf32>
    %cst_116 = arith.constant dense<0.000000e+00> : vector<34xf32>
    %137 = vector.multi_reduction <add>, %132, %cst_116 [1] : vector<34x16xf32> to vector<34xf32>
    %138 = vector.shape_cast %137 : vector<34xf32> to vector<34x1xf32>
    %cst_117 = arith.constant 1.600000e+01 : f32
    %139 = vector.broadcast %cst_117 : f32 to vector<34x1xf32>
    %140 = arith.divf %138, %139 : vector<34x1xf32>
    %141 = vector.broadcast %140 : vector<34x1xf32> to vector<34x16xf32>
    %142 = arith.subf %132, %141 : vector<34x16xf32>
    %143 = arith.mulf %142, %142 : vector<34x16xf32>
    %cst_118 = arith.constant dense<0.000000e+00> : vector<34xf32>
    %144 = vector.multi_reduction <add>, %143, %cst_118 [1] : vector<34x16xf32> to vector<34xf32>
    %145 = vector.shape_cast %144 : vector<34xf32> to vector<34x1xf32>
    %cst_119 = arith.constant 1.600000e+01 : f32
    %146 = vector.broadcast %cst_119 : f32 to vector<34x1xf32>
    %147 = arith.divf %145, %146 : vector<34x1xf32>
    %148 = vector.broadcast %140 : vector<34x1xf32> to vector<34x16xf32>
    %149 = arith.subf %132, %148 : vector<34x16xf32>
    %cst_120 = arith.constant 9.99999974E-6 : f32
    %150 = vector.broadcast %cst_120 : f32 to vector<34x1xf32>
    %151 = arith.addf %147, %150 : vector<34x1xf32>
    %152 = math.rsqrt %151 : vector<34x1xf32>
    %153 = vector.broadcast %152 : vector<34x1xf32> to vector<34x16xf32>
    %154 = arith.mulf %149, %153 : vector<34x16xf32>
    %155 = vector.broadcast %134 : vector<1x16xf32> to vector<34x16xf32>
    %156 = arith.mulf %154, %155 : vector<34x16xf32>
    %157 = vector.broadcast %136 : vector<1x16xf32> to vector<34x16xf32>
    %158 = arith.addf %156, %157 : vector<34x16xf32>
    %c1_121 = arith.constant 1 : index
    %c0_122 = arith.constant 0 : index
    %c0_123 = arith.constant 0 : index
    %159 = vector.load %arg14[%c1_121, %c0_122, %c0_123] : memref<2x1x16xf32, #tpu.memory_space<vmem>>, vector<1x1x16xf32>
    %160 = vector.shape_cast %159 : vector<1x1x16xf32> to vector<1x16xf32>
    %c1_124 = arith.constant 1 : index
    %c0_125 = arith.constant 0 : index
    %c0_126 = arith.constant 0 : index
    %c0_127 = arith.constant 0 : index
    %161 = vector.load %arg7[%c1_124, %c0_125, %c0_126, %c0_127] : memref<2x2x16x8xf32, #tpu.memory_space<vmem>>, vector<1x1x16x8xf32>
    %162 = vector.shape_cast %161 : vector<1x1x16x8xf32> to vector<16x8xf32>
    %cst_128 = arith.constant dense<0.000000e+00> : vector<34x8xf32>
    %163 = tpu.matmul %158, %162, %cst_128 {dimension_numbers = #tpu.dot_dimension_numbers<[1], [0], [0], [1], [0, 0, 1, 1], [], []>} : vector<34x16xf32>, vector<16x8xf32>, vector<34x8xf32> -> vector<34x8xf32>
    %c1_129 = arith.constant 1 : index
    %c0_130 = arith.constant 0 : index
    %c0_131 = arith.constant 0 : index
    %c0_132 = arith.constant 0 : index
    %164 = vector.load %arg8[%c1_129, %c0_130, %c0_131, %c0_132] : memref<2x2x1x8xf32, #tpu.memory_space<vmem>>, vector<1x1x1x8xf32>
    %165 = vector.shape_cast %164 : vector<1x1x1x8xf32> to vector<1x8xf32>
    %166 = vector.broadcast %165 : vector<1x8xf32> to vector<34x8xf32>
    %167 = arith.addf %163, %166 : vector<34x8xf32>
    %c1_133 = arith.constant 1 : index
    %c0_134 = arith.constant 0 : index
    %c0_135 = arith.constant 0 : index
    %c0_136 = arith.constant 0 : index
    %168 = vector.load %arg9[%c1_133, %c0_134, %c0_135, %c0_136] : memref<2x2x16x8xf32, #tpu.memory_space<vmem>>, vector<1x1x16x8xf32>
    %169 = vector.shape_cast %168 : vector<1x1x16x8xf32> to vector<16x8xf32>
    %cst_137 = arith.constant dense<0.000000e+00> : vector<34x8xf32>
    %170 = tpu.matmul %158, %169, %cst_137 {dimension_numbers = #tpu.dot_dimension_numbers<[1], [0], [0], [1], [0, 0, 1, 1], [], []>} : vector<34x16xf32>, vector<16x8xf32>, vector<34x8xf32> -> vector<34x8xf32>
    %c1_138 = arith.constant 1 : index
    %c0_139 = arith.constant 0 : index
    %c0_140 = arith.constant 0 : index
    %c0_141 = arith.constant 0 : index
    %171 = vector.load %arg10[%c1_138, %c0_139, %c0_140, %c0_141] : memref<2x2x1x8xf32, #tpu.memory_space<vmem>>, vector<1x1x1x8xf32>
    %172 = vector.shape_cast %171 : vector<1x1x1x8xf32> to vector<1x8xf32>
    %173 = vector.broadcast %172 : vector<1x8xf32> to vector<34x8xf32>
    %174 = arith.addf %170, %173 : vector<34x8xf32>
    %c1_142 = arith.constant 1 : index
    %c0_143 = arith.constant 0 : index
    %c0_144 = arith.constant 0 : index
    %c0_145 = arith.constant 0 : index
    %175 = vector.load %arg11[%c1_142, %c0_143, %c0_144, %c0_145] : memref<2x2x16x8xf32, #tpu.memory_space<vmem>>, vector<1x1x16x8xf32>
    %176 = vector.shape_cast %175 : vector<1x1x16x8xf32> to vector<16x8xf32>
    %cst_146 = arith.constant dense<0.000000e+00> : vector<34x8xf32>
    %177 = tpu.matmul %158, %176, %cst_146 {dimension_numbers = #tpu.dot_dimension_numbers<[1], [0], [0], [1], [0, 0, 1, 1], [], []>} : vector<34x16xf32>, vector<16x8xf32>, vector<34x8xf32> -> vector<34x8xf32>
    %c1_147 = arith.constant 1 : index
    %c0_148 = arith.constant 0 : index
    %c0_149 = arith.constant 0 : index
    %c0_150 = arith.constant 0 : index
    %178 = vector.load %arg12[%c1_147, %c0_148, %c0_149, %c0_150] : memref<2x2x1x8xf32, #tpu.memory_space<vmem>>, vector<1x1x1x8xf32>
    %179 = vector.shape_cast %178 : vector<1x1x1x8xf32> to vector<1x8xf32>
    %180 = vector.broadcast %179 : vector<1x8xf32> to vector<34x8xf32>
    %181 = arith.addf %177, %180 : vector<34x8xf32>
    %cst_151 = arith.constant dense<0.000000e+00> : vector<34x34xf32>
    %182 = tpu.matmul %167, %174, %cst_151 {dimension_numbers = #tpu.dot_dimension_numbers<[1], [1], [0], [0], [0, 0, 1, 0], [], []>} : vector<34x8xf32>, vector<34x8xf32>, vector<34x34xf32> -> vector<34x34xf32>
    %183 = arith.addf %182, %2 : vector<34x34xf32>
    %cst_152 = arith.constant dense<0xFF800000> : vector<34xf32>
    %184 = vector.multi_reduction <maximumf>, %183, %cst_152 [1] : vector<34x34xf32> to vector<34xf32>
    %185 = vector.shape_cast %184 : vector<34xf32> to vector<34x1xf32>
    %186 = vector.broadcast %185 : vector<34x1xf32> to vector<34x34xf32>
    %187 = arith.subf %183, %186 : vector<34x34xf32>
    %188 = math.exp %187 : vector<34x34xf32>
    %cst_153 = arith.constant dense<0.000000e+00> : vector<34xf32>
    %189 = vector.multi_reduction <add>, %188, %cst_153 [1] : vector<34x34xf32> to vector<34xf32>
    %190 = vector.shape_cast %189 : vector<34xf32> to vector<34x1xf32>
    %191 = tpu.reciprocal %190 {approx = true} : vector<34x1xf32> -> vector<34x1xf32>
    %192 = vector.broadcast %191 : vector<34x1xf32> to vector<34x34xf32>
    %193 = arith.mulf %188, %192 : vector<34x34xf32>
    %cst_154 = arith.constant dense<0.000000e+00> : vector<34x8xf32>
    %194 = tpu.matmul %193, %181, %cst_154 {dimension_numbers = #tpu.dot_dimension_numbers<[1], [0], [0], [1], [0, 0, 1, 1], [], []>} : vector<34x34xf32>, vector<34x8xf32>, vector<34x8xf32> -> vector<34x8xf32>
    %c1_155 = arith.constant 1 : index
    %c0_156 = arith.constant 0 : index
    %c0_157 = arith.constant 0 : index
    %c0_158 = arith.constant 0 : index
    %195 = vector.load %arg13[%c1_155, %c0_156, %c0_157, %c0_158] : memref<2x2x8x16xf32, #tpu.memory_space<vmem>>, vector<1x1x8x16xf32>
    %196 = vector.shape_cast %195 : vector<1x1x8x16xf32> to vector<8x16xf32>
    %cst_159 = arith.constant dense<0.000000e+00> : vector<34x16xf32>
    %197 = tpu.matmul %194, %196, %cst_159 {dimension_numbers = #tpu.dot_dimension_numbers<[1], [0], [0], [1], [0, 0, 1, 1], [], []>} : vector<34x8xf32>, vector<8x16xf32>, vector<34x16xf32> -> vector<34x16xf32>
    %198 = vector.broadcast %160 : vector<1x16xf32> to vector<34x16xf32>
    %199 = arith.addf %198, %197 : vector<34x16xf32>
    %c1_160 = arith.constant 1 : index
    %c1_161 = arith.constant 1 : index
    %c0_162 = arith.constant 0 : index
    %c0_163 = arith.constant 0 : index
    %200 = vector.load %arg7[%c1_160, %c1_161, %c0_162, %c0_163] : memref<2x2x16x8xf32, #tpu.memory_space<vmem>>, vector<1x1x16x8xf32>
    %201 = vector.shape_cast %200 : vector<1x1x16x8xf32> to vector<16x8xf32>
    %cst_164 = arith.constant dense<0.000000e+00> : vector<34x8xf32>
    %202 = tpu.matmul %158, %201, %cst_164 {dimension_numbers = #tpu.dot_dimension_numbers<[1], [0], [0], [1], [0, 0, 1, 1], [], []>} : vector<34x16xf32>, vector<16x8xf32>, vector<34x8xf32> -> vector<34x8xf32>
    %c1_165 = arith.constant 1 : index
    %c1_166 = arith.constant 1 : index
    %c0_167 = arith.constant 0 : index
    %c0_168 = arith.constant 0 : index
    %203 = vector.load %arg8[%c1_165, %c1_166, %c0_167, %c0_168] : memref<2x2x1x8xf32, #tpu.memory_space<vmem>>, vector<1x1x1x8xf32>
    %204 = vector.shape_cast %203 : vector<1x1x1x8xf32> to vector<1x8xf32>
    %205 = vector.broadcast %204 : vector<1x8xf32> to vector<34x8xf32>
    %206 = arith.addf %202, %205 : vector<34x8xf32>
    %c1_169 = arith.constant 1 : index
    %c1_170 = arith.constant 1 : index
    %c0_171 = arith.constant 0 : index
    %c0_172 = arith.constant 0 : index
    %207 = vector.load %arg9[%c1_169, %c1_170, %c0_171, %c0_172] : memref<2x2x16x8xf32, #tpu.memory_space<vmem>>, vector<1x1x16x8xf32>
    %208 = vector.shape_cast %207 : vector<1x1x16x8xf32> to vector<16x8xf32>
    %cst_173 = arith.constant dense<0.000000e+00> : vector<34x8xf32>
    %209 = tpu.matmul %158, %208, %cst_173 {dimension_numbers = #tpu.dot_dimension_numbers<[1], [0], [0], [1], [0, 0, 1, 1], [], []>} : vector<34x16xf32>, vector<16x8xf32>, vector<34x8xf32> -> vector<34x8xf32>
    %c1_174 = arith.constant 1 : index
    %c1_175 = arith.constant 1 : index
    %c0_176 = arith.constant 0 : index
    %c0_177 = arith.constant 0 : index
    %210 = vector.load %arg10[%c1_174, %c1_175, %c0_176, %c0_177] : memref<2x2x1x8xf32, #tpu.memory_space<vmem>>, vector<1x1x1x8xf32>
    %211 = vector.shape_cast %210 : vector<1x1x1x8xf32> to vector<1x8xf32>
    %212 = vector.broadcast %211 : vector<1x8xf32> to vector<34x8xf32>
    %213 = arith.addf %209, %212 : vector<34x8xf32>
    %c1_178 = arith.constant 1 : index
    %c1_179 = arith.constant 1 : index
    %c0_180 = arith.constant 0 : index
    %c0_181 = arith.constant 0 : index
    %214 = vector.load %arg11[%c1_178, %c1_179, %c0_180, %c0_181] : memref<2x2x16x8xf32, #tpu.memory_space<vmem>>, vector<1x1x16x8xf32>
    %215 = vector.shape_cast %214 : vector<1x1x16x8xf32> to vector<16x8xf32>
    %cst_182 = arith.constant dense<0.000000e+00> : vector<34x8xf32>
    %216 = tpu.matmul %158, %215, %cst_182 {dimension_numbers = #tpu.dot_dimension_numbers<[1], [0], [0], [1], [0, 0, 1, 1], [], []>} : vector<34x16xf32>, vector<16x8xf32>, vector<34x8xf32> -> vector<34x8xf32>
    %c1_183 = arith.constant 1 : index
    %c1_184 = arith.constant 1 : index
    %c0_185 = arith.constant 0 : index
    %c0_186 = arith.constant 0 : index
    %217 = vector.load %arg12[%c1_183, %c1_184, %c0_185, %c0_186] : memref<2x2x1x8xf32, #tpu.memory_space<vmem>>, vector<1x1x1x8xf32>
    %218 = vector.shape_cast %217 : vector<1x1x1x8xf32> to vector<1x8xf32>
    %219 = vector.broadcast %218 : vector<1x8xf32> to vector<34x8xf32>
    %220 = arith.addf %216, %219 : vector<34x8xf32>
    %cst_187 = arith.constant dense<0.000000e+00> : vector<34x34xf32>
    %221 = tpu.matmul %206, %213, %cst_187 {dimension_numbers = #tpu.dot_dimension_numbers<[1], [1], [0], [0], [0, 0, 1, 0], [], []>} : vector<34x8xf32>, vector<34x8xf32>, vector<34x34xf32> -> vector<34x34xf32>
    %222 = arith.addf %221, %2 : vector<34x34xf32>
    %cst_188 = arith.constant dense<0xFF800000> : vector<34xf32>
    %223 = vector.multi_reduction <maximumf>, %222, %cst_188 [1] : vector<34x34xf32> to vector<34xf32>
    %224 = vector.shape_cast %223 : vector<34xf32> to vector<34x1xf32>
    %225 = vector.broadcast %224 : vector<34x1xf32> to vector<34x34xf32>
    %226 = arith.subf %222, %225 : vector<34x34xf32>
    %227 = math.exp %226 : vector<34x34xf32>
    %cst_189 = arith.constant dense<0.000000e+00> : vector<34xf32>
    %228 = vector.multi_reduction <add>, %227, %cst_189 [1] : vector<34x34xf32> to vector<34xf32>
    %229 = vector.shape_cast %228 : vector<34xf32> to vector<34x1xf32>
    %230 = tpu.reciprocal %229 {approx = true} : vector<34x1xf32> -> vector<34x1xf32>
    %231 = vector.broadcast %230 : vector<34x1xf32> to vector<34x34xf32>
    %232 = arith.mulf %227, %231 : vector<34x34xf32>
    %cst_190 = arith.constant dense<0.000000e+00> : vector<34x8xf32>
    %233 = tpu.matmul %232, %220, %cst_190 {dimension_numbers = #tpu.dot_dimension_numbers<[1], [0], [0], [1], [0, 0, 1, 1], [], []>} : vector<34x34xf32>, vector<34x8xf32>, vector<34x8xf32> -> vector<34x8xf32>
    %c1_191 = arith.constant 1 : index
    %c1_192 = arith.constant 1 : index
    %c0_193 = arith.constant 0 : index
    %c0_194 = arith.constant 0 : index
    %234 = vector.load %arg13[%c1_191, %c1_192, %c0_193, %c0_194] : memref<2x2x8x16xf32, #tpu.memory_space<vmem>>, vector<1x1x8x16xf32>
    %235 = vector.shape_cast %234 : vector<1x1x8x16xf32> to vector<8x16xf32>
    %cst_195 = arith.constant dense<0.000000e+00> : vector<34x16xf32>
    %236 = tpu.matmul %233, %235, %cst_195 {dimension_numbers = #tpu.dot_dimension_numbers<[1], [0], [0], [1], [0, 0, 1, 1], [], []>} : vector<34x8xf32>, vector<8x16xf32>, vector<34x16xf32> -> vector<34x16xf32>
    %237 = arith.addf %199, %236 : vector<34x16xf32>
    %238 = arith.addf %158, %237 : vector<34x16xf32>
    %c1_196 = arith.constant 1 : index
    %c0_197 = arith.constant 0 : index
    %c0_198 = arith.constant 0 : index
    %239 = vector.load %arg15[%c1_196, %c0_197, %c0_198] : memref<2x1x16xf32, #tpu.memory_space<vmem>>, vector<1x1x16xf32>
    %240 = vector.shape_cast %239 : vector<1x1x16xf32> to vector<1x16xf32>
    %c1_199 = arith.constant 1 : index
    %c0_200 = arith.constant 0 : index
    %c0_201 = arith.constant 0 : index
    %241 = vector.load %arg16[%c1_199, %c0_200, %c0_201] : memref<2x1x16xf32, #tpu.memory_space<vmem>>, vector<1x1x16xf32>
    %242 = vector.shape_cast %241 : vector<1x1x16xf32> to vector<1x16xf32>
    %cst_202 = arith.constant dense<0.000000e+00> : vector<34xf32>
    %243 = vector.multi_reduction <add>, %238, %cst_202 [1] : vector<34x16xf32> to vector<34xf32>
    %244 = vector.shape_cast %243 : vector<34xf32> to vector<34x1xf32>
    %cst_203 = arith.constant 1.600000e+01 : f32
    %245 = vector.broadcast %cst_203 : f32 to vector<34x1xf32>
    %246 = arith.divf %244, %245 : vector<34x1xf32>
    %247 = vector.broadcast %246 : vector<34x1xf32> to vector<34x16xf32>
    %248 = arith.subf %238, %247 : vector<34x16xf32>
    %249 = arith.mulf %248, %248 : vector<34x16xf32>
    %cst_204 = arith.constant dense<0.000000e+00> : vector<34xf32>
    %250 = vector.multi_reduction <add>, %249, %cst_204 [1] : vector<34x16xf32> to vector<34xf32>
    %251 = vector.shape_cast %250 : vector<34xf32> to vector<34x1xf32>
    %cst_205 = arith.constant 1.600000e+01 : f32
    %252 = vector.broadcast %cst_205 : f32 to vector<34x1xf32>
    %253 = arith.divf %251, %252 : vector<34x1xf32>
    %254 = vector.broadcast %246 : vector<34x1xf32> to vector<34x16xf32>
    %255 = arith.subf %238, %254 : vector<34x16xf32>
    %cst_206 = arith.constant 9.99999974E-6 : f32
    %256 = vector.broadcast %cst_206 : f32 to vector<34x1xf32>
    %257 = arith.addf %253, %256 : vector<34x1xf32>
    %258 = math.rsqrt %257 : vector<34x1xf32>
    %259 = vector.broadcast %258 : vector<34x1xf32> to vector<34x16xf32>
    %260 = arith.mulf %255, %259 : vector<34x16xf32>
    %261 = vector.broadcast %240 : vector<1x16xf32> to vector<34x16xf32>
    %262 = arith.mulf %260, %261 : vector<34x16xf32>
    %263 = vector.broadcast %242 : vector<1x16xf32> to vector<34x16xf32>
    %264 = arith.addf %262, %263 : vector<34x16xf32>
    %c1_207 = arith.constant 1 : index
    %c0_208 = arith.constant 0 : index
    %c0_209 = arith.constant 0 : index
    %265 = vector.load %arg17[%c1_207, %c0_208, %c0_209] : memref<2x16x64xf32, #tpu.memory_space<vmem>>, vector<1x16x64xf32>
    %266 = vector.shape_cast %265 : vector<1x16x64xf32> to vector<16x64xf32>
    %cst_210 = arith.constant dense<0.000000e+00> : vector<34x64xf32>
    %267 = tpu.matmul %264, %266, %cst_210 {dimension_numbers = #tpu.dot_dimension_numbers<[1], [0], [0], [1], [0, 0, 1, 1], [], []>} : vector<34x16xf32>, vector<16x64xf32>, vector<34x64xf32> -> vector<34x64xf32>
    %c1_211 = arith.constant 1 : index
    %c0_212 = arith.constant 0 : index
    %c0_213 = arith.constant 0 : index
    %268 = vector.load %arg18[%c1_211, %c0_212, %c0_213] : memref<2x1x64xf32, #tpu.memory_space<vmem>>, vector<1x1x64xf32>
    %269 = vector.shape_cast %268 : vector<1x1x64xf32> to vector<1x64xf32>
    %270 = vector.broadcast %269 : vector<1x64xf32> to vector<34x64xf32>
    %271 = arith.addf %267, %270 : vector<34x64xf32>
    %cst_214 = arith.constant 0.000000e+00 : f32
    %272 = vector.broadcast %cst_214 : f32 to vector<34x64xf32>
    %273 = arith.maximumf %271, %272 : vector<34x64xf32>
    %c1_215 = arith.constant 1 : index
    %c0_216 = arith.constant 0 : index
    %c0_217 = arith.constant 0 : index
    %274 = vector.load %arg19[%c1_215, %c0_216, %c0_217] : memref<2x64x16xf32, #tpu.memory_space<vmem>>, vector<1x64x16xf32>
    %275 = vector.shape_cast %274 : vector<1x64x16xf32> to vector<64x16xf32>
    %cst_218 = arith.constant dense<0.000000e+00> : vector<34x16xf32>
    %276 = tpu.matmul %273, %275, %cst_218 {dimension_numbers = #tpu.dot_dimension_numbers<[1], [0], [0], [1], [0, 0, 1, 1], [], []>} : vector<34x64xf32>, vector<64x16xf32>, vector<34x16xf32> -> vector<34x16xf32>
    %c1_219 = arith.constant 1 : index
    %c0_220 = arith.constant 0 : index
    %c0_221 = arith.constant 0 : index
    %277 = vector.load %arg20[%c1_219, %c0_220, %c0_221] : memref<2x1x16xf32, #tpu.memory_space<vmem>>, vector<1x1x16xf32>
    %278 = vector.shape_cast %277 : vector<1x1x16xf32> to vector<1x16xf32>
    %279 = vector.broadcast %278 : vector<1x16xf32> to vector<34x16xf32>
    %280 = arith.addf %276, %279 : vector<34x16xf32>
    %281 = arith.addf %264, %280 : vector<34x16xf32>
    %c1_222 = arith.constant 1 : index
    %c0_223 = arith.constant 0 : index
    %c0_224 = arith.constant 0 : index
    %282 = vector.load %arg21[%c1_222, %c0_223, %c0_224] : memref<2x1x16xf32, #tpu.memory_space<vmem>>, vector<1x1x16xf32>
    %283 = vector.shape_cast %282 : vector<1x1x16xf32> to vector<1x16xf32>
    %c1_225 = arith.constant 1 : index
    %c0_226 = arith.constant 0 : index
    %c0_227 = arith.constant 0 : index
    %284 = vector.load %arg22[%c1_225, %c0_226, %c0_227] : memref<2x1x16xf32, #tpu.memory_space<vmem>>, vector<1x1x16xf32>
    %285 = vector.shape_cast %284 : vector<1x1x16xf32> to vector<1x16xf32>
    %cst_228 = arith.constant dense<0.000000e+00> : vector<34xf32>
    %286 = vector.multi_reduction <add>, %281, %cst_228 [1] : vector<34x16xf32> to vector<34xf32>
    %287 = vector.shape_cast %286 : vector<34xf32> to vector<34x1xf32>
    %cst_229 = arith.constant 1.600000e+01 : f32
    %288 = vector.broadcast %cst_229 : f32 to vector<34x1xf32>
    %289 = arith.divf %287, %288 : vector<34x1xf32>
    %290 = vector.broadcast %289 : vector<34x1xf32> to vector<34x16xf32>
    %291 = arith.subf %281, %290 : vector<34x16xf32>
    %292 = arith.mulf %291, %291 : vector<34x16xf32>
    %cst_230 = arith.constant dense<0.000000e+00> : vector<34xf32>
    %293 = vector.multi_reduction <add>, %292, %cst_230 [1] : vector<34x16xf32> to vector<34xf32>
    %294 = vector.shape_cast %293 : vector<34xf32> to vector<34x1xf32>
    %cst_231 = arith.constant 1.600000e+01 : f32
    %295 = vector.broadcast %cst_231 : f32 to vector<34x1xf32>
    %296 = arith.divf %294, %295 : vector<34x1xf32>
    %297 = vector.broadcast %289 : vector<34x1xf32> to vector<34x16xf32>
    %298 = arith.subf %281, %297 : vector<34x16xf32>
    %cst_232 = arith.constant 9.99999974E-6 : f32
    %299 = vector.broadcast %cst_232 : f32 to vector<34x1xf32>
    %300 = arith.addf %296, %299 : vector<34x1xf32>
    %301 = math.rsqrt %300 : vector<34x1xf32>
    %302 = vector.broadcast %301 : vector<34x1xf32> to vector<34x16xf32>
    %303 = arith.mulf %298, %302 : vector<34x16xf32>
    %304 = vector.broadcast %283 : vector<1x16xf32> to vector<34x16xf32>
    %305 = arith.mulf %303, %304 : vector<34x16xf32>
    %306 = vector.broadcast %285 : vector<1x16xf32> to vector<34x16xf32>
    %307 = arith.addf %305, %306 : vector<34x16xf32>
    %c0_233 = arith.constant 0 : index
    %c0_234 = arith.constant 0 : index
    %308 = vector.load %arg4[%c0_233, %c0_234] : memref<2x34xf32, #tpu.memory_space<vmem>>, vector<2x34xf32>
    %cst_235 = arith.constant dense<0.000000e+00> : vector<2x16xf32>
    %309 = tpu.matmul %308, %307, %cst_235 {dimension_numbers = #tpu.dot_dimension_numbers<[1], [0], [0], [1], [0, 0, 1, 1], [], []>} : vector<2x34xf32>, vector<34x16xf32>, vector<2x16xf32> -> vector<2x16xf32>
    %c0_236 = arith.constant 0 : index
    %c0_237 = arith.constant 0 : index
    %310 = vector.load %arg23[%c0_236, %c0_237] : memref<16x2xf32, #tpu.memory_space<vmem>>, vector<16x2xf32>
    %cst_238 = arith.constant dense<0.000000e+00> : vector<2x2xf32>
    %311 = tpu.matmul %309, %310, %cst_238 {dimension_numbers = #tpu.dot_dimension_numbers<[1], [0], [0], [1], [0, 0, 1, 1], [], []>} : vector<2x16xf32>, vector<16x2xf32>, vector<2x2xf32> -> vector<2x2xf32>
    %c0_239 = arith.constant 0 : index
    %c0_240 = arith.constant 0 : index
    %312 = vector.load %arg24[%c0_239, %c0_240] : memref<1x2xf32, #tpu.memory_space<vmem>>, vector<1x2xf32>
    %313 = vector.broadcast %312 : vector<1x2xf32> to vector<2x2xf32>
    %314 = arith.addf %311, %313 : vector<2x2xf32>
    %c0_241 = arith.constant 0 : index
    %c0_242 = arith.constant 0 : index
    %c0_243 = arith.constant 0 : index
    %315 = vector.load %arg25[%c0_241, %c0_242, %c0_243] : memref<1x2x2xf32, #tpu.memory_space<vmem>>, vector<1x2x2xf32>
    %316 = vector.shape_cast %315 : vector<1x2x2xf32> to vector<2x2xf32>
    %317 = vector.shape_cast %314 : vector<2x2xf32> to vector<1x2x2xf32>
    tpu.vector_store %arg25[%c0_241, %c0_242, %c0_243], %317 {strides = array<i32>} : memref<1x2x2xf32, #tpu.memory_space<vmem>>, vector<1x2x2xf32>,
    return
  }
  func.func @transform_0(%arg0: i32) -> (i32, i32, i32) {
    %c0_i32 = arith.constant 0 : i32
    %c0_i32_0 = arith.constant 0 : i32
    %c0_i32_1 = arith.constant 0 : i32
    return %arg0, %c0_i32, %c0_i32_0 : i32, i32, i32
  }
  func.func @transform_1(%arg0: i32) -> (i32, i32) {
    %c0_i32 = arith.constant 0 : i32
    %c0_i32_0 = arith.constant 0 : i32
    %c0_i32_1 = arith.constant 0 : i32
    return %c0_i32, %c0_i32_0 : i32, i32
  }
  func.func @transform_2(%arg0: i32) -> (i32, i32) {
    %c0_i32 = arith.constant 0 : i32
    %c0_i32_0 = arith.constant 0 : i32
    %c0_i32_1 = arith.constant 0 : i32
    return %c0_i32, %c0_i32_0 : i32, i32
  }
  func.func @transform_3(%arg0: i32) -> (i32, i32) {
    %c0_i32 = arith.constant 0 : i32
    %c0_i32_0 = arith.constant 0 : i32
    %c0_i32_1 = arith.constant 0 : i32
    return %c0_i32, %c0_i32_0 : i32, i32
  }
  func.func @transform_4(%arg0: i32) -> (i32, i32) {
    %c0_i32 = arith.constant 0 : i32
    %c0_i32_0 = arith.constant 0 : i32
    %c0_i32_1 = arith.constant 0 : i32
    return %c0_i32, %c0_i32_0 : i32, i32
  }
  func.func @transform_5(%arg0: i32) -> (i32, i32) {
    %c0_i32 = arith.constant 0 : i32
    %c0_i32_0 = arith.constant 0 : i32
    %c0_i32_1 = arith.constant 0 : i32
    return %c0_i32, %c0_i32_0 : i32, i32
  }
  func.func @transform_6(%arg0: i32) -> (i32, i32, i32, i32) {
    %c0_i32 = arith.constant 0 : i32
    %c0_i32_0 = arith.constant 0 : i32
    %c0_i32_1 = arith.constant 0 : i32
    %c0_i32_2 = arith.constant 0 : i32
    %c0_i32_3 = arith.constant 0 : i32
    return %c0_i32, %c0_i32_0, %c0_i32_1, %c0_i32_2 : i32, i32, i32, i32
  }
  func.func @transform_7(%arg0: i32) -> (i32, i32, i32, i32) {
    %c0_i32 = arith.constant 0 : i32
    %c0_i32_0 = arith.constant 0 : i32
    %c0_i32_1 = arith.constant 0 : i32
    %c0_i32_2 = arith.constant 0 : i32
    %c0_i32_3 = arith.constant 0 : i32
    return %c0_i32, %c0_i32_0, %c0_i32_1, %c0_i32_2 : i32, i32, i32, i32
  }
  func.func @transform_8(%arg0: i32) -> (i32, i32, i32, i32) {
    %c0_i32 = arith.constant 0 : i32
    %c0_i32_0 = arith.constant 0 : i32
    %c0_i32_1 = arith.constant 0 : i32
    %c0_i32_2 = arith.constant 0 : i32
    %c0_i32_3 = arith.constant 0 : i32
    return %c0_i32, %c0_i32_0, %c0_i32_1, %c0_i32_2 : i32, i32, i32, i32
  }
  func.func @transform_9(%arg0: i32) -> (i32, i32, i32, i32) {
    %c0_i32 = arith.constant 0 : i32
    %c0_i32_0 = arith.constant 0 : i32
    %c0_i32_1 = arith.constant 0 : i32
    %c0_i32_2 = arith.constant 0 : i32
    %c0_i32_3 = arith.constant 0 : i32
    return %c0_i32, %c0_i32_0, %c0_i32_1, %c0_i32_2 : i32, i32, i32, i32
  }
  func.func @transform_10(%arg0: i32) -> (i32, i32, i32, i32) {
    %c0_i32 = arith.constant 0 : i32
    %c0_i32_0 = arith.constant 0 : i32
    %c0_i32_1 = arith.constant 0 : i32
    %c0_i32_2 = arith.constant 0 : i32
    %c0_i32_3 = arith.constant 0 : i32
    return %c0_i32, %c0_i32_0, %c0_i32_1, %c0_i32_2 : i32, i32, i32, i32
  }
  func.func @transform_11(%arg0: i32) -> (i32, i32, i32, i32) {
    %c0_i32 = arith.constant 0 : i32
    %c0_i32_0 = arith.constant 0 : i32
    %c0_i32_1 = arith.constant 0 : i32
    %c0_i32_2 = arith.constant 0 : i32
    %c0_i32_3 = arith.constant 0 : i32
    return %c0_i32, %c0_i32_0, %c0_i32_1, %c0_i32_2 : i32, i32, i32, i32
  }
  func.func @transform_12(%arg0: i32) -> (i32, i32, i32, i32) {
    %c0_i32 = arith.constant 0 : i32
    %c0_i32_0 = arith.constant 0 : i32
    %c0_i32_1 = arith.constant 0 : i32
    %c0_i32_2 = arith.constant 0 : i32
    %c0_i32_3 = arith.constant 0 : i32
    return %c0_i32, %c0_i32_0, %c0_i32_1, %c0_i32_2 : i32, i32, i32, i32
  }
  func.func @transform_13(%arg0: i32) -> (i32, i32, i32) {
    %c0_i32 = arith.constant 0 : i32
    %c0_i32_0 = arith.constant 0 : i32
    %c0_i32_1 = arith.constant 0 : i32
    %c0_i32_2 = arith.constant 0 : i32
    return %c0_i32, %c0_i32_0, %c0_i32_1 : i32, i32, i32
  }
  func.func @transform_14(%arg0: i32) -> (i32, i32, i32) {
    %c0_i32 = arith.constant 0 : i32
    %c0_i32_0 = arith.constant 0 : i32
    %c0_i32_1 = arith.constant 0 : i32
    %c0_i32_2 = arith.constant 0 : i32
    return %c0_i32, %c0_i32_0, %c0_i32_1 : i32, i32, i32
  }
  func.func @transform_15(%arg0: i32) -> (i32, i32, i32) {
    %c0_i32 = arith.constant 0 : i32
    %c0_i32_0 = arith.constant 0 : i32
    %c0_i32_1 = arith.constant 0 : i32
    %c0_i32_2 = arith.constant 0 : i32
    return %c0_i32, %c0_i32_0, %c0_i32_1 : i32, i32, i32
  }
  func.func @transform_16(%arg0: i32) -> (i32, i32, i32) {
    %c0_i32 = arith.constant 0 : i32
    %c0_i32_0 = arith.constant 0 : i32
    %c0_i32_1 = arith.constant 0 : i32
    %c0_i32_2 = arith.constant 0 : i32
    return %c0_i32, %c0_i32_0, %c0_i32_1 : i32, i32, i32
  }
  func.func @transform_17(%arg0: i32) -> (i32, i32, i32) {
    %c0_i32 = arith.constant 0 : i32
    %c0_i32_0 = arith.constant 0 : i32
    %c0_i32_1 = arith.constant 0 : i32
    %c0_i32_2 = arith.constant 0 : i32
    return %c0_i32, %c0_i32_0, %c0_i32_1 : i32, i32, i32
  }
  func.func @transform_18(%arg0: i32) -> (i32, i32, i32) {
    %c0_i32 = arith.constant 0 : i32
    %c0_i32_0 = arith.constant 0 : i32
    %c0_i32_1 = arith.constant 0 : i32
    %c0_i32_2 = arith.constant 0 : i32
    return %c0_i32, %c0_i32_0, %c0_i32_1 : i32, i32, i32
  }
  func.func @transform_19(%arg0: i32) -> (i32, i32, i32) {
    %c0_i32 = arith.constant 0 : i32
    %c0_i32_0 = arith.constant 0 : i32
    %c0_i32_1 = arith.constant 0 : i32
    %c0_i32_2 = arith.constant 0 : i32
    return %c0_i32, %c0_i32_0, %c0_i32_1 : i32, i32, i32
  }
  func.func @transform_20(%arg0: i32) -> (i32, i32, i32) {
    %c0_i32 = arith.constant 0 : i32
    %c0_i32_0 = arith.constant 0 : i32
    %c0_i32_1 = arith.constant 0 : i32
    %c0_i32_2 = arith.constant 0 : i32
    return %c0_i32, %c0_i32_0, %c0_i32_1 : i32, i32, i32
  }
  func.func @transform_21(%arg0: i32) -> (i32, i32, i32) {
    %c0_i32 = arith.constant 0 : i32
    %c0_i32_0 = arith.constant 0 : i32
    %c0_i32_1 = arith.constant 0 : i32
    %c0_i32_2 = arith.constant 0 : i32
    return %c0_i32, %c0_i32_0, %c0_i32_1 : i32, i32, i32
  }
  func.func @transform_22(%arg0: i32) -> (i32, i32) {
    %c0_i32 = arith.constant 0 : i32
    %c0_i32_0 = arith.constant 0 : i32
    %c0_i32_1 = arith.constant 0 : i32
    return %c0_i32, %c0_i32_0 : i32, i32
  }
  func.func @transform_23(%arg0: i32) -> (i32, i32) {
    %c0_i32 = arith.constant 0 : i32
    %c0_i32_0 = arith.constant 0 : i32
    %c0_i32_1 = arith.constant 0 : i32
    return %c0_i32, %c0_i32_0 : i32, i32
  }
  func.func @transform_24(%arg0: i32) -> (i32, i32, i32) {
    %c0_i32 = arith.constant 0 : i32
    %c0_i32_0 = arith.constant 0 : i32
    %c0_i32_1 = arith.constant 0 : i32
    return %arg0, %c0_i32, %c0_i32_0 : i32, i32, i32
  }
}

</mosaic_0001>

<bundles_post_ra>
// kernel: tpu_custom_call.1
= control target key start
LH: loop header
LB: loop body
LE: loop exit
PB: predicated region body
PF: predicated region fallthrough
CT: control target
= control target key end

     0   :  { %s3850_s0 = inlined_call_operand.vmem [shape: f32[1,34,3], index: 0, kind: input, shape index: {}]   ;;  %s3851_s1 = inlined_call_operand.vmem [shape: f32[34,16], index: 1, kind: input, shape index: {}]   ;;  %s3852_s2 = inlined_call_operand.vmem [shape: f32[34,34], index: 2, kind: input, shape index: {}]   ;;  %s3853_s3 = inlined_call_operand.vmem [shape: f32[2,34], index: 3, kind: input, shape index: {}]   ;;  %s3854_s4 = inlined_call_operand.vmem [shape: f32[3,16], index: 4, kind: input, shape index: {}]   ;;  %s3855_s5 = inlined_call_operand.vmem [shape: f32[1,16], index: 5, kind: input, shape index: {}]   ;;  %s3856_s6 = inlined_call_operand.vmem [shape: f32[2,2,16,8], index: 6, kind: input, shape index: {}]   ;;  %s3857_s7 = inlined_call_operand.vmem [shape: f32[2,2,1,8], index: 7, kind: input, shape index: {}]   ;;  %s3858_s8 = inlined_call_operand.vmem [shape: f32[2,2,16,8], index: 8, kind: input, shape index: {}]   ;;  %s3859_s9 = inlined_call_operand.vmem [shape: f32[2,2,1,8], index: 9, kind: input, shape index: {}]   ;;  %s3860_s10 = inlined_call_operand.vmem [shape: f32[2,2,16,8], index: 10, kind: input, shape index: {}]   ;;  %s3861_s11 = inlined_call_operand.vmem [shape: f32[2,2,1,8], index: 11, kind: input, shape index: {}]   ;;  %s3862_s12 = inlined_call_operand.vmem [shape: f32[2,2,8,16], index: 12, kind: input, shape index: {}]   ;;  %s3863_s13 = inlined_call_operand.vmem [shape: f32[2,1,16], index: 13, kind: input, shape index: {}]   ;;  %s3864_s14 = inlined_call_operand.vmem [shape: f32[2,1,16], index: 14, kind: input, shape index: {}]   ;;  %s3865_s15 = inlined_call_operand.vmem [shape: f32[2,1,16], index: 15, kind: input, shape index: {}]   ;;  %s3866_s16 = inlined_call_operand.vmem [shape: f32[2,16,64], index: 16, kind: input, shape index: {}]   ;;  %s3867_s17 = inlined_call_operand.vmem [shape: f32[2,1,64], index: 17, kind: input, shape index: {}]   ;;  %s3868_s18 = inlined_call_operand.vmem [shape: f32[2,64,16], index: 18, kind: input, shape index: {}]   ;;  %s3869_s19 = inlined_call_operand.vmem [shape: f32[2,1,16], index: 19, kind: input, shape index: {}]   ;;  %s3870_s20 = inlined_call_operand.vmem [shape: f32[2,1,16], index: 20, kind: input, shape index: {}]   ;;  %s3871_s21 = inlined_call_operand.vmem [shape: f32[2,1,16], index: 21, kind: input, shape index: {}]   ;;  %s3872_s22 = inlined_call_operand.vmem [shape: f32[16,2], index: 22, kind: input, shape index: {}]   ;;  %s3873_s23 = inlined_call_operand.vmem [shape: f32[1,2], index: 23, kind: input, shape index: {}]   ;;  %s3874_s24 = inlined_call_operand.hbm [shape: f32[1,2,2], index: 24, kind: output, shape index: {}]  }
   0x1   :  { %3881 = sst [smem:[#allocation5_spill]] %s3850_s0 }
   0x2   :  { %3882 = sst [smem:[#allocation6_spill]] %s3851_s1 }
   0x3   :  { %3883 = sst [smem:[#allocation7_spill]] %s3852_s2 }
   0x4   :  { %3884 = sst [smem:[#allocation8_spill]] %s3853_s3 }
   0x5   :  { %3885 = sst [smem:[#allocation9_spill]] %s3854_s4 }
   0x6   :  { %3886 = sst [smem:[#allocation10_spill]] %s3855_s5 }
   0x7   :  { %3887 = sst [smem:[#allocation11_spill]] %s3856_s6 }
   0x8   :  { %3888 = sst [smem:[#allocation12_spill]] %s3857_s7 }
   0x9   :  { %3889 = sst [smem:[#allocation13_spill]] %s3858_s8 }
   0xa   :  { %s3890_s27 = sld [smem:[#allocation9_spill]]  ;;  %vm109_vm0 = vcmask 1042432   ;;  %vm93_vm1 = vcmask 23552  }
   0xb   :  { %s3891_s2 = sld [smem:[#allocation5_spill]] }
  0x10   :  { %v88_v0 = vld [vmem:[%s3890_s27] sm:$0x7] }
  0x11   :  { %v78_v1 = vld [vmem:[%s3891_s2] sm:$0xff]  ;;  %2413 = vmatpush.msk.msra.mxu0 %vm109_vm0, %v88_v0  ;;  %2633 = vmatpush.msk.msra.mxu3 %vm109_vm0, %v88_v0  ;;  %v81_v2 = vld [vmem:[%s3891_s2 + $0x18] sm:$0xff]  ;;  %v79_v3 = vld [vmem:[%s3891_s2 + $0x8] sm:$0xff] }
  0x12   :  { %2414 = vmatmul.msk.f32.vlgmr.msra.gmra.mxu0 %vm93_vm1, %v78_v1  ;;  %2417 = vmatmul.msk.f32.vlgmr.msra.gmra.mxu3 %vm93_vm1, %v81_v2  ;;  %v82_v4 = vld [vmem:[%s3891_s2 + $0x20] sm:$0x3] }
  0x1a   :  { %2415 = vmatmul.msk.f32.gmra.mxu0 %vm93_vm1, %v79_v3  ;;  %2418 = vmatmul.msk.f32.gmra.mxu3 %vm93_vm1, %v82_v4 }
  0x1b   :  { %29 = vsyncpa [#allocation3], 0  ;;  %v80_v5 = vld [vmem:[%s3891_s2 + $0x10] sm:$0xff]  ;;  %s3892_s26 = sld [smem:[#allocation11_spill]]  ;;  %v249_v8 = vld [vmem:[%s3860_s10 + $0x8] sm:$0xff]  ;;  %vm162_vm2 = vcmask 130048  }
  0x1c   :  { %s3893_s6 = sld [smem:[#allocation13_spill]]  ;;  %268 = vmatpush.msrb.mxu3 %v249_v8  ;;  %v248_v11 = vld [vmem:[%s3860_s10] sm:$0xff]  ;;  %vm286_vm3 = vcmask 64512   ;;  %vm421_vm4 = vcmask 1041408   ;;  %vm349_vm5 = vcmask 277504   ;;  %vm362_vm6 = vcmask 271360  }
  0x1d   :  { %s3894_s5 = sld [smem:[#allocation10_spill]]  ;;  %v2640_v43 = vld [vmem:[%s3859_s9] ss:$0 sm:$0xff]  ;;  %vm873_vm7 = vcmask 123904  }
  0x1e   :  { %269 = vmatpush.msrb.mxu3 %v248_v11  ;;  %s3895_s29 = sld [smem:[#allocation6_spill]]  ;;  %v2641_v45 = vld [vmem:[%s3861_s11] ss:$0 sm:$0xff] }
  0x1f   :  { %s3896_s25 = sld [smem:[#allocation12_spill]] }
  0x21   :  { %v157_v6 = vld [vmem:[%s3892_s26 + $0x8] sm:$0xff]  ;;  %v156_v9 = vld [vmem:[%s3892_s26] sm:$0xff]  ;;  %v2456_v17 = vld [vmem:[%s3892_s26 + $0x18] sm:$0xff] }
  0x22   :  { %2416 = vmatmul.msk.f32.gmra.mxu0 %vm93_vm1, %v80_v5  ;;  %v211_v7 = vld [vmem:[%s3893_s6 + $0x8] sm:$0xff]  ;;  %192 = vmatpush.msra.mxu1 %v157_v6  ;;  %v210_v10 = vld [vmem:[%s3893_s6] sm:$0xff]  ;;  %v2455_v18 = vld [vmem:[%s3892_s26 + $0x10] sm:$0xff] }
  0x23   :  { %230 = vmatpush.msra.mxu2 %v211_v7  ;;  %v2638_v12 = vld [vmem:[%s3894_s5] ss:$0 sm:$0xff]  ;;  %535 = vmatpush.msra.mxu3 %v2456_v17  ;;  %v2464_v61 = vld [vmem:[%s3893_s6 + $0x18] sm:$0xff]  ;;  %v2463_v62 = vld [vmem:[%s3893_s6 + $0x10] sm:$0xff] }
  0x24   :  { %193 = vmatpush.msra.mxu1 %v156_v9  ;;  %v145_v14 = vld [vmem:[%s3895_s29] sm:$0xff]  ;;  %v146_v20 = vld [vmem:[%s3895_s29 + $0x8] sm:$0xff]  ;;  %v147_v24 = vld [vmem:[%s3895_s29 + $0x10] sm:$0xff] }
  0x25   :  { %231 = vmatpush.msra.mxu2 %v210_v10  ;;  %536 = vmatpush.msra.mxu3 %v2455_v18  ;;  %v148_v29 = vld [vmem:[%s3895_s29 + $0x18] sm:$0xff]  ;;  %v149_v33 = vld [vmem:[%s3895_s29 + $0x20] sm:$0x3]  ;;  %s3897_s29 = sld [smem:[#allocation7_spill]] }
  0x26   :  { %v2639_v57 = vld [vmem:[%s3896_s25] ss:$0 sm:$0xff] }
  0x2b   :  { %v3093_v6 = vld [vmem:[%s3897_s29] sm:$0xff]  ;;  %v3100_v10 = vld [vmem:[%s3897_s29 + $0x8] sm:$0xff] }
  0x8f   :  { %v130_v13 = vpop.f32.mrf.mxu0 }
  0x90   :  { %v131_v15 = vadd.f32 %v2638_v12, %v130_v13 }
  0x92   :  { %v2988_v16 = vadd.f32 %v145_v14, %v131_v15  ;;  %v3107_v14 = vld [vmem:[%s3897_s29 + $0x10] sm:$0xff] }
  0x94   :  { %2419 = vmatmul.msk.f32.vlgmr.msra.gmra.mxu1 %vm162_vm2, %v2988_v16  ;;  %2424 = vmatmul.msk.f32.vlgmr.msra.gmra.mxu2 %vm162_vm2, %v2988_v16 }
  0x95   :  { %2429 = vmatmul.msk.f32.vlgmr.msrb.gmra.mxu3 %vm162_vm2, %v2988_v16  ;;  %v139_v25 = vpop.f32.mrf.mxu3 }
  0x96   :  { %v140_v28 = vadd.f32 %v2638_v12, %v139_v25 }
  0x97   :  { %v133_v19 = vpop.f32.mrf.mxu0 }
  0x98   :  { %v134_v21 = vadd.f32 %v2638_v12, %v133_v19  ;;  %v3027_v30 = vadd.f32 %v148_v29, %v140_v28  ;;  %v3114_v19 = vld [vmem:[%s3897_s29 + $0x18] sm:$0xff] }
  0x9a   :  { %v3005_v22 = vadd.f32 %v146_v20, %v134_v21 }
  0x9c   :  { %2420 = vmatmul.msk.f32.gmra.mxu1 %vm162_vm2, %v3005_v22  ;;  %2425 = vmatmul.msk.f32.gmra.mxu2 %vm162_vm2, %v3005_v22 }
  0x9d   :  { %2430 = vmatmul.msk.f32.gmra.mxu3 %vm162_vm2, %v3005_v22  ;;  %v142_v31 = vpop.f32.mrf.mxu3 }
  0x9e   :  { %v143_v32 = vadd.f32 %v2638_v12, %v142_v31 }
  0x9f   :  { %v136_v23 = vpop.f32.mrf.mxu0 }
  0xa0   :  { %v137_v26 = vadd.f32 %v2638_v12, %v136_v23  ;;  %v3038_v34 = vadd.f32 %v149_v33, %v143_v32 }
  0xa2   :  { %v3016_v27 = vadd.f32 %v147_v24, %v137_v26  ;;  %v3121_v24 = vld [vmem:[%s3897_s29 + $0x20] sm:$0x3] }
  0xa4   :  { %2421 = vmatmul.msk.f32.gmra.mxu1 %vm162_vm2, %v3016_v27  ;;  %2426 = vmatmul.msk.f32.gmra.mxu2 %vm162_vm2, %v3016_v27 }
  0xa5   :  { %2431 = vmatmul.msk.f32.gmra.mxu3 %vm162_vm2, %v3016_v27 }
  0xac   :  { %2422 = vmatmul.msk.f32.gmra.mxu1 %vm162_vm2, %v3027_v30  ;;  %2427 = vmatmul.msk.f32.gmra.mxu2 %vm162_vm2, %v3027_v30 }
  0xad   :  { %2432 = vmatmul.msk.f32.gmra.mxu3 %vm162_vm2, %v3027_v30 }
  0xb4   :  { %2423 = vmatmul.msk.f32.gmra.mxu1 %vm162_vm2, %v3038_v34  ;;  %2428 = vmatmul.msk.f32.gmra.mxu2 %vm162_vm2, %v3038_v34 }
  0xb5   :  { %2433 = vmatmul.msk.f32.gmra.mxu3 %vm162_vm2, %v3038_v34 }
  0xbd   :  { %2458 = vmatmul.msk.f32.vlgmr.msra.gmra.mxu3 %vm162_vm2, %v2988_v16 }
  0xc5   :  { %2459 = vmatmul.msk.f32.gmra.mxu3 %vm162_vm2, %v3005_v22 }
  0xcd   :  { %2460 = vmatmul.msk.f32.gmra.mxu3 %vm162_vm2, %v3016_v27 }
  0xd5   :  { %2461 = vmatmul.msk.f32.gmra.mxu3 %vm162_vm2, %v3027_v30 }
  0xdd   :  { %2462 = vmatmul.msk.f32.gmra.mxu3 %vm162_vm2, %v3038_v34 }
 0x111   :  { %v195_v53 = vpop.f32.mrf.mxu1 }
 0x112   :  { %v196_v60 = vadd.f32 %v2639_v57, %v195_v53 }
 0x117   :  { %v233_v35 = vpop.f32.mrf.mxu2 }
 0x118   :  { %v271_v36 = vpop.f32.mrf.mxu3  ;;  %v234_v58 = vadd.f32 %v2640_v43, %v233_v35 }
 0x119   :  { %v272_v55 = vadd.f32 %v2641_v45, %v271_v36  ;;  %v198_v59 = vpop.f32.mrf.mxu1 }
 0x11a   :  { %v199_v63 = vadd.f32 %v2639_v57, %v198_v59 }
 0x11f   :  { %v236_v37 = vpop.f32.mrf.mxu2 }
 0x120   :  { %v274_v38 = vpop.f32.mrf.mxu3  ;;  %v237_v56 = vadd.f32 %v2640_v43, %v236_v37 }
 0x121   :  { %v275_v52 = vadd.f32 %v2641_v45, %v274_v38  ;;  %v201_v0 = vpop.f32.mrf.mxu1 }
 0x122   :  { %v202_v1 = vadd.f32 %v2639_v57, %v201_v0  ;;  %v2471_v0 = vld [vmem:[%s3860_s10 + $0x10] sm:$0xff] }
 0x127   :  { %v239_v39 = vpop.f32.mrf.mxu2 }
 0x128   :  { %v277_v40 = vpop.f32.mrf.mxu3  ;;  %v240_v54 = vadd.f32 %v2640_v43, %v239_v39 }
 0x129   :  { %v278_v51 = vadd.f32 %v2641_v45, %v277_v40  ;;  %v204_v2 = vpop.f32.mrf.mxu1 }
 0x12a   :  { %v205_v3 = vadd.f32 %v2639_v57, %v204_v2 }
 0x12f   :  { %v242_v41 = vpop.f32.mrf.mxu2 }
 0x130   :  { %v280_v42 = vpop.f32.mrf.mxu3  ;;  %v243_v50 = vadd.f32 %v2640_v43, %v242_v41 }
 0x131   :  { %v281_v49 = vadd.f32 %v2641_v45, %v280_v42  ;;  %v207_v4 = vpop.f32.mrf.mxu1 }
 0x132   :  { %v208_v5 = vadd.f32 %v2639_v57, %v207_v4 }
 0x137   :  { %v245_v44 = vpop.f32.mrf.mxu2 }
 0x138   :  { %v246_v46 = vadd.f32 %v2640_v43, %v245_v44  ;;  %v283_v47 = vpop.f32.mrf.mxu3 }
 0x139   :  { %v284_v48 = vadd.f32 %v2641_v45, %v283_v47 }
 0x13a   :  { %2434 = vmatpush.xpose.msk.msrb.mxu0 %vm286_vm3, %v246_v46 }
 0x13b   :  { %2444 = vmatpush.msk.msrb.mxu1 %vm421_vm4, %v284_v48 }
 0x13d   :  { %437 = vmatpush.msrb.mxu1 %v281_v49 }
 0x13e   :  { %2435 = vmatpush.xpose.msk.msrb.mxu0 %vm286_vm3, %v243_v50 }
 0x13f   :  { %438 = vmatpush.msrb.mxu1 %v278_v51 }
 0x141   :  { %439 = vmatpush.msrb.mxu1 %v275_v52 }
 0x142   :  { %2436 = vmatpush.xpose.msk.msrb.mxu0 %vm286_vm3, %v240_v54 }
 0x143   :  { %440 = vmatpush.msrb.mxu1 %v272_v55 }
 0x145   :  { %2634 = vmatpush.msra.mxu1 %v2464_v61 }
 0x146   :  { %2437 = vmatpush.xpose.msk.msrb.mxu0 %vm286_vm3, %v237_v56 }
 0x147   :  { %2635 = vmatpush.msra.mxu1 %v2463_v62 }
 0x14a   :  { %2438 = vmatpush.xpose.msk.msrb.mxu0 %vm286_vm3, %v234_v58 }
 0x14d   :  { %2439 = vmatmul.msk.f32.vlgmr.msrb.gmra.mxu0 %vm286_vm3, %v196_v60 }
 0x14e   :  { %575 = vmatpush.msra.mxu0 %v2464_v61 }
 0x150   :  { %576 = vmatpush.msra.mxu0 %v2463_v62 }
 0x155   :  { %2440 = vmatmul.msk.f32.gmra.mxu0 %vm286_vm3, %v199_v63  ;;  %v2472_v63 = vld [vmem:[%s3860_s10 + $0x18] sm:$0xff] }
 0x15d   :  { %2441 = vmatmul.msk.f32.gmra.mxu0 %vm286_vm3, %v202_v1 }
 0x165   :  { %2442 = vmatmul.msk.f32.gmra.mxu0 %vm286_vm3, %v205_v3 }
 0x16d   :  { %2443 = vmatmul.msk.f32.gmra.mxu0 %vm286_vm3, %v208_v5 }
 0x175   :  { %2466 = vmatmul.msk.f32.vlgmr.msra.gmra.mxu0 %vm162_vm2, %v2988_v16 }
 0x17d   :  { %2467 = vmatmul.msk.f32.gmra.mxu0 %vm162_vm2, %v3005_v22 }
 0x185   :  { %2468 = vmatmul.msk.f32.gmra.mxu0 %vm162_vm2, %v3016_v27 }
 0x18d   :  { %2469 = vmatmul.msk.f32.gmra.mxu0 %vm162_vm2, %v3027_v30 }
 0x1ca   :  { %v334_v7 = vpop.f32.mrf.mxu0 }
 0x1cb   :  { %v335_v8 = vadd.f32 %v334_v7, %v3093_v6 }
 0x1cd   :  { %v350_v9 = vsel %vm349_vm5, %v335_v8, -inf }
 0x1ce   :  { %351 = vmax.xlane.f32.xlu0 %v350_v9 }
 0x1d2   :  { %v337_v11 = vpop.f32.mrf.mxu0 }
 0x1d3   :  { %v338_v12 = vadd.f32 %v337_v11, %v3100_v10  ;;  %v457_v11 = vld [vmem:[%s3862_s12] sm:$0xff] }
 0x1d4   :  { %488 = vmatpush.msrb.mxu2 %v457_v11 }
 0x1d5   :  { %v353_v13 = vsel %vm349_vm5, %v338_v12, -inf }
 0x1d6   :  { %354 = vmax.xlane.f32.xlu0 %v353_v13 }
 0x1da   :  { %v340_v15 = vpop.f32.mrf.mxu0 }
 0x1db   :  { %v341_v17 = vadd.f32 %v340_v15, %v3107_v14 }
 0x1dd   :  { %v356_v18 = vsel %vm349_vm5, %v341_v17, -inf }
 0x1de   :  { %357 = vmax.xlane.f32.xlu1 %v356_v18 }
 0x1e2   :  { %v343_v20 = vpop.f32.mrf.mxu0 }
 0x1e3   :  { %v344_v21 = vadd.f32 %v343_v20, %v3114_v19 }
 0x1e5   :  { %v359_v23 = vsel %vm349_vm5, %v344_v21, -inf }
 0x1e6   :  { %360 = vmax.xlane.f32.xlu1 %v359_v23 }
 0x1ea   :  { %v346_v25 = vpop.f32.mrf.mxu0 }
 0x1eb   :  { %v347_v26 = vadd.f32 %v346_v25, %v3121_v24  ;;  %v2643_v25 = vld [vmem:[%s3859_s9 + $0x1] ss:$0 sm:$0xff] }
 0x1ed   :  { %v363_v28 = vsel %vm362_vm6, %v347_v26, -inf }
 0x1ee   :  { %364 = vmax.xlane.f32.xlu2 %v363_v28 }
 0x1f2   :  { %v578_v15 = vpop.f32.mrf.mxu0 }
 0x1fa   :  { %v581_v18 = vpop.f32.mrf.mxu0 }
 0x241   :  { %v352_v29 = vpop.xlane.xlu0 %351 }
 0x242   :  { %v366_v31 = vsub.f32 %v335_v8, %v352_v29 }
 0x244   :  { %v371_v32 = vmul.f32 1.442695, %v366_v31 }
 0x246   :  { %2666 = vpow2.f32 %v371_v32 }
 0x249   :  { %v355_v33 = vpop.xlane.xlu0 %354 }
 0x24a   :  { %v367_v35 = vsub.f32 %v338_v12, %v355_v33  ;;  %v538_v33 = vpop.f32.mrf.mxu3 }
 0x24c   :  { %v2667_v36 = vpop.eup %2666  ;;  %v373_v37 = vmul.f32 1.442695, %v367_v35 }
 0x24d   :  { %v381_v38 = vsel %vm349_vm5, %v2667_v36, 0.0 }
 0x24e   :  { %2668 = vpow2.f32 %v373_v37  ;;  %382 = vadd.xlane.f32.xlu2 %v381_v38  ;;  %v2642_v37 = vld [vmem:[%s3896_s25 + $0x1] ss:$0 sm:$0xff] }
 0x251   :  { %v358_v39 = vpop.xlane.xlu1 %357 }
 0x252   :  { %v368_v40 = vsub.f32 %v341_v17, %v358_v39  ;;  %v579_v39 = vadd.f32 %v2643_v25, %v578_v15 }
 0x254   :  { %v2669_v41 = vpop.eup %2668  ;;  %v375_v42 = vmul.f32 1.442695, %v368_v40  ;;  %v541_v40 = vpop.f32.mrf.mxu3 }
 0x255   :  { %v384_v43 = vsel %vm349_vm5, %v2669_v41, 0.0 }
 0x256   :  { %2670 = vpow2.f32 %v375_v42  ;;  %385 = vadd.xlane.f32.xlu0 %v384_v43  ;;  %v542_v43 = vadd.f32 %v2642_v37, %v541_v40 }
 0x259   :  { %v361_v44 = vpop.xlane.xlu1 %360 }
 0x25a   :  { %v369_v45 = vsub.f32 %v344_v21, %v361_v44  ;;  %v584_v21 = vpop.f32.mrf.mxu0 }
 0x25b   :  { %v585_v35 = vadd.f32 %v2643_v25, %v584_v21 }
 0x25c   :  { %v2671_v46 = vpop.eup %2670  ;;  %v377_v47 = vmul.f32 1.442695, %v369_v45  ;;  %v544_v44 = vpop.f32.mrf.mxu3 }
 0x25d   :  { %v387_v48 = vsel %vm349_vm5, %v2671_v46, 0.0 }
 0x25e   :  { %2672 = vpow2.f32 %v377_v47  ;;  %388 = vadd.xlane.f32.xlu1 %v387_v48  ;;  %v2644_v48 = vld [vmem:[%s3861_s11 + $0x1] ss:$0 sm:$0xff] }
 0x261   :  { %v365_v49 = vpop.xlane.xlu2 %364 }
 0x262   :  { %v370_v50 = vsub.f32 %v347_v26, %v365_v49  ;;  %v587_v29 = vpop.f32.mrf.mxu0 }
 0x263   :  { %v588_v31 = vadd.f32 %v2643_v25, %v587_v29 }
 0x264   :  { %v2673_v51 = vpop.eup %2672  ;;  %v379_v52 = vmul.f32 1.442695, %v370_v50  ;;  %v547_v47 = vpop.f32.mrf.mxu3 }
 0x265   :  { %v390_v53 = vsel %vm349_vm5, %v2673_v51, 0.0 }
 0x266   :  { %2674 = vpow2.f32 %v379_v52  ;;  %391 = vadd.xlane.f32.xlu2 %v390_v53  ;;  %v548_v52 = vadd.f32 %v2642_v37, %v547_v47 }
 0x26c   :  { %v2675_v54 = vpop.eup %2674 }
 0x26d   :  { %v393_v55 = vsel %vm362_vm6, %v2675_v54, 0.0 }
 0x26e   :  { %394 = vadd.xlane.f32.xlu0 %v393_v55  ;;  %v550_v55 = vpop.f32.mrf.mxu3 }
 0x2c1   :  { %v383_v56 = vpop.xlane.xlu2 %382 }
 0x2c2   :  { %2676 = vrcp.f32 %v383_v56 }
 0x2c8   :  { %v2677_v57 = vpop.eup %2676 }
 0x2c9   :  { %v386_v58 = vpop.xlane.xlu0 %385  ;;  %v401_v59 = vmul.f32 %v2677_v57, %v2667_v36  ;;  %v582_v36 = vadd.f32 %v2643_v25, %v581_v18  ;;  %v551_v57 = vadd.f32 %v2642_v37, %v550_v55 }
 0x2ca   :  { %2678 = vrcp.f32 %v386_v58 }
 0x2cb   :  { %2445 = vmatmul.msk.f32.vlgmr.msrb.gmra.mxu1 %vm349_vm5, %v401_v59 }
 0x2cc   :  { %615 = vmatpush.msrb.mxu1 %v2472_v63 }
 0x2ce   :  { %616 = vmatpush.msrb.mxu1 %v2471_v0 }
 0x2d0   :  { %v2679_v60 = vpop.eup %2678 }
 0x2d1   :  { %v389_v61 = vpop.xlane.xlu1 %388  ;;  %v402_v62 = vmul.f32 %v2679_v60, %v2669_v41  ;;  %v539_v41 = vadd.f32 %v2642_v37, %v538_v33 }
 0x2d2   :  { %2680 = vrcp.f32 %v389_v61 }
 0x2d3   :  { %2446 = vmatmul.msk.f32.gmra.mxu1 %vm349_vm5, %v402_v62 }
 0x2d8   :  { %v2681_v1 = vpop.eup %2680 }
 0x2d9   :  { %v392_v2 = vpop.xlane.xlu2 %391  ;;  %v403_v3 = vmul.f32 %v2681_v1, %v2671_v46  ;;  %v545_v46 = vadd.f32 %v2642_v37, %v544_v44 }
 0x2da   :  { %2682 = vrcp.f32 %v392_v2 }
 0x2db   :  { %2447 = vmatmul.msk.f32.gmra.mxu1 %vm349_vm5, %v403_v3 }
 0x2e0   :  { %v2683_v4 = vpop.eup %2682 }
 0x2e1   :  { %v395_v5 = vpop.xlane.xlu0 %394  ;;  %v404_v7 = vmul.f32 %v2683_v4, %v2673_v51 }
 0x2e2   :  { %2684 = vrcp.f32 %v395_v5 }
 0x2e3   :  { %2448 = vmatmul.msk.f32.gmra.mxu1 %vm349_vm5, %v404_v7 }
 0x2e8   :  { %v2685_v8 = vpop.eup %2684 }
 0x2e9   :  { %v405_v9 = vmul.f32 %v2685_v8, %v2675_v54 }
 0x2eb   :  { %2449 = vmatmul.msk.f32.gmra.mxu1 %vm349_vm5, %v405_v9 }
 0x2f3   :  { %2470 = vmatmul.msk.f32.vlgmr.msra.gmra.mxu1 %vm162_vm2, %v3038_v34 }
 0x2fb   :  { %2474 = vmatmul.msk.f32.vlgmr.msrb.gmra.mxu1 %vm162_vm2, %v2988_v16 }
 0x303   :  { %2475 = vmatmul.msk.f32.gmra.mxu1 %vm162_vm2, %v3005_v22 }
 0x30b   :  { %2476 = vmatmul.msk.f32.gmra.mxu1 %vm162_vm2, %v3016_v27 }
 0x313   :  { %2477 = vmatmul.msk.f32.gmra.mxu1 %vm162_vm2, %v3027_v30 }
 0x31b   :  { %2478 = vmatmul.msk.f32.gmra.mxu1 %vm162_vm2, %v3038_v34 }
 0x348   :  { %v442_v12 = vpop.f32.mrf.mxu1 }
 0x349   :  { %2450 = vmatmul.msk.f32.vlgmr.msrb.gmra.mxu2 %vm286_vm3, %v442_v12 }
 0x350   :  { %v445_v13 = vpop.f32.mrf.mxu1 }
 0x351   :  { %2451 = vmatmul.msk.f32.gmra.mxu2 %vm286_vm3, %v445_v13 }
 0x358   :  { %v448_v17 = vpop.f32.mrf.mxu1 }
 0x359   :  { %2452 = vmatmul.msk.f32.gmra.mxu2 %vm286_vm3, %v448_v17 }
 0x360   :  { %v451_v20 = vpop.f32.mrf.mxu1 }
 0x361   :  { %2453 = vmatmul.msk.f32.gmra.mxu2 %vm286_vm3, %v451_v20 }
 0x368   :  { %v454_v23 = vpop.f32.mrf.mxu1 }
 0x369   :  { %2454 = vmatmul.msk.f32.gmra.mxu2 %vm286_vm3, %v454_v23 }
 0x370   :  { %v590_v26 = vpop.f32.mrf.mxu1 }
 0x371   :  { %v591_v28 = vadd.f32 %v2643_v25, %v590_v26 }
 0x373   :  { %2479 = vmatpush.xpose.msk.msra.mxu2 %vm286_vm3, %v591_v28 }
 0x377   :  { %2480 = vmatpush.xpose.msk.msra.mxu2 %vm286_vm3, %v588_v31 }
 0x378   :  { %v618_v32 = vpop.f32.mrf.mxu1 }
 0x379   :  { %v619_v56 = vadd.f32 %v2644_v48, %v618_v32 }
 0x37b   :  { %2481 = vmatpush.xpose.msk.msra.mxu2 %vm286_vm3, %v585_v35 }
 0x37f   :  { %2482 = vmatpush.xpose.msk.msra.mxu2 %vm286_vm3, %v582_v36 }
 0x380   :  { %v621_v38 = vpop.f32.mrf.mxu1 }
 0x381   :  { %v622_v54 = vadd.f32 %v2644_v48, %v621_v38 }
 0x383   :  { %2483 = vmatpush.xpose.msk.msra.mxu2 %vm286_vm3, %v579_v39 }
 0x386   :  { %2484 = vmatmul.msk.f32.vlgmr.msra.gmra.mxu2 %vm286_vm3, %v539_v41 }
 0x388   :  { %v624_v42 = vpop.f32.mrf.mxu1 }
 0x389   :  { %v625_v53 = vadd.f32 %v2644_v48, %v624_v42 }
 0x38e   :  { %2485 = vmatmul.msk.f32.gmra.mxu2 %vm286_vm3, %v542_v43 }
 0x390   :  { %v627_v45 = vpop.f32.mrf.mxu1 }
 0x391   :  { %v628_v51 = vadd.f32 %v2644_v48, %v627_v45 }
 0x396   :  { %2486 = vmatmul.msk.f32.gmra.mxu2 %vm286_vm3, %v545_v46 }
 0x398   :  { %v630_v49 = vpop.f32.mrf.mxu1 }
 0x399   :  { %v631_v50 = vadd.f32 %v2644_v48, %v630_v49  ;;  %v2495_v48 = vld [vmem:[%s3862_s12 + $0x8] sm:$0xff] }
 0x39a   :  { %832 = vmatpush.msrb.mxu0 %v2495_v48 }
 0x39b   :  { %2489 = vmatpush.msk.msrb.mxu3 %vm421_vm4, %v631_v50 }
 0x39d   :  { %780 = vmatpush.msrb.mxu3 %v628_v51 }
 0x39e   :  { %2487 = vmatmul.msk.f32.gmra.mxu2 %vm286_vm3, %v548_v52 }
 0x39f   :  { %781 = vmatpush.msrb.mxu3 %v625_v53 }
 0x3a1   :  { %782 = vmatpush.msrb.mxu3 %v622_v54 }
 0x3a3   :  { %783 = vmatpush.msrb.mxu3 %v619_v56 }
 0x3a6   :  { %2488 = vmatmul.msk.f32.gmra.mxu2 %vm286_vm3, %v551_v57 }
 0x3cc   :  { %v3181_v58 = vpop.f32.mrf.mxu2 }
 0x3d4   :  { %v3183_v59 = vpop.f32.mrf.mxu2 }
 0x3dc   :  { %v3185_v60 = vpop.f32.mrf.mxu2 }
 0x3e4   :  { %v3187_v61 = vpop.f32.mrf.mxu2 }
 0x3ec   :  { %v3189_v62 = vpop.f32.mrf.mxu2 }
 0x409   :  { %v680_v63 = vpop.f32.mrf.mxu2 }
 0x40a   :  { %v681_v0 = vadd.f32 %v680_v63, %v3093_v6 }
 0x40c   :  { %v695_v1 = vsel %vm349_vm5, %v681_v0, -inf }
 0x40d   :  { %696 = vmax.xlane.f32.xlu1 %v695_v1 }
 0x411   :  { %v683_v2 = vpop.f32.mrf.mxu2 }
 0x412   :  { %v684_v3 = vadd.f32 %v683_v2, %v3100_v10 }
 0x414   :  { %v698_v4 = vsel %vm349_vm5, %v684_v3, -inf }
 0x415   :  { %699 = vmax.xlane.f32.xlu2 %v698_v4 }
 0x419   :  { %v686_v5 = vpop.f32.mrf.mxu2 }
 0x41a   :  { %v687_v7 = vadd.f32 %v686_v5, %v3107_v14 }
 0x41c   :  { %v701_v8 = vsel %vm349_vm5, %v687_v7, -inf }
 0x41d   :  { %702 = vmax.xlane.f32.xlu0 %v701_v8 }
 0x421   :  { %v689_v9 = vpop.f32.mrf.mxu2 }
 0x422   :  { %v690_v11 = vadd.f32 %v689_v9, %v3114_v19 }
 0x424   :  { %v704_v6 = vsel %vm349_vm5, %v690_v11, -inf }
 0x425   :  { %705 = vmax.xlane.f32.xlu1 %v704_v6 }
 0x429   :  { %v692_v12 = vpop.f32.mrf.mxu2 }
 0x42a   :  { %v693_v13 = vadd.f32 %v692_v12, %v3121_v24 }
 0x42c   :  { %v707_v10 = vsel %vm362_vm6, %v693_v13, -inf }
 0x42d   :  { %708 = vmax.xlane.f32.xlu2 %v707_v10 }
 0x480   :  { %v697_v15 = vpop.xlane.xlu1 %696 }
 0x481   :  { %v710_v17 = vsub.f32 %v681_v0, %v697_v15 }
 0x483   :  { %v715_v18 = vmul.f32 1.442695, %v710_v17 }
 0x485   :  { %2686 = vpow2.f32 %v715_v18 }
 0x488   :  { %v700_v14 = vpop.xlane.xlu2 %699 }
 0x489   :  { %v711_v20 = vsub.f32 %v684_v3, %v700_v14 }
 0x48b   :  { %v2687_v21 = vpop.eup %2686  ;;  %v717_v23 = vmul.f32 1.442695, %v711_v20 }
 0x48c   :  { %v725_v25 = vsel %vm349_vm5, %v2687_v21, 0.0 }
 0x48d   :  { %2688 = vpow2.f32 %v717_v23  ;;  %726 = vadd.xlane.f32.xlu0 %v725_v25 }
 0x490   :  { %v703_v19 = vpop.xlane.xlu0 %702 }
 0x491   :  { %v712_v26 = vsub.f32 %v687_v7, %v703_v19  ;;  %v2645_v7 = vld [vmem:[%s3863_s13] ss:$0 sm:$0xff] }
 0x492   :  { %v508_v8 = vadd.f32 %v2645_v7, %v3181_v58  ;;  %v510_v14 = vadd.f32 %v2645_v7, %v3185_v60  ;;  %v511_v23 = vadd.f32 %v2645_v7, %v3187_v61 }
 0x493   :  { %v2689_v28 = vpop.eup %2688  ;;  %v719_v29 = vmul.f32 1.442695, %v712_v26  ;;  %v512_v26 = vadd.f32 %v2645_v7, %v3189_v62 }
 0x494   :  { %v728_v24 = vsel %vm349_vm5, %v2689_v28, 0.0 }
 0x495   :  { %2690 = vpow2.f32 %v719_v29  ;;  %729 = vadd.xlane.f32.xlu1 %v728_v24  ;;  %v2819_v24 = vmov 16.0  }
 0x498   :  { %v706_v31 = vpop.xlane.xlu1 %705 }
 0x499   :  { %v713_v32 = vsub.f32 %v690_v11, %v706_v31 }
 0x49b   :  { %v2691_v33 = vpop.eup %2690  ;;  %v721_v35 = vmul.f32 1.442695, %v713_v32 }
 0x49c   :  { %v731_v36 = vsel %vm349_vm5, %v2691_v33, 0.0 }
 0x49d   :  { %2692 = vpow2.f32 %v721_v35  ;;  %732 = vadd.xlane.f32.xlu2 %v731_v36 }
 0x4a0   :  { %v709_v37 = vpop.xlane.xlu2 %708 }
 0x4a1   :  { %v714_v38 = vsub.f32 %v693_v13, %v709_v37  ;;  %v509_v13 = vadd.f32 %v2645_v7, %v3183_v59 }
 0x4a3   :  { %v2693_v39 = vpop.eup %2692  ;;  %v723_v40 = vmul.f32 1.442695, %v714_v38 }
 0x4a4   :  { %v734_v41 = vsel %vm349_vm5, %v2693_v39, 0.0 }
 0x4a5   :  { %2694 = vpow2.f32 %v723_v40  ;;  %735 = vadd.xlane.f32.xlu0 %v734_v41 }
 0x4ab   :  { %v2695_v42 = vpop.eup %2694 }
 0x4ac   :  { %v737_v43 = vsel %vm362_vm6, %v2695_v42, 0.0 }
 0x4ad   :  { %738 = vadd.xlane.f32.xlu1 %v737_v43 }
 0x500   :  { %v727_v44 = vpop.xlane.xlu0 %726 }
 0x501   :  { %2696 = vrcp.f32 %v727_v44 }
 0x507   :  { %v2697_v45 = vpop.eup %2696 }
 0x508   :  { %v745_v46 = vmul.f32 %v2697_v45, %v2687_v21  ;;  %v730_v47 = vpop.xlane.xlu1 %729 }
 0x509   :  { %2698 = vrcp.f32 %v730_v47 }
 0x50a   :  { %2490 = vmatmul.msk.f32.vlgmr.msrb.gmra.mxu3 %vm349_vm5, %v745_v46 }
 0x50f   :  { %v2699_v49 = vpop.eup %2698 }
 0x510   :  { %v733_v50 = vpop.xlane.xlu2 %732  ;;  %v746_v51 = vmul.f32 %v2699_v49, %v2689_v28 }
 0x511   :  { %2700 = vrcp.f32 %v733_v50 }
 0x512   :  { %2491 = vmatmul.msk.f32.gmra.mxu3 %vm349_vm5, %v746_v51 }
 0x517   :  { %v2701_v52 = vpop.eup %2700 }
 0x518   :  { %v736_v53 = vpop.xlane.xlu0 %735  ;;  %v747_v54 = vmul.f32 %v2701_v52, %v2691_v33 }
 0x519   :  { %2702 = vrcp.f32 %v736_v53 }
 0x51a   :  { %2492 = vmatmul.msk.f32.gmra.mxu3 %vm349_vm5, %v747_v54 }
 0x51f   :  { %v2703_v55 = vpop.eup %2702 }
 0x520   :  { %v739_v56 = vpop.xlane.xlu1 %738  ;;  %v748_v57 = vmul.f32 %v2703_v55, %v2693_v39 }
 0x521   :  { %2704 = vrcp.f32 %v739_v56 }
 0x522   :  { %2493 = vmatmul.msk.f32.gmra.mxu3 %vm349_vm5, %v748_v57  ;;  %2706 = vrcp.f32 %v2819_v24 }
 0x527   :  { %v2705_v63 = vpop.eup %2704 }
 0x528   :  { %v749_v0 = vmul.f32 %v2705_v63, %v2695_v42  ;;  %v2707_v61 = vpop.eup %2706 }
 0x529   :  { %v878_v31 = vmul.f32 16.0, %v2707_v61  ;;  %vm882_vm8 = vweird.f32 %v2707_v61 }
 0x52a   :  { %2494 = vmatmul.msk.f32.gmra.mxu3 %vm349_vm5, %v749_v0  ;;  %v996_v0 = vld [vmem:[%s3866_s16 + $0x8] sm:$0xff] }
 0x52b   :  { %v879_v32 = vsub.f32 1.0, %v878_v31  ;;  %1030 = vmatpush.msra.mxu1 %v996_v0  ;;  %v1060_v31 = vld [vmem:[%s3868_s18 + $0x38] sm:$0xff] }
 0x52c   :  { %1089 = vmatpush.msrb.mxu2 %v1060_v31 }
 0x52d   :  { %v880_v33 = vmul.f32 %v2707_v61, %v879_v32  ;;  %v1059_v32 = vld [vmem:[%s3868_s18 + $0x30] sm:$0xff] }
 0x52e   :  { %1090 = vmatpush.msrb.mxu2 %v1059_v32 }
 0x58d   :  { %v785_v1 = vpop.f32.mrf.mxu3 }
 0x58e   :  { %2496 = vmatmul.msk.f32.vlgmr.msrb.gmra.mxu0 %vm286_vm3, %v785_v1  ;;  %v995_v1 = vld [vmem:[%s3866_s16] sm:$0xff] }
 0x58f   :  { %1031 = vmatpush.msra.mxu1 %v995_v1 }
 0x595   :  { %v788_v2 = vpop.f32.mrf.mxu3 }
 0x596   :  { %2497 = vmatmul.msk.f32.gmra.mxu0 %vm286_vm3, %v788_v2 }
 0x59d   :  { %v791_v3 = vpop.f32.mrf.mxu3 }
 0x59e   :  { %2498 = vmatmul.msk.f32.gmra.mxu0 %vm286_vm3, %v791_v3 }
 0x5a5   :  { %v794_v4 = vpop.f32.mrf.mxu3 }
 0x5a6   :  { %2499 = vmatmul.msk.f32.gmra.mxu0 %vm286_vm3, %v794_v4 }
 0x5ad   :  { %v797_v5 = vpop.f32.mrf.mxu3 }
 0x5ae   :  { %2500 = vmatmul.msk.f32.gmra.mxu0 %vm286_vm3, %v797_v5 }
 0x60b   :  { %v834_v9 = vpop.f32.mrf.mxu0 }
 0x60c   :  { %v849_v11 = vadd.f32 %v834_v9, %v508_v8 }
 0x60e   :  { %v854_v6 = vadd.f32 %v849_v11, %v2988_v16 }
 0x610   :  { %v861_v12 = vsel %vm162_vm2, %v854_v6, 0.0 }
 0x611   :  { %862 = vadd.xlane.f32.xlu2 %v861_v12 }
 0x613   :  { %v837_v10 = vpop.f32.mrf.mxu0 }
 0x614   :  { %v850_v15 = vadd.f32 %v837_v10, %v509_v13 }
 0x616   :  { %v855_v17 = vadd.f32 %v850_v15, %v3005_v22 }
 0x618   :  { %v864_v18 = vsel %vm162_vm2, %v855_v17, 0.0 }
 0x619   :  { %865 = vadd.xlane.f32.xlu0 %v864_v18 }
 0x61b   :  { %v840_v20 = vpop.f32.mrf.mxu0 }
 0x61c   :  { %v851_v58 = vadd.f32 %v840_v20, %v510_v14 }
 0x61e   :  { %v856_v21 = vadd.f32 %v851_v58, %v3016_v27  ;;  %v3277_v58 = vld [vmem:[%s3864_s14] ss:$0 sm:$0xff] }
 0x620   :  { %v867_v16 = vsel %vm162_vm2, %v856_v21, 0.0 }
 0x621   :  { %868 = vadd.xlane.f32.xlu1 %v867_v16 }
 0x623   :  { %v843_v25 = vpop.f32.mrf.mxu0 }
 0x624   :  { %v852_v59 = vadd.f32 %v843_v25, %v511_v23  ;;  %v3282_v25 = vld [vmem:[%s3865_s15] ss:$0 sm:$0xff] }
 0x626   :  { %v857_v19 = vadd.f32 %v852_v59, %v3027_v30  ;;  %v881_v30 = vadd.f32 %v2707_v61, %v880_v33 }
 0x628   :  { %v870_v22 = vsel %vm162_vm2, %v857_v19, 0.0  ;;  %v3237_v35 = vsel %vm882_vm8, %v2707_v61, %v881_v30 }
 0x629   :  { %871 = vadd.xlane.f32.xlu2 %v870_v22 }
 0x62b   :  { %v846_v28 = vpop.f32.mrf.mxu0 }
 0x62c   :  { %v853_v60 = vadd.f32 %v846_v28, %v512_v26 }
 0x62e   :  { %v858_v29 = vadd.f32 %v853_v60, %v3038_v34 }
 0x630   :  { %v874_v27 = vsel %vm873_vm7, %v858_v29, 0.0 }
 0x631   :  { %875 = vadd.xlane.f32.xlu0 %v874_v27 }
 0x684   :  { %v863_v36 = vpop.xlane.xlu2 %862 }
 0x685   :  { %v884_v62 = vmul.f32 %v3237_v35, %v863_v36 }
 0x687   :  { %v889_v37 = vsub.f32 %v854_v6, %v884_v62  ;;  %v1058_v62 = vld [vmem:[%s3868_s18 + $0x28] sm:$0xff] }
 0x688   :  { %1091 = vmatpush.msrb.mxu2 %v1058_v62 }
 0x689   :  { %v894_v38 = vmul.f32 %v889_v37, %v889_v37 }
 0x68b   :  { %v899_v34 = vsel %vm162_vm2, %v894_v38, 0.0 }
 0x68c   :  { %v866_v39 = vpop.xlane.xlu0 %865  ;;  %900 = vadd.xlane.f32.xlu1 %v899_v34 }
 0x68d   :  { %v885_v40 = vmul.f32 %v3237_v35, %v866_v39 }
 0x68f   :  { %v3242_v41 = vsub.f32 %v855_v17, %v885_v40  ;;  %v1057_v40 = vld [vmem:[%s3868_s18 + $0x20] sm:$0xff] }
 0x690   :  { %1092 = vmatpush.msrb.mxu2 %v1057_v40 }
 0x691   :  { %v895_v42 = vmul.f32 %v3242_v41, %v3242_v41 }
 0x693   :  { %v902_v43 = vsel %vm162_vm2, %v895_v42, 0.0 }
 0x694   :  { %903 = vadd.xlane.f32.xlu2 %v902_v43  ;;  %v869_v44 = vpop.xlane.xlu1 %868 }
 0x695   :  { %v886_v45 = vmul.f32 %v3237_v35, %v869_v44 }
 0x697   :  { %v3248_v46 = vsub.f32 %v856_v21, %v886_v45  ;;  %v1056_v45 = vld [vmem:[%s3868_s18 + $0x18] sm:$0xff] }
 0x698   :  { %1093 = vmatpush.msrb.mxu2 %v1056_v45 }
 0x699   :  { %v896_v47 = vmul.f32 %v3248_v46, %v3248_v46 }
 0x69b   :  { %v905_v48 = vsel %vm162_vm2, %v896_v47, 0.0 }
 0x69c   :  { %v872_v49 = vpop.xlane.xlu2 %871  ;;  %906 = vadd.xlane.f32.xlu0 %v905_v48 }
 0x69d   :  { %v887_v50 = vmul.f32 %v3237_v35, %v872_v49 }
 0x69f   :  { %v3254_v51 = vsub.f32 %v857_v19, %v887_v50 }
 0x6a1   :  { %v897_v52 = vmul.f32 %v3254_v51, %v3254_v51 }
 0x6a3   :  { %v908_v53 = vsel %vm162_vm2, %v897_v52, 0.0 }
 0x6a4   :  { %909 = vadd.xlane.f32.xlu1 %v908_v53  ;;  %v876_v54 = vpop.xlane.xlu0 %875 }
 0x6a5   :  { %v888_v55 = vmul.f32 %v3237_v35, %v876_v54 }
 0x6a7   :  { %v3260_v56 = vsub.f32 %v858_v29, %v888_v55 }
 0x6a9   :  { %v898_v57 = vmul.f32 %v3260_v56, %v3260_v56 }
 0x6ab   :  { %v911_v63 = vsel %vm873_vm7, %v898_v57, 0.0 }
 0x6ac   :  { %912 = vadd.xlane.f32.xlu2 %v911_v63 }
 0x6ff   :  { %v901_v2 = vpop.xlane.xlu1 %900 }
 0x700   :  { %v914_v3 = vmul.f32 %v901_v2, %v3237_v35 }
 0x702   :  { %v919_v4 = vadd.f32 1e-05, %v914_v3 }
 0x704   :  { %2708 = vrsqrt.f32 %v919_v4  ;;  %vm930_vm10 = vweird.f32 %v919_v4 }
 0x707   :  { %v904_v5 = vpop.xlane.xlu2 %903 }
 0x708   :  { %v915_v7 = vmul.f32 %v904_v5, %v3237_v35 }
 0x70a   :  { %v2709_v8 = vpop.eup %2708  ;;  %v920_v9 = vadd.f32 1e-05, %v915_v7 }
 0x70b   :  { %v925_v11 = vmul.f32 %v2709_v8, %v919_v4  ;;  %vm931_vm9 = vweird.f32 %v2709_v8 }
 0x70c   :  { %2710 = vrsqrt.f32 %v920_v9  ;;  %vm932_vm11 = vmor %vm930_vm10, %vm931_vm9  ;;  %vm940_vm13 = vweird.f32 %v920_v9 }
 0x70d   :  { %v926_v6 = vmul.f32 %v2709_v8, %v925_v11 }
 0x70f   :  { %v927_v12 = vmul.f32 0.5, %v926_v6  ;;  %v907_v13 = vpop.xlane.xlu0 %906 }
 0x710   :  { %v916_v10 = vmul.f32 %v907_v13, %v3237_v35 }
 0x711   :  { %v928_v15 = vsub.f32 1.5, %v927_v12 }
 0x712   :  { %v2711_v17 = vpop.eup %2710  ;;  %v921_v18 = vadd.f32 1e-05, %v916_v10  ;;  %v1054_v10 = vld [vmem:[%s3868_s18 + $0x8] sm:$0xff] }
 0x713   :  { %v929_v14 = vmul.f32 %v2709_v8, %v928_v15  ;;  %v935_v20 = vmul.f32 %v2711_v17, %v920_v9  ;;  %vm941_vm12 = vweird.f32 %v2711_v17  ;;  %v2648_v15 = vld [vmem:[%s3867_s17] ss:$0 sm:$0xff] }
 0x714   :  { %2712 = vrsqrt.f32 %v921_v18  ;;  %vm942_vm14 = vmor %vm940_vm13, %vm941_vm12  ;;  %vm950_vm0 = vweird.f32 %v921_v18 }
 0x715   :  { %v933_v21 = vsel %vm932_vm11, %v2709_v8, %v929_v14  ;;  %v936_v16 = vmul.f32 %v2711_v17, %v935_v20 }
 0x716   :  { %v974_v23 = vmul.f32 %v933_v21, %v889_v37 }
 0x717   :  { %v937_v59 = vmul.f32 0.5, %v936_v16  ;;  %v910_v19 = vpop.xlane.xlu1 %909 }
 0x718   :  { %v982_v22 = vmul.f32 %v3277_v58, %v974_v23  ;;  %v917_v26 = vmul.f32 %v910_v19, %v3237_v35 }
 0x719   :  { %v938_v28 = vsub.f32 1.5, %v937_v59 }
 0x71a   :  { %v2713_v60 = vpop.eup %2712  ;;  %v922_v29 = vadd.f32 1e-05, %v917_v26  ;;  %v3287_v27 = vadd.f32 %v3282_v25, %v982_v22 }
 0x71b   :  { %v939_v24 = vmul.f32 %v2711_v17, %v938_v28  ;;  %v945_v61 = vmul.f32 %v2713_v60, %v921_v18  ;;  %vm951_vm15 = vweird.f32 %v2713_v60 }
 0x71c   :  { %2714 = vrsqrt.f32 %v922_v29  ;;  %2501 = vmatmul.msk.f32.vlgmr.msra.gmra.mxu1 %vm162_vm2, %v3287_v27  ;;  %vm952_vm1 = vmor %vm950_vm0, %vm951_vm15  ;;  %vm960_vm9 = vweird.f32 %v922_v29 }
 0x71d   :  { %v943_v33 = vsel %vm942_vm14, %v2711_v17, %v939_v24  ;;  %v946_v30 = vmul.f32 %v2713_v60, %v945_v61  ;;  %vm1065_vm14 = vcmask 523264  }
 0x71e   :  { %v975_v36 = vmul.f32 %v943_v33, %v3242_v41 }
 0x71f   :  { %v947_v37 = vmul.f32 0.5, %v946_v30  ;;  %v913_v38 = vpop.xlane.xlu2 %912 }
 0x720   :  { %v918_v34 = vmul.f32 %v913_v38, %v3237_v35  ;;  %v983_v39 = vmul.f32 %v3277_v58, %v975_v36 }
 0x721   :  { %v948_v42 = vsub.f32 1.5, %v947_v37 }
 0x722   :  { %v2715_v43 = vpop.eup %2714  ;;  %v923_v41 = vadd.f32 1e-05, %v918_v34  ;;  %v3307_v44 = vadd.f32 %v3282_v25, %v983_v39 }
 0x723   :  { %v949_v47 = vmul.f32 %v2713_v60, %v948_v42  ;;  %v955_v48 = vmul.f32 %v2715_v43, %v922_v29  ;;  %vm961_vm8 = vweird.f32 %v2715_v43  ;;  %v2649_v29 = vld [vmem:[%s3869_s19] ss:$0 sm:$0xff] }
 0x724   :  { %2716 = vrsqrt.f32 %v923_v41  ;;  %2502 = vmatmul.msk.f32.gmra.mxu1 %vm162_vm2, %v3307_v44  ;;  %vm962_vm10 = vmor %vm960_vm9, %vm961_vm8  ;;  %vm970_vm12 = vweird.f32 %v923_v41 }
 0x725   :  { %v953_v49 = vsel %vm952_vm1, %v2713_v60, %v949_v47  ;;  %v956_v50 = vmul.f32 %v2715_v43, %v955_v48 }
 0x726   :  { %v976_v52 = vmul.f32 %v953_v49, %v3248_v46 }
 0x727   :  { %v957_v53 = vmul.f32 0.5, %v956_v50 }
 0x728   :  { %v984_v54 = vmul.f32 %v3277_v58, %v976_v52 }
 0x729   :  { %v958_v55 = vsub.f32 1.5, %v957_v53 }
 0x72a   :  { %v2717_v57 = vpop.eup %2716  ;;  %v3317_v63 = vadd.f32 %v3282_v25, %v984_v54 }
 0x72b   :  { %v959_v0 = vmul.f32 %v2715_v43, %v958_v55  ;;  %v965_v1 = vmul.f32 %v2717_v57, %v923_v41  ;;  %vm971_vm11 = vweird.f32 %v2717_v57 }
 0x72c   :  { %2503 = vmatmul.msk.f32.gmra.mxu1 %vm162_vm2, %v3317_v63  ;;  %vm972_vm13 = vmor %vm970_vm12, %vm971_vm11 }
 0x72d   :  { %v963_v2 = vsel %vm962_vm10, %v2715_v43, %v959_v0  ;;  %v966_v3 = vmul.f32 %v2717_v57, %v965_v1 }
 0x72e   :  { %v977_v46 = vmul.f32 %v963_v2, %v3254_v51  ;;  %v1055_v51 = vld [vmem:[%s3868_s18 + $0x10] sm:$0xff] }
 0x72f   :  { %v967_v4 = vmul.f32 0.5, %v966_v3  ;;  %1094 = vmatpush.msrb.mxu2 %v1055_v51 }
 0x730   :  { %v985_v5 = vmul.f32 %v3277_v58, %v977_v46 }
 0x731   :  { %v968_v7 = vsub.f32 1.5, %v967_v4  ;;  %1095 = vmatpush.msrb.mxu2 %v1054_v10 }
 0x732   :  { %v993_v8 = vadd.f32 %v3282_v25, %v985_v5 }
 0x733   :  { %v969_v9 = vmul.f32 %v2717_v57, %v968_v7 }
 0x734   :  { %2504 = vmatmul.msk.f32.gmra.mxu1 %vm162_vm2, %v993_v8 }
 0x735   :  { %v973_v11 = vsel %vm972_vm13, %v2717_v57, %v969_v9 }
 0x736   :  { %v978_v6 = vmul.f32 %v973_v11, %v3260_v56  ;;  %v1053_v56 = vld [vmem:[%s3868_s18] sm:$0xff] }
 0x737   :  { %1096 = vmatpush.msrb.mxu2 %v1053_v56  ;;  %v2521_v56 = vld [vmem:[%s3893_s6 + $0x28] sm:$0xff] }
 0x738   :  { %v986_v12 = vmul.f32 %v3277_v58, %v978_v6  ;;  %1325 = vmatpush.msra.mxu0 %v2521_v56 }
 0x73a   :  { %v994_v13 = vadd.f32 %v3282_v25, %v986_v12 }
 0x73c   :  { %2505 = vmatmul.msk.f32.gmra.mxu1 %vm162_vm2, %v994_v13 }
 0x799   :  { %v1033_v17 = vpop.f32.mrf.mxu1 }
 0x79a   :  { %v1034_v18 = vadd.f32 %v2648_v15, %v1033_v17  ;;  %v2529_v17 = vld [vmem:[%s3860_s10 + $0x28] sm:$0xff] }
 0x79b   :  { %1365 = vmatpush.msrb.mxu1 %v2529_v17 }
 0x79c   :  { %v1048_v14 = vmax.f32 %v1034_v18, 0.0  ;;  %v2512_v18 = vld [vmem:[%s3892_s26 + $0x20] sm:$0xff] }
 0x79e   :  { %2506 = vmatmul.msk.f32.vlgmr.msrb.gmra.mxu2 %vm1065_vm14, %v1048_v14  ;;  %v2520_v14 = vld [vmem:[%s3893_s6 + $0x20] sm:$0xff] }
 0x79f   :  { %1326 = vmatpush.msra.mxu0 %v2520_v14 }
 0x7a1   :  { %v1036_v20 = vpop.f32.mrf.mxu1 }
 0x7a2   :  { %v1037_v58 = vadd.f32 %v2648_v15, %v1036_v20  ;;  %v2528_v20 = vld [vmem:[%s3860_s10 + $0x20] sm:$0xff] }
 0x7a3   :  { %1366 = vmatpush.msrb.mxu1 %v2528_v20 }
 0x7a4   :  { %v1049_v21 = vmax.f32 %v1037_v58, 0.0 }
 0x7a6   :  { %2507 = vmatmul.msk.f32.gmra.mxu2 %vm1065_vm14, %v1049_v21 }
 0x7a9   :  { %v1039_v16 = vpop.f32.mrf.mxu1 }
 0x7aa   :  { %v1040_v23 = vadd.f32 %v2648_v15, %v1039_v16 }
 0x7ac   :  { %v1050_v25 = vmax.f32 %v1040_v23, 0.0 }
 0x7ae   :  { %2508 = vmatmul.msk.f32.gmra.mxu2 %vm1065_vm14, %v1050_v25 }
 0x7b1   :  { %v1042_v59 = vpop.f32.mrf.mxu1 }
 0x7b2   :  { %v1043_v19 = vadd.f32 %v2648_v15, %v1042_v59 }
 0x7b4   :  { %v1051_v22 = vmax.f32 %v1043_v19, 0.0 }
 0x7b6   :  { %2509 = vmatmul.msk.f32.gmra.mxu2 %vm1065_vm14, %v1051_v22 }
 0x7b9   :  { %v1045_v26 = vpop.f32.mrf.mxu1 }
 0x7ba   :  { %v1046_v28 = vadd.f32 %v2648_v15, %v1045_v26  ;;  %v2513_v15 = vld [vmem:[%s3892_s26 + $0x28] sm:$0xff] }
 0x7bb   :  { %1285 = vmatpush.msra.mxu3 %v2513_v15 }
 0x7bc   :  { %v1052_v60 = vmax.f32 %v1046_v28, 0.0 }
 0x7bd   :  { %1286 = vmatpush.msra.mxu3 %v2512_v18 }
 0x7be   :  { %2510 = vmatmul.msk.f32.gmra.mxu2 %vm1065_vm14, %v1052_v60 }
 0x821   :  { %v1098_v24 = vpop.f32.mrf.mxu2 }
 0x822   :  { %v1099_v61 = vadd.f32 %v2649_v29, %v1098_v24 }
 0x824   :  { %v1113_v31 = vadd.f32 %v1099_v61, %v3287_v27 }
 0x826   :  { %v1120_v32 = vsel %vm162_vm2, %v1113_v31, 0.0 }
 0x827   :  { %1121 = vadd.xlane.f32.xlu0 %v1120_v32 }
 0x829   :  { %v1101_v33 = vpop.f32.mrf.mxu2 }
 0x82a   :  { %v1102_v30 = vadd.f32 %v2649_v29, %v1101_v33 }
 0x82c   :  { %v1114_v36 = vadd.f32 %v1102_v30, %v3307_v44  ;;  %v3411_v30 = vld [vmem:[%s3870_s20] ss:$0 sm:$0xff] }
 0x82e   :  { %v1123_v62 = vsel %vm162_vm2, %v1114_v36, 0.0 }
 0x82f   :  { %1124 = vadd.xlane.f32.xlu1 %v1123_v62 }
 0x831   :  { %v1104_v37 = vpop.f32.mrf.mxu2 }
 0x832   :  { %v1105_v38 = vadd.f32 %v2649_v29, %v1104_v37  ;;  %v3416_v37 = vld [vmem:[%s3871_s21] ss:$0 sm:$0xff] }
 0x834   :  { %v1115_v34 = vadd.f32 %v1105_v38, %v3317_v63 }
 0x836   :  { %v1126_v39 = vsel %vm162_vm2, %v1115_v34, 0.0 }
 0x837   :  { %1127 = vadd.xlane.f32.xlu2 %v1126_v39 }
 0x839   :  { %v1107_v40 = vpop.f32.mrf.mxu2 }
 0x83a   :  { %v1108_v42 = vadd.f32 %v2649_v29, %v1107_v40 }
 0x83c   :  { %v1116_v27 = vadd.f32 %v1108_v42, %v993_v8 }
 0x83e   :  { %v1129_v43 = vsel %vm162_vm2, %v1116_v27, 0.0 }
 0x83f   :  { %1130 = vadd.xlane.f32.xlu0 %v1129_v43 }
 0x841   :  { %v1110_v41 = vpop.f32.mrf.mxu2 }
 0x842   :  { %v1111_v45 = vadd.f32 %v2649_v29, %v1110_v41 }
 0x844   :  { %v1117_v47 = vadd.f32 %v1111_v45, %v994_v13 }
 0x846   :  { %v1132_v44 = vsel %vm873_vm7, %v1117_v47, 0.0 }
 0x847   :  { %1133 = vadd.xlane.f32.xlu1 %v1132_v44 }
 0x89a   :  { %v1122_v48 = vpop.xlane.xlu0 %1121 }
 0x89b   :  { %v1135_v49 = vmul.f32 %v1122_v48, %v3237_v35 }
 0x89d   :  { %v3358_v50 = vsub.f32 %v1113_v31, %v1135_v49 }
 0x89f   :  { %v1145_v52 = vmul.f32 %v3358_v50, %v3358_v50 }
 0x8a1   :  { %v1150_v53 = vsel %vm162_vm2, %v1145_v52, 0.0  ;;  %v2558_v52 = vld [vmem:[%s3892_s26 + $0x30] sm:$0xff] }
 0x8a2   :  { %v1125_v54 = vpop.xlane.xlu1 %1124  ;;  %1151 = vadd.xlane.f32.xlu2 %v1150_v53 }
 0x8a3   :  { %v1136_v55 = vmul.f32 %v1125_v54, %v3237_v35 }
 0x8a5   :  { %v3364_v57 = vsub.f32 %v1114_v36, %v1136_v55 }
 0x8a7   :  { %v1146_v63 = vmul.f32 %v3364_v57, %v3364_v57 }
 0x8a9   :  { %v1153_v0 = vsel %vm162_vm2, %v1146_v63, 0.0 }
 0x8aa   :  { %1154 = vadd.xlane.f32.xlu0 %v1153_v0  ;;  %v1128_v1 = vpop.xlane.xlu2 %1127 }
 0x8ab   :  { %v1137_v2 = vmul.f32 %v1128_v1, %v3237_v35 }
 0x8ad   :  { %v3370_v3 = vsub.f32 %v1115_v34, %v1137_v2 }
 0x8af   :  { %v1147_v46 = vmul.f32 %v3370_v3, %v3370_v3 }
 0x8b1   :  { %v1156_v4 = vsel %vm162_vm2, %v1147_v46, 0.0 }
 0x8b2   :  { %1157 = vadd.xlane.f32.xlu1 %v1156_v4  ;;  %v1131_v5 = vpop.xlane.xlu0 %1130 }
 0x8b3   :  { %v1138_v7 = vmul.f32 %v1131_v5, %v3237_v35 }
 0x8b5   :  { %v3376_v8 = vsub.f32 %v1116_v27, %v1138_v7 }
 0x8b7   :  { %v1148_v9 = vmul.f32 %v3376_v8, %v3376_v8 }
 0x8b9   :  { %v1159_v11 = vsel %vm162_vm2, %v1148_v9, 0.0 }
 0x8ba   :  { %v1134_v6 = vpop.xlane.xlu1 %1133  ;;  %1160 = vadd.xlane.f32.xlu2 %v1159_v11 }
 0x8bb   :  { %v1139_v12 = vmul.f32 %v1134_v6, %v3237_v35 }
 0x8bd   :  { %v3382_v13 = vsub.f32 %v1117_v47, %v1139_v12 }
 0x8bf   :  { %v1149_v51 = vmul.f32 %v3382_v13, %v3382_v13 }
 0x8c1   :  { %v1162_v10 = vsel %vm873_vm7, %v1149_v51, 0.0 }
 0x8c2   :  { %1163 = vadd.xlane.f32.xlu0 %v1162_v10 }
 0x915   :  { %v1152_v58 = vpop.xlane.xlu2 %1151 }
 0x916   :  { %v1165_v21 = vmul.f32 %v1152_v58, %v3237_v35 }
 0x918   :  { %v1170_v16 = vadd.f32 1e-05, %v1165_v21 }
 0x91a   :  { %2718 = vrsqrt.f32 %v1170_v16  ;;  %vm1181_vm0 = vweird.f32 %v1170_v16 }
 0x91d   :  { %v1155_v23 = vpop.xlane.xlu0 %1154 }
 0x91e   :  { %v1166_v25 = vmul.f32 %v1155_v23, %v3237_v35 }
 0x920   :  { %v2719_v59 = vpop.eup %2718  ;;  %v1171_v19 = vadd.f32 1e-05, %v1166_v25 }
 0x921   :  { %v1176_v22 = vmul.f32 %v2719_v59, %v1170_v16  ;;  %vm1182_vm15 = vweird.f32 %v2719_v59 }
 0x922   :  { %2720 = vrsqrt.f32 %v1171_v19  ;;  %vm1183_vm1 = vmor %vm1181_vm0, %vm1182_vm15  ;;  %vm1191_vm9 = vweird.f32 %v1171_v19 }
 0x923   :  { %v1177_v26 = vmul.f32 %v2719_v59, %v1176_v22 }
 0x925   :  { %v1178_v28 = vmul.f32 0.5, %v1177_v26  ;;  %v1158_v60 = vpop.xlane.xlu1 %1157 }
 0x926   :  { %v1167_v29 = vmul.f32 %v1158_v60, %v3237_v35 }
 0x927   :  { %v1179_v24 = vsub.f32 1.5, %v1178_v28 }
 0x928   :  { %v2721_v61 = vpop.eup %2720  ;;  %v1172_v31 = vadd.f32 1e-05, %v1167_v29 }
 0x929   :  { %v1180_v32 = vmul.f32 %v2719_v59, %v1179_v24  ;;  %v1186_v33 = vmul.f32 %v2721_v61, %v1171_v19  ;;  %vm1192_vm8 = vweird.f32 %v2721_v61 }
 0x92a   :  { %2722 = vrsqrt.f32 %v1172_v31  ;;  %vm1193_vm10 = vmor %vm1191_vm9, %vm1192_vm8  ;;  %vm1201_vm12 = vweird.f32 %v1172_v31 }
 0x92b   :  { %v1184_v36 = vsel %vm1183_vm1, %v2719_v59, %v1180_v32  ;;  %v1187_v62 = vmul.f32 %v2721_v61, %v1186_v33  ;;  %v2653_v32 = vld [vmem:[%s3861_s11 + $0x2] ss:$0 sm:$0xff] }
 0x92c   :  { %v1225_v38 = vmul.f32 %v1184_v36, %v3358_v50  ;;  %v2559_v50 = vld [vmem:[%s3892_s26 + $0x38] sm:$0xff]  ;;  %s2404_s26 = sshll.u32 %s3874_s24, 4  ;;  %s2405_s26 = int_to_ptr.hbm [resolvable:$true] %s2404_s26 }
 0x92d   :  { %v1188_v34 = vmul.f32 0.5, %v1187_v62  ;;  %v1161_v39 = vpop.xlane.xlu2 %1160  ;;  %1629 = vmatpush.msra.mxu1 %v2559_v50  ;;  %v2566_v50 = vld [vmem:[%s3893_s6 + $0x30] sm:$0xff] }
 0x92e   :  { %v1233_v40 = vmul.f32 %v3411_v30, %v1225_v38  ;;  %v1168_v42 = vmul.f32 %v1161_v39, %v3237_v35 }
 0x92f   :  { %v1189_v27 = vsub.f32 1.5, %v1188_v34  ;;  %1630 = vmatpush.msra.mxu1 %v2558_v52 }
 0x930   :  { %v2723_v43 = vpop.eup %2722  ;;  %v3422_v41 = vadd.f32 %v3416_v37, %v1233_v40  ;;  %v1173_v45 = vadd.f32 1e-05, %v1168_v42 }
 0x931   :  { %v1190_v47 = vmul.f32 %v2721_v61, %v1189_v27  ;;  %v1196_v44 = vmul.f32 %v2723_v43, %v1172_v31  ;;  %vm1202_vm11 = vweird.f32 %v2723_v43  ;;  %v2652_v31 = vld [vmem:[%s3859_s9 + $0x2] ss:$0 sm:$0xff] }
 0x932   :  { %2724 = vrsqrt.f32 %v1173_v45  ;;  %2515 = vmatmul.msk.f32.vlgmr.msra.gmra.mxu3 %vm162_vm2, %v3422_v41  ;;  %2523 = vmatmul.msk.f32.vlgmr.msra.gmra.mxu0 %vm162_vm2, %v3422_v41  ;;  %vm1203_vm13 = vmor %vm1201_vm12, %vm1202_vm11  ;;  %vm1211_vm0 = vweird.f32 %v1173_v45 }
 0x933   :  { %v1194_v48 = vsel %vm1193_vm10, %v2721_v61, %v1190_v47  ;;  %v1197_v49 = vmul.f32 %v2723_v43, %v1196_v44  ;;  %2531 = vmatmul.msk.f32.vlgmr.msrb.gmra.mxu1 %vm162_vm2, %v3422_v41 }
 0x934   :  { %v1226_v53 = vmul.f32 %v1194_v48, %v3364_v57 }
 0x935   :  { %v1198_v54 = vmul.f32 0.5, %v1197_v49  ;;  %v1164_v55 = vpop.xlane.xlu0 %1163  ;;  %v2567_v49 = vld [vmem:[%s3893_s6 + $0x38] sm:$0xff] }
 0x936   :  { %v1234_v63 = vmul.f32 %v3411_v30, %v1226_v53  ;;  %v1169_v0 = vmul.f32 %v1164_v55, %v3237_v35 }
 0x937   :  { %v1199_v1 = vsub.f32 1.5, %v1198_v54 }
 0x938   :  { %v2725_v2 = vpop.eup %2724  ;;  %v3440_v46 = vadd.f32 %v3416_v37, %v1234_v63  ;;  %v1174_v4 = vadd.f32 1e-05, %v1169_v0 }
 0x939   :  { %v1200_v5 = vmul.f32 %v2723_v43, %v1199_v1  ;;  %v1206_v7 = vmul.f32 %v2725_v2, %v1173_v45  ;;  %vm1212_vm15 = vweird.f32 %v2725_v2  ;;  %v2654_v45 = vld [vmem:[%s3896_s25 + $0x2] ss:$0 sm:$0xff] }
 0x93a   :  { %2726 = vrsqrt.f32 %v1174_v4  ;;  %2516 = vmatmul.msk.f32.gmra.mxu3 %vm162_vm2, %v3440_v46  ;;  %2524 = vmatmul.msk.f32.gmra.mxu0 %vm162_vm2, %v3440_v46  ;;  %vm1213_vm1 = vmor %vm1211_vm0, %vm1212_vm15  ;;  %vm1221_vm9 = vweird.f32 %v1174_v4 }
 0x93b   :  { %v1204_v57 = vsel %vm1203_vm13, %v2723_v43, %v1200_v5  ;;  %v1207_v9 = vmul.f32 %v2725_v2, %v1206_v7  ;;  %2532 = vmatmul.msk.f32.gmra.mxu1 %vm162_vm2, %v3440_v46 }
 0x93c   :  { %v1227_v11 = vmul.f32 %v1204_v57, %v3370_v3 }
 0x93d   :  { %v1208_v6 = vmul.f32 0.5, %v1207_v9  ;;  %v3537_v9 = vld [vmem:[%s3897_s29 + $0x8] sm:$0xff] }
 0x93e   :  { %v1235_v12 = vmul.f32 %v3411_v30, %v1227_v11 }
 0x93f   :  { %v1209_v51 = vsub.f32 1.5, %v1208_v6 }
 0x940   :  { %v2727_v10 = vpop.eup %2726  ;;  %v3451_v56 = vadd.f32 %v3416_v37, %v1235_v12 }
 0x941   :  { %v1210_v15 = vmul.f32 %v2725_v2, %v1209_v51  ;;  %v1216_v17 = vmul.f32 %v2727_v10, %v1174_v4  ;;  %vm1222_vm8 = vweird.f32 %v2727_v10  ;;  %v3530_v4 = vld [vmem:[%s3897_s29] sm:$0xff]  ;;  %v3544_v51 = vld [vmem:[%s3897_s29 + $0x10] sm:$0xff] }
 0x942   :  { %2517 = vmatmul.msk.f32.gmra.mxu3 %vm162_vm2, %v3451_v56  ;;  %2525 = vmatmul.msk.f32.gmra.mxu0 %vm162_vm2, %v3451_v56  ;;  %vm1223_vm10 = vmor %vm1221_vm9, %vm1222_vm8 }
 0x943   :  { %v1214_v3 = vsel %vm1213_vm1, %v2725_v2, %v1210_v15  ;;  %v1217_v18 = vmul.f32 %v2727_v10, %v1216_v17  ;;  %2533 = vmatmul.msk.f32.gmra.mxu1 %vm162_vm2, %v3451_v56 }
 0x944   :  { %v1228_v14 = vmul.f32 %v1214_v3, %v3376_v8  ;;  %v3551_v3 = vld [vmem:[%s3897_s29 + $0x18] sm:$0xff] }
 0x945   :  { %v1218_v20 = vmul.f32 0.5, %v1217_v18 }
 0x946   :  { %v1236_v58 = vmul.f32 %v3411_v30, %v1228_v14 }
 0x947   :  { %v1219_v21 = vsub.f32 1.5, %v1218_v20 }
 0x948   :  { %v3462_v16 = vadd.f32 %v3416_v37, %v1236_v58  ;;  %v3558_v58 = vld [vmem:[%s3897_s29 + $0x20] sm:$0x3]  ;;  %s2820_s29 = smov [#allocation2]  }
 0x949   :  { %v1220_v23 = vmul.f32 %v2727_v10, %v1219_v21  ;;  %s2402_s3 = sshll.u32 %s2820_s29, 4  ;;  %s2403_s3 = int_to_ptr.vmem [resolvable:$true] %s2402_s3 }
 0x94a   :  { %2518 = vmatmul.msk.f32.gmra.mxu3 %vm162_vm2, %v3462_v16  ;;  %2526 = vmatmul.msk.f32.gmra.mxu0 %vm162_vm2, %v3462_v16 }
 0x94b   :  { %v1224_v25 = vsel %vm1223_vm10, %v2727_v10, %v1220_v23  ;;  %2534 = vmatmul.msk.f32.gmra.mxu1 %vm162_vm2, %v3462_v16 }
 0x94c   :  { %v1229_v8 = vmul.f32 %v1224_v25, %v3382_v13 }
 0x94e   :  { %v1237_v59 = vmul.f32 %v3411_v30, %v1229_v8  ;;  %v2552_v8 = vld [vmem:[%s3862_s12 + $0x10] sm:$0xff] }
 0x94f   :  { %1582 = vmatpush.msrb.mxu0 %v2552_v8 }
 0x950   :  { %v3473_v19 = vadd.f32 %v3416_v37, %v1237_v59 }
 0x952   :  { %2519 = vmatmul.msk.f32.gmra.mxu3 %vm162_vm2, %v3473_v19  ;;  %2527 = vmatmul.msk.f32.gmra.mxu0 %vm162_vm2, %v3473_v19 }
 0x953   :  { %2535 = vmatmul.msk.f32.gmra.mxu1 %vm162_vm2, %v3473_v19 }
 0x95b   :  { %2561 = vmatmul.msk.f32.vlgmr.msra.gmra.mxu1 %vm162_vm2, %v3422_v41 }
 0x963   :  { %2562 = vmatmul.msk.f32.gmra.mxu1 %vm162_vm2, %v3440_v46 }
 0x96b   :  { %2563 = vmatmul.msk.f32.gmra.mxu1 %vm162_vm2, %v3451_v56 }
 0x973   :  { %2564 = vmatmul.msk.f32.gmra.mxu1 %vm162_vm2, %v3462_v16 }
 0x97b   :  { %2565 = vmatmul.msk.f32.gmra.mxu1 %vm162_vm2, %v3473_v19 }
 0x9af   :  { %v1328_v13 = vpop.f32.mrf.mxu0 }
 0x9b0   :  { %v1368_v22 = vpop.f32.mrf.mxu1  ;;  %v1329_v47 = vadd.f32 %v2652_v31, %v1328_v13 }
 0x9b1   :  { %v1369_v27 = vadd.f32 %v2653_v32, %v1368_v22 }
 0x9b5   :  { %v1288_v40 = vpop.f32.mrf.mxu3 }
 0x9b6   :  { %v1289_v48 = vadd.f32 %v2654_v45, %v1288_v40 }
 0x9b7   :  { %v1331_v26 = vpop.f32.mrf.mxu0 }
 0x9b8   :  { %v1371_v28 = vpop.f32.mrf.mxu1  ;;  %v1332_v43 = vadd.f32 %v2652_v31, %v1331_v26  ;;  %v2656_v26 = vld [vmem:[%s3859_s9 + $0x3] ss:$0 sm:$0xff] }
 0x9b9   :  { %v1372_v39 = vadd.f32 %v2653_v32, %v1371_v28 }
 0x9bd   :  { %v1291_v44 = vpop.f32.mrf.mxu3 }
 0x9be   :  { %v1292_v52 = vadd.f32 %v2654_v45, %v1291_v44 }
 0x9bf   :  { %v1334_v60 = vpop.f32.mrf.mxu0 }
 0x9c0   :  { %v1374_v29 = vpop.f32.mrf.mxu1  ;;  %v1335_v42 = vadd.f32 %v2652_v31, %v1334_v60 }
 0x9c1   :  { %v1375_v34 = vadd.f32 %v2653_v32, %v1374_v29 }
 0x9c5   :  { %v1294_v53 = vpop.f32.mrf.mxu3 }
 0x9c6   :  { %v1295_v54 = vadd.f32 %v2654_v45, %v1294_v53 }
 0x9c7   :  { %v1337_v24 = vpop.f32.mrf.mxu0 }
 0x9c8   :  { %v1377_v61 = vpop.f32.mrf.mxu1  ;;  %v1338_v38 = vadd.f32 %v2652_v31, %v1337_v24 }
 0x9c9   :  { %v1378_v37 = vadd.f32 %v2653_v32, %v1377_v61 }
 0x9cd   :  { %v1297_v55 = vpop.f32.mrf.mxu3 }
 0x9ce   :  { %v1298_v63 = vadd.f32 %v2654_v45, %v1297_v55 }
 0x9cf   :  { %v1340_v33 = vpop.f32.mrf.mxu0 }
 0x9d0   :  { %v1341_v30 = vadd.f32 %v2652_v31, %v1340_v33  ;;  %v1380_v36 = vpop.f32.mrf.mxu1 }
 0x9d1   :  { %v1381_v62 = vadd.f32 %v2653_v32, %v1380_v36 }
 0x9d2   :  { %2536 = vmatpush.xpose.msk.msra.mxu2 %vm286_vm3, %v1341_v30 }
 0x9d3   :  { %2546 = vmatpush.msk.msrb.mxu3 %vm421_vm4, %v1381_v62 }
 0x9d5   :  { %1530 = vmatpush.msrb.mxu3 %v1378_v37  ;;  %v1300_v0 = vpop.f32.mrf.mxu3 }
 0x9d6   :  { %2537 = vmatpush.xpose.msk.msra.mxu2 %vm286_vm3, %v1338_v38  ;;  %v1301_v1 = vadd.f32 %v2654_v45, %v1300_v0 }
 0x9d7   :  { %1531 = vmatpush.msrb.mxu3 %v1375_v34 }
 0x9d9   :  { %1532 = vmatpush.msrb.mxu3 %v1372_v39 }
 0x9da   :  { %2538 = vmatpush.xpose.msk.msra.mxu2 %vm286_vm3, %v1335_v42 }
 0x9db   :  { %1533 = vmatpush.msrb.mxu3 %v1369_v27 }
 0x9de   :  { %2539 = vmatpush.xpose.msk.msra.mxu2 %vm286_vm3, %v1332_v43 }
 0x9e2   :  { %2540 = vmatpush.xpose.msk.msra.mxu2 %vm286_vm3, %v1329_v47 }
 0x9e5   :  { %2541 = vmatmul.msk.f32.vlgmr.msra.gmra.mxu2 %vm286_vm3, %v1289_v48 }
 0x9e6   :  { %1669 = vmatpush.msrb.mxu2 %v2567_v49 }
 0x9e8   :  { %1670 = vmatpush.msrb.mxu2 %v2566_v50 }
 0x9ed   :  { %2542 = vmatmul.msk.f32.gmra.mxu2 %vm286_vm3, %v1292_v52 }
 0x9f5   :  { %2543 = vmatmul.msk.f32.gmra.mxu2 %vm286_vm3, %v1295_v54 }
 0x9fd   :  { %2544 = vmatmul.msk.f32.gmra.mxu2 %vm286_vm3, %v1298_v63 }
 0xa05   :  { %2545 = vmatmul.msk.f32.gmra.mxu2 %vm286_vm3, %v1301_v1 }
 0xa0d   :  { %2569 = vmatmul.msk.f32.vlgmr.msrb.gmra.mxu2 %vm162_vm2, %v3422_v41 }
 0xa15   :  { %2570 = vmatmul.msk.f32.gmra.mxu2 %vm162_vm2, %v3440_v46 }
 0xa1d   :  { %2571 = vmatmul.msk.f32.gmra.mxu2 %vm162_vm2, %v3451_v56 }
 0xa25   :  { %2572 = vmatmul.msk.f32.gmra.mxu2 %vm162_vm2, %v3462_v16 }
 0xa2d   :  { %2573 = vmatmul.msk.f32.gmra.mxu2 %vm162_vm2, %v3473_v19 }
 0xa68   :  { %v1430_v2 = vpop.f32.mrf.mxu2 }
 0xa69   :  { %v1431_v5 = vadd.f32 %v3530_v4, %v1430_v2 }
 0xa6b   :  { %v1445_v7 = vsel %vm349_vm5, %v1431_v5, -inf }
 0xa6c   :  { %1446 = vmax.xlane.f32.xlu1 %v1445_v7 }
 0xa70   :  { %v1433_v57 = vpop.f32.mrf.mxu2 }
 0xa71   :  { %v1434_v11 = vadd.f32 %v3537_v9, %v1433_v57  ;;  %v2575_v57 = vld [vmem:[%s3860_s10 + $0x38] sm:$0xff] }
 0xa72   :  { %1709 = vmatpush.msra.mxu3 %v2575_v57 }
 0xa73   :  { %v1448_v6 = vsel %vm349_vm5, %v1434_v11, -inf }
 0xa74   :  { %1449 = vmax.xlane.f32.xlu2 %v1448_v6 }
 0xa78   :  { %v1436_v12 = vpop.f32.mrf.mxu2 }
 0xa79   :  { %v1437_v10 = vadd.f32 %v3544_v51, %v1436_v12 }
 0xa7b   :  { %v1451_v15 = vsel %vm349_vm5, %v1437_v10, -inf }
 0xa7c   :  { %1452 = vmax.xlane.f32.xlu0 %v1451_v15 }
 0xa80   :  { %v1439_v17 = vpop.f32.mrf.mxu2 }
 0xa81   :  { %v1440_v18 = vadd.f32 %v3551_v3, %v1439_v17 }
 0xa83   :  { %v1454_v14 = vsel %vm349_vm5, %v1440_v18, -inf }
 0xa84   :  { %1455 = vmax.xlane.f32.xlu1 %v1454_v14 }
 0xa88   :  { %v1442_v20 = vpop.f32.mrf.mxu2 }
 0xa89   :  { %v1443_v21 = vadd.f32 %v3558_v58, %v1442_v20 }
 0xa8b   :  { %v1457_v23 = vsel %vm362_vm6, %v1443_v21, -inf }
 0xa8c   :  { %1458 = vmax.xlane.f32.xlu2 %v1457_v23 }
 0xa90   :  { %v1672_v25 = vpop.f32.mrf.mxu2 }
 0xa91   :  { %v1673_v31 = vadd.f32 %v2656_v26, %v1672_v25 }
 0xa98   :  { %v1675_v59 = vpop.f32.mrf.mxu2 }
 0xa99   :  { %v1676_v61 = vadd.f32 %v2656_v26, %v1675_v59 }
 0xaa0   :  { %v1678_v13 = vpop.f32.mrf.mxu2 }
 0xaa1   :  { %v1679_v24 = vadd.f32 %v2656_v26, %v1678_v13 }
 0xaa8   :  { %v1681_v22 = vpop.f32.mrf.mxu2 }
 0xaa9   :  { %v1682_v29 = vadd.f32 %v2656_v26, %v1681_v22 }
 0xab0   :  { %v1684_v28 = vpop.f32.mrf.mxu2 }
 0xab1   :  { %v1685_v60 = vadd.f32 %v2656_v26, %v1684_v28  ;;  %v1632_v26 = vpop.f32.mrf.mxu1 }
 0xab3   :  { %2582 = vmatpush.xpose.msk.msra.mxu0 %vm286_vm3, %v1685_v60  ;;  %v2655_v60 = vld [vmem:[%s3896_s25 + $0x3] ss:$0 sm:$0xff] }
 0xab7   :  { %2583 = vmatpush.xpose.msk.msra.mxu0 %vm286_vm3, %v1682_v29 }
 0xab9   :  { %v1635_v29 = vpop.f32.mrf.mxu1 }
 0xabb   :  { %2584 = vmatpush.xpose.msk.msra.mxu0 %vm286_vm3, %v1679_v24  ;;  %v1633_v24 = vadd.f32 %v2655_v60, %v1632_v26 }
 0xabf   :  { %2585 = vmatpush.xpose.msk.msra.mxu0 %vm286_vm3, %v1676_v61 }
 0xac3   :  { %2586 = vmatpush.xpose.msk.msra.mxu0 %vm286_vm3, %v1673_v31  ;;  %v1636_v31 = vadd.f32 %v2655_v60, %v1635_v29 }
 0xadf   :  { %v1447_v32 = vpop.xlane.xlu1 %1446 }
 0xae0   :  { %v1460_v33 = vsub.f32 %v1431_v5, %v1447_v32  ;;  %v1638_v32 = vpop.f32.mrf.mxu1 }
 0xae2   :  { %v1465_v30 = vmul.f32 1.442695, %v1460_v33 }
 0xae4   :  { %2728 = vpow2.f32 %v1465_v30  ;;  %v1639_v30 = vadd.f32 %v2655_v60, %v1638_v32 }
 0xae7   :  { %v1450_v36 = vpop.xlane.xlu2 %1449 }
 0xae8   :  { %v1461_v62 = vsub.f32 %v1434_v11, %v1450_v36  ;;  %v2574_v11 = vld [vmem:[%s3860_s10 + $0x30] sm:$0xff] }
 0xae9   :  { %1710 = vmatpush.msra.mxu3 %v2574_v11 }
 0xaea   :  { %v2729_v37 = vpop.eup %2728  ;;  %v1467_v38 = vmul.f32 1.442695, %v1461_v62  ;;  %v1641_v62 = vpop.f32.mrf.mxu1 }
 0xaeb   :  { %v1475_v34 = vsel %vm349_vm5, %v2729_v37, 0.0 }
 0xaec   :  { %2730 = vpow2.f32 %v1467_v38  ;;  %1476 = vadd.xlane.f32.xlu0 %v1475_v34 }
 0xaef   :  { %v1453_v39 = vpop.xlane.xlu0 %1452 }
 0xaf0   :  { %v1462_v40 = vsub.f32 %v1437_v10, %v1453_v39 }
 0xaf2   :  { %v2731_v42 = vpop.eup %2730  ;;  %v1469_v27 = vmul.f32 1.442695, %v1462_v40  ;;  %v1644_v34 = vpop.f32.mrf.mxu1  ;;  %v2657_v40 = vld [vmem:[%s3861_s11 + $0x3] ss:$0 sm:$0xff] }
 0xaf3   :  { %v1478_v43 = vsel %vm349_vm5, %v2731_v42, 0.0  ;;  %v1645_v39 = vadd.f32 %v2655_v60, %v1644_v34  ;;  %v2598_v34 = vld [vmem:[%s3862_s12 + $0x18] sm:$0xff] }
 0xaf4   :  { %2732 = vpow2.f32 %v1469_v27  ;;  %1479 = vadd.xlane.f32.xlu1 %v1478_v43  ;;  %1926 = vmatpush.msra.mxu2 %v2598_v34 }
 0xaf7   :  { %v1456_v45 = vpop.xlane.xlu1 %1455 }
 0xaf8   :  { %v1463_v47 = vsub.f32 %v1440_v18, %v1456_v45 }
 0xafa   :  { %v2733_v44 = vpop.eup %2732  ;;  %v1471_v48 = vmul.f32 1.442695, %v1463_v47 }
 0xafb   :  { %v1481_v49 = vsel %vm349_vm5, %v2733_v44, 0.0 }
 0xafc   :  { %2734 = vpow2.f32 %v1471_v48  ;;  %1482 = vadd.xlane.f32.xlu2 %v1481_v49 }
 0xaff   :  { %v1459_v50 = vpop.xlane.xlu2 %1458 }
 0xb00   :  { %v1464_v52 = vsub.f32 %v1443_v21, %v1459_v50 }
 0xb02   :  { %v2735_v53 = vpop.eup %2734  ;;  %v1473_v54 = vmul.f32 1.442695, %v1464_v52 }
 0xb03   :  { %v1484_v55 = vsel %vm349_vm5, %v2735_v53, 0.0 }
 0xb04   :  { %2736 = vpow2.f32 %v1473_v54  ;;  %1485 = vadd.xlane.f32.xlu0 %v1484_v55 }
 0xb0a   :  { %v2737_v63 = vpop.eup %2736 }
 0xb0b   :  { %v1487_v0 = vsel %vm362_vm6, %v2737_v63, 0.0 }
 0xb0c   :  { %1488 = vadd.xlane.f32.xlu1 %v1487_v0 }
 0xb5f   :  { %v1477_v1 = vpop.xlane.xlu0 %1476 }
 0xb60   :  { %2738 = vrcp.f32 %v1477_v1 }
 0xb66   :  { %v2739_v2 = vpop.eup %2738 }
 0xb67   :  { %v1495_v5 = vmul.f32 %v2739_v2, %v2729_v37  ;;  %v1480_v7 = vpop.xlane.xlu1 %1479  ;;  %v1642_v37 = vadd.f32 %v2655_v60, %v1641_v62 }
 0xb68   :  { %2740 = vrcp.f32 %v1480_v7 }
 0xb69   :  { %2547 = vmatmul.msk.f32.vlgmr.msrb.gmra.mxu3 %vm349_vm5, %v1495_v5 }
 0xb6e   :  { %v2741_v6 = vpop.eup %2740 }
 0xb6f   :  { %v1483_v12 = vpop.xlane.xlu2 %1482  ;;  %v1496_v10 = vmul.f32 %v2741_v6, %v2731_v42 }
 0xb70   :  { %2742 = vrcp.f32 %v1483_v12 }
 0xb71   :  { %2548 = vmatmul.msk.f32.gmra.mxu3 %vm349_vm5, %v1496_v10 }
 0xb76   :  { %v2743_v15 = vpop.eup %2742 }
 0xb77   :  { %v1486_v17 = vpop.xlane.xlu0 %1485  ;;  %v1497_v18 = vmul.f32 %v2743_v15, %v2733_v44 }
 0xb78   :  { %2744 = vrcp.f32 %v1486_v17 }
 0xb79   :  { %2549 = vmatmul.msk.f32.gmra.mxu3 %vm349_vm5, %v1497_v18 }
 0xb7e   :  { %v2745_v14 = vpop.eup %2744 }
 0xb7f   :  { %v1489_v20 = vpop.xlane.xlu1 %1488  ;;  %v1498_v21 = vmul.f32 %v2745_v14, %v2735_v53 }
 0xb80   :  { %2746 = vrcp.f32 %v1489_v20 }
 0xb81   :  { %2550 = vmatmul.msk.f32.gmra.mxu3 %vm349_vm5, %v1498_v21 }
 0xb86   :  { %v2747_v23 = vpop.eup %2746 }
 0xb87   :  { %v1499_v25 = vmul.f32 %v2747_v23, %v2737_v63 }
 0xb89   :  { %2551 = vmatmul.msk.f32.gmra.mxu3 %vm349_vm5, %v1499_v25 }
 0xb91   :  { %2577 = vmatmul.msk.f32.vlgmr.msra.gmra.mxu3 %vm162_vm2, %v3422_v41 }
 0xb99   :  { %2578 = vmatmul.msk.f32.gmra.mxu3 %vm162_vm2, %v3440_v46 }
 0xba1   :  { %2579 = vmatmul.msk.f32.gmra.mxu3 %vm162_vm2, %v3451_v56 }
 0xba9   :  { %2580 = vmatmul.msk.f32.gmra.mxu3 %vm162_vm2, %v3462_v16 }
 0xbb1   :  { %2581 = vmatmul.msk.f32.gmra.mxu3 %vm162_vm2, %v3473_v19 }
 0xbec   :  { %v1535_v8 = vpop.f32.mrf.mxu3 }
 0xbed   :  { %2553 = vmatmul.msk.f32.vlgmr.msrb.gmra.mxu0 %vm286_vm3, %v1535_v8 }
 0xbf4   :  { %v1538_v59 = vpop.f32.mrf.mxu3 }
 0xbf5   :  { %2554 = vmatmul.msk.f32.gmra.mxu0 %vm286_vm3, %v1538_v59 }
 0xbfc   :  { %v1541_v13 = vpop.f32.mrf.mxu3 }
 0xbfd   :  { %2555 = vmatmul.msk.f32.gmra.mxu0 %vm286_vm3, %v1541_v13 }
 0xc04   :  { %v1544_v22 = vpop.f32.mrf.mxu3 }
 0xc05   :  { %2556 = vmatmul.msk.f32.gmra.mxu0 %vm286_vm3, %v1544_v22 }
 0xc0c   :  { %v1547_v28 = vpop.f32.mrf.mxu3 }
 0xc0d   :  { %2557 = vmatmul.msk.f32.gmra.mxu0 %vm286_vm3, %v1547_v28 }
 0xc14   :  { %v1712_v61 = vpop.f32.mrf.mxu3 }
 0xc15   :  { %2587 = vmatmul.msk.f32.vlgmr.msra.gmra.mxu0 %vm286_vm3, %v1633_v24  ;;  %v1713_v44 = vadd.f32 %v2657_v40, %v1712_v61 }
 0xc1c   :  { %v1715_v33 = vpop.f32.mrf.mxu3 }
 0xc1d   :  { %2588 = vmatmul.msk.f32.gmra.mxu0 %vm286_vm3, %v1636_v31  ;;  %v1716_v47 = vadd.f32 %v2657_v40, %v1715_v33 }
 0xc24   :  { %v1718_v36 = vpop.f32.mrf.mxu3 }
 0xc25   :  { %2589 = vmatmul.msk.f32.gmra.mxu0 %vm286_vm3, %v1639_v30  ;;  %v1719_v45 = vadd.f32 %v2657_v40, %v1718_v36 }
 0xc2c   :  { %v1721_v38 = vpop.f32.mrf.mxu3 }
 0xc2d   :  { %2590 = vmatmul.msk.f32.gmra.mxu0 %vm286_vm3, %v1642_v37  ;;  %v1722_v43 = vadd.f32 %v2657_v40, %v1721_v38 }
 0xc34   :  { %v1724_v42 = vpop.f32.mrf.mxu3 }
 0xc35   :  { %v1725_v27 = vadd.f32 %v2657_v40, %v1724_v42  ;;  %2591 = vmatmul.msk.f32.gmra.mxu0 %vm286_vm3, %v1645_v39 }
 0xc37   :  { %2592 = vmatpush.msk.msrb.mxu1 %vm421_vm4, %v1725_v27 }
 0xc39   :  { %1874 = vmatpush.msrb.mxu1 %v1722_v43 }
 0xc3b   :  { %1875 = vmatpush.msrb.mxu1 %v1719_v45 }
 0xc3d   :  { %1876 = vmatpush.msrb.mxu1 %v1716_v47 }
 0xc3f   :  { %1877 = vmatpush.msrb.mxu1 %v1713_v44 }
 0xc6a   :  { %v3616_v48 = vpop.f32.mrf.mxu0 }
 0xc72   :  { %v3618_v49 = vpop.f32.mrf.mxu0 }
 0xc7a   :  { %v3620_v50 = vpop.f32.mrf.mxu0 }
 0xc82   :  { %v3622_v52 = vpop.f32.mrf.mxu0 }
 0xc8a   :  { %v3624_v53 = vpop.f32.mrf.mxu0 }
 0xc92   :  { %v1774_v54 = vpop.f32.mrf.mxu0 }
 0xc93   :  { %v1775_v55 = vadd.f32 %v3530_v4, %v1774_v54 }
 0xc95   :  { %v1789_v63 = vsel %vm349_vm5, %v1775_v55, -inf }
 0xc96   :  { %1790 = vmax.xlane.f32.xlu2 %v1789_v63 }
 0xc9a   :  { %v1777_v0 = vpop.f32.mrf.mxu0 }
 0xc9b   :  { %v1778_v1 = vadd.f32 %v3537_v9, %v1777_v0 }
 0xc9d   :  { %v1792_v2 = vsel %vm349_vm5, %v1778_v1, -inf }
 0xc9e   :  { %1793 = vmax.xlane.f32.xlu0 %v1792_v2 }
 0xca2   :  { %v1780_v5 = vpop.f32.mrf.mxu0 }
 0xca3   :  { %v1781_v7 = vadd.f32 %v3544_v51, %v1780_v5 }
 0xca5   :  { %v1795_v57 = vsel %vm349_vm5, %v1781_v7, -inf }
 0xca6   :  { %1796 = vmax.xlane.f32.xlu1 %v1795_v57  ;;  %v2658_v57 = vld [vmem:[%s3863_s13 + $0x1] ss:$0 sm:$0xff] }
 0xcaa   :  { %v1783_v11 = vpop.f32.mrf.mxu0 }
 0xcab   :  { %v1784_v6 = vadd.f32 %v3551_v3, %v1783_v11  ;;  %v1602_v11 = vadd.f32 %v2658_v57, %v3616_v48 }
 0xcad   :  { %v1798_v4 = vsel %vm349_vm5, %v1784_v6, -inf }
 0xcae   :  { %1799 = vmax.xlane.f32.xlu2 %v1798_v4 }
 0xcb2   :  { %v1786_v12 = vpop.f32.mrf.mxu0 }
 0xcb3   :  { %v1787_v10 = vadd.f32 %v3558_v58, %v1786_v12 }
 0xcb5   :  { %v1801_v9 = vsel %vm362_vm6, %v1787_v10, -inf }
 0xcb6   :  { %1802 = vmax.xlane.f32.xlu0 %v1801_v9  ;;  %v1603_v9 = vadd.f32 %v2658_v57, %v3618_v49 }
 0xd09   :  { %v1791_v15 = vpop.xlane.xlu2 %1790 }
 0xd0a   :  { %v1804_v17 = vsub.f32 %v1775_v55, %v1791_v15 }
 0xd0c   :  { %v1809_v18 = vmul.f32 1.442695, %v1804_v17 }
 0xd0e   :  { %2748 = vpow2.f32 %v1809_v18 }
 0xd11   :  { %v1794_v51 = vpop.xlane.xlu0 %1793 }
 0xd12   :  { %v1805_v14 = vsub.f32 %v1778_v1, %v1794_v51 }
 0xd14   :  { %v2749_v20 = vpop.eup %2748  ;;  %v1811_v21 = vmul.f32 1.442695, %v1805_v14  ;;  %v1604_v14 = vadd.f32 %v2658_v57, %v3620_v50 }
 0xd15   :  { %v1819_v23 = vsel %vm349_vm5, %v2749_v20, 0.0 }
 0xd16   :  { %2750 = vpow2.f32 %v1811_v21  ;;  %1820 = vadd.xlane.f32.xlu1 %v1819_v23  ;;  %v1605_v23 = vadd.f32 %v2658_v57, %v3622_v52 }
 0xd19   :  { %v1797_v3 = vpop.xlane.xlu1 %1796 }
 0xd1a   :  { %v1806_v25 = vsub.f32 %v1781_v7, %v1797_v3 }
 0xd1c   :  { %v2751_v8 = vpop.eup %2750  ;;  %v1813_v59 = vmul.f32 1.442695, %v1806_v25 }
 0xd1d   :  { %v1822_v58 = vsel %vm349_vm5, %v2751_v8, 0.0 }
 0xd1e   :  { %2752 = vpow2.f32 %v1813_v59  ;;  %1823 = vadd.xlane.f32.xlu2 %v1822_v58 }
 0xd21   :  { %v1800_v13 = vpop.xlane.xlu2 %1799 }
 0xd22   :  { %v1807_v22 = vsub.f32 %v1784_v6, %v1800_v13 }
 0xd24   :  { %v2753_v26 = vpop.eup %2752  ;;  %v1815_v28 = vmul.f32 1.442695, %v1807_v22 }
 0xd25   :  { %v1825_v60 = vsel %vm349_vm5, %v2753_v26, 0.0 }
 0xd26   :  { %2754 = vpow2.f32 %v1815_v28  ;;  %1826 = vadd.xlane.f32.xlu0 %v1825_v60 }
 0xd29   :  { %v1803_v29 = vpop.xlane.xlu0 %1802 }
 0xd2a   :  { %v1808_v24 = vsub.f32 %v1787_v10, %v1803_v29 }
 0xd2c   :  { %v2755_v61 = vpop.eup %2754  ;;  %v1817_v31 = vmul.f32 1.442695, %v1808_v24 }
 0xd2d   :  { %v1828_v32 = vsel %vm349_vm5, %v2755_v61, 0.0 }
 0xd2e   :  { %2756 = vpow2.f32 %v1817_v31  ;;  %1829 = vadd.xlane.f32.xlu1 %v1828_v32 }
 0xd34   :  { %v2757_v33 = vpop.eup %2756 }
 0xd35   :  { %v1831_v30 = vsel %vm362_vm6, %v2757_v33, 0.0 }
 0xd36   :  { %1832 = vadd.xlane.f32.xlu2 %v1831_v30 }
 0xd89   :  { %v1821_v36 = vpop.xlane.xlu1 %1820 }
 0xd8a   :  { %2758 = vrcp.f32 %v1821_v36 }
 0xd90   :  { %v2759_v62 = vpop.eup %2758 }
 0xd91   :  { %v1839_v37 = vmul.f32 %v2759_v62, %v2749_v20  ;;  %v1824_v38 = vpop.xlane.xlu2 %1823 }
 0xd92   :  { %2760 = vrcp.f32 %v1824_v38 }
 0xd93   :  { %2593 = vmatmul.msk.f32.vlgmr.msrb.gmra.mxu1 %vm349_vm5, %v1839_v37 }
 0xd98   :  { %v2761_v39 = vpop.eup %2760 }
 0xd99   :  { %v1827_v40 = vpop.xlane.xlu0 %1826  ;;  %v1840_v42 = vmul.f32 %v2761_v39, %v2751_v8  ;;  %v1606_v8 = vadd.f32 %v2658_v57, %v3624_v53 }
 0xd9a   :  { %2762 = vrcp.f32 %v1827_v40 }
 0xd9b   :  { %2594 = vmatmul.msk.f32.gmra.mxu1 %vm349_vm5, %v1840_v42 }
 0xda0   :  { %v2763_v27 = vpop.eup %2762 }
 0xda1   :  { %v1830_v43 = vpop.xlane.xlu1 %1829  ;;  %v1841_v45 = vmul.f32 %v2763_v27, %v2753_v26 }
 0xda2   :  { %2764 = vrcp.f32 %v1830_v43  ;;  %v2607_v43 = vld [vmem:[%s3866_s16 + $0x18] sm:$0xff] }
 0xda3   :  { %2595 = vmatmul.msk.f32.gmra.mxu1 %vm349_vm5, %v1841_v45  ;;  %2120 = vmatpush.msrb.mxu3 %v2607_v43  ;;  %v2606_v45 = vld [vmem:[%s3866_s16 + $0x10] sm:$0xff] }
 0xda5   :  { %2121 = vmatpush.msrb.mxu3 %v2606_v45 }
 0xda8   :  { %v2765_v47 = vpop.eup %2764 }
 0xda9   :  { %v1833_v44 = vpop.xlane.xlu2 %1832  ;;  %v1842_v54 = vmul.f32 %v2765_v47, %v2755_v61 }
 0xdaa   :  { %2766 = vrcp.f32 %v1833_v44 }
 0xdab   :  { %2596 = vmatmul.msk.f32.gmra.mxu1 %vm349_vm5, %v1842_v54 }
 0xdb0   :  { %v2767_v55 = vpop.eup %2766 }
 0xdb1   :  { %v1843_v63 = vmul.f32 %v2767_v55, %v2757_v33 }
 0xdb3   :  { %2597 = vmatmul.msk.f32.gmra.mxu1 %vm349_vm5, %v1843_v63 }
 0xe10   :  { %v1879_v0 = vpop.f32.mrf.mxu1 }
 0xe11   :  { %2599 = vmatmul.msk.f32.vlgmr.msra.gmra.mxu2 %vm286_vm3, %v1879_v0 }
 0xe18   :  { %v1882_v1 = vpop.f32.mrf.mxu1 }
 0xe19   :  { %2600 = vmatmul.msk.f32.gmra.mxu2 %vm286_vm3, %v1882_v1 }
 0xe20   :  { %v1885_v2 = vpop.f32.mrf.mxu1 }
 0xe21   :  { %2601 = vmatmul.msk.f32.gmra.mxu2 %vm286_vm3, %v1885_v2 }
 0xe28   :  { %v1888_v5 = vpop.f32.mrf.mxu1 }
 0xe29   :  { %2602 = vmatmul.msk.f32.gmra.mxu2 %vm286_vm3, %v1888_v5 }
 0xe30   :  { %v1891_v7 = vpop.f32.mrf.mxu1 }
 0xe31   :  { %2603 = vmatmul.msk.f32.gmra.mxu2 %vm286_vm3, %v1891_v7 }
 0xe94   :  { %v1928_v6 = vpop.f32.mrf.mxu2 }
 0xe95   :  { %v1943_v4 = vadd.f32 %v1928_v6, %v1602_v11 }
 0xe97   :  { %v1948_v12 = vadd.f32 %v1943_v4, %v3422_v41 }
 0xe99   :  { %v1957_v10 = vsel %vm162_vm2, %v1948_v12, 0.0 }
 0xe9a   :  { %1958 = vadd.xlane.f32.xlu0 %v1957_v10 }
 0xe9c   :  { %v1931_v15 = vpop.f32.mrf.mxu2 }
 0xe9d   :  { %v1944_v17 = vadd.f32 %v1931_v15, %v1603_v9  ;;  %v3710_v15 = vld [vmem:[%s3864_s14 + $0x1] ss:$0 sm:$0xff] }
 0xe9f   :  { %v1949_v18 = vadd.f32 %v1944_v17, %v3440_v46 }
 0xea1   :  { %v1960_v51 = vsel %vm162_vm2, %v1949_v18, 0.0 }
 0xea2   :  { %1961 = vadd.xlane.f32.xlu1 %v1960_v51  ;;  %v3715_v51 = vld [vmem:[%s3865_s15 + $0x1] ss:$0 sm:$0xff]  ;;  %s3898_s15 = sld [smem:[#allocation8_spill]] }
 0xea4   :  { %v1934_v20 = vpop.f32.mrf.mxu2 }
 0xea5   :  { %v1945_v48 = vadd.f32 %v1934_v20, %v1604_v14 }
 0xea7   :  { %v1950_v21 = vadd.f32 %v1945_v48, %v3451_v56 }
 0xea9   :  { %v1963_v41 = vsel %vm162_vm2, %v1950_v21, 0.0 }
 0xeaa   :  { %1964 = vadd.xlane.f32.xlu2 %v1963_v41 }
 0xeac   :  { %v1937_v3 = vpop.f32.mrf.mxu2 }
 0xead   :  { %v1946_v49 = vadd.f32 %v1937_v3, %v1605_v23 }
 0xeaf   :  { %v1951_v25 = vadd.f32 %v1946_v49, %v3462_v16 }
 0xeb1   :  { %v1966_v46 = vsel %vm162_vm2, %v1951_v25, 0.0 }
 0xeb2   :  { %1967 = vadd.xlane.f32.xlu0 %v1966_v46 }
 0xeb4   :  { %v1940_v59 = vpop.f32.mrf.mxu2 }
 0xeb5   :  { %v1947_v50 = vadd.f32 %v1940_v59, %v1606_v8  ;;  %v2621_v59 = vld [vmem:[%s3868_s18 + $0x78] sm:$0xff] }
 0xeb6   :  { %2180 = vmatpush.msrb.mxu0 %v2621_v59 }
 0xeb7   :  { %v1952_v58 = vadd.f32 %v1947_v50, %v3473_v19  ;;  %v2620_v50 = vld [vmem:[%s3868_s18 + $0x70] sm:$0xff] }
 0xeb8   :  { %2181 = vmatpush.msrb.mxu0 %v2620_v50 }
 0xeb9   :  { %v1969_v56 = vsel %vm873_vm7, %v1952_v58, 0.0 }
 0xeba   :  { %1970 = vadd.xlane.f32.xlu1 %v1969_v56 }
 0xf0d   :  { %v1959_v13 = vpop.xlane.xlu0 %1958 }
 0xf0e   :  { %v1972_v22 = vmul.f32 %v1959_v13, %v3237_v35 }
 0xf10   :  { %v1977_v52 = vsub.f32 %v1948_v12, %v1972_v22  ;;  %v2619_v22 = vld [vmem:[%s3868_s18 + $0x68] sm:$0xff] }
 0xf11   :  { %2182 = vmatpush.msrb.mxu0 %v2619_v22 }
 0xf12   :  { %v1982_v26 = vmul.f32 %v1977_v52, %v1977_v52 }
 0xf14   :  { %v1987_v28 = vsel %vm162_vm2, %v1982_v26, 0.0 }
 0xf15   :  { %v1962_v16 = vpop.xlane.xlu1 %1961  ;;  %1988 = vadd.xlane.f32.xlu2 %v1987_v28 }
 0xf16   :  { %v1973_v60 = vmul.f32 %v1962_v16, %v3237_v35 }
 0xf18   :  { %v3675_v29 = vsub.f32 %v1949_v18, %v1973_v60  ;;  %v2618_v60 = vld [vmem:[%s3868_s18 + $0x60] sm:$0xff] }
 0xf19   :  { %2183 = vmatpush.msrb.mxu0 %v2618_v60 }
 0xf1a   :  { %v1983_v53 = vmul.f32 %v3675_v29, %v3675_v29 }
 0xf1c   :  { %v1990_v19 = vsel %vm162_vm2, %v1983_v53, 0.0 }
 0xf1d   :  { %1991 = vadd.xlane.f32.xlu0 %v1990_v19  ;;  %v1965_v24 = vpop.xlane.xlu2 %1964 }
 0xf1e   :  { %v1974_v61 = vmul.f32 %v1965_v24, %v3237_v35 }
 0xf20   :  { %v3681_v31 = vsub.f32 %v1950_v21, %v1974_v61  ;;  %v2617_v61 = vld [vmem:[%s3868_s18 + $0x58] sm:$0xff] }
 0xf21   :  { %2184 = vmatpush.msrb.mxu0 %v2617_v61 }
 0xf22   :  { %v1984_v32 = vmul.f32 %v3681_v31, %v3681_v31 }
 0xf24   :  { %v1993_v33 = vsel %vm162_vm2, %v1984_v32, 0.0 }
 0xf25   :  { %v1968_v30 = vpop.xlane.xlu0 %1967  ;;  %1994 = vadd.xlane.f32.xlu1 %v1993_v33 }
 0xf26   :  { %v1975_v36 = vmul.f32 %v1968_v30, %v3237_v35 }
 0xf28   :  { %v3687_v62 = vsub.f32 %v1951_v25, %v1975_v36 }
 0xf2a   :  { %v1985_v37 = vmul.f32 %v3687_v62, %v3687_v62 }
 0xf2c   :  { %v1996_v38 = vsel %vm162_vm2, %v1985_v37, 0.0 }
 0xf2d   :  { %1997 = vadd.xlane.f32.xlu2 %v1996_v38  ;;  %v1971_v34 = vpop.xlane.xlu1 %1970 }
 0xf2e   :  { %v1976_v39 = vmul.f32 %v1971_v34, %v3237_v35 }
 0xf30   :  { %v3693_v40 = vsub.f32 %v1952_v58, %v1976_v39 }
 0xf32   :  { %v1986_v42 = vmul.f32 %v3693_v40, %v3693_v40 }
 0xf34   :  { %v1999_v27 = vsel %vm873_vm7, %v1986_v42, 0.0 }
 0xf35   :  { %2000 = vadd.xlane.f32.xlu0 %v1999_v27 }
 0xf88   :  { %v1989_v47 = vpop.xlane.xlu2 %1988 }
 0xf89   :  { %v2002_v44 = vmul.f32 %v1989_v47, %v3237_v35 }
 0xf8b   :  { %v2007_v54 = vadd.f32 1e-05, %v2002_v44 }
 0xf8d   :  { %2768 = vrsqrt.f32 %v2007_v54  ;;  %vm2018_vm6 = vweird.f32 %v2007_v54 }
 0xf90   :  { %v1992_v55 = vpop.xlane.xlu0 %1991 }
 0xf91   :  { %v2003_v63 = vmul.f32 %v1992_v55, %v3237_v35 }
 0xf93   :  { %v2769_v0 = vpop.eup %2768  ;;  %v2008_v1 = vadd.f32 1e-05, %v2003_v63 }
 0xf94   :  { %v2013_v2 = vmul.f32 %v2769_v0, %v2007_v54  ;;  %vm2019_vm3 = vweird.f32 %v2769_v0 }
 0xf95   :  { %2770 = vrsqrt.f32 %v2008_v1  ;;  %vm2020_vm11 = vmor %vm2018_vm6, %vm2019_vm3  ;;  %vm2028_vm13 = vweird.f32 %v2008_v1 }
 0xf96   :  { %v2014_v5 = vmul.f32 %v2769_v0, %v2013_v2 }
 0xf98   :  { %v2015_v7 = vmul.f32 0.5, %v2014_v5  ;;  %v1995_v57 = vpop.xlane.xlu1 %1994 }
 0xf99   :  { %v2004_v11 = vmul.f32 %v1995_v57, %v3237_v35 }
 0xf9a   :  { %v2016_v6 = vsub.f32 1.5, %v2015_v7 }
 0xf9b   :  { %v2771_v4 = vpop.eup %2770  ;;  %v2009_v12 = vadd.f32 1e-05, %v2004_v11  ;;  %v2615_v11 = vld [vmem:[%s3868_s18 + $0x48] sm:$0xff] }
 0xf9c   :  { %v2017_v10 = vmul.f32 %v2769_v0, %v2016_v6  ;;  %v2023_v9 = vmul.f32 %v2771_v4, %v2008_v1  ;;  %vm2029_vm12 = vweird.f32 %v2771_v4  ;;  %v2661_v6 = vld [vmem:[%s3867_s17 + $0x1] ss:$0 sm:$0xff] }
 0xf9d   :  { %2772 = vrsqrt.f32 %v2009_v12  ;;  %vm2030_vm15 = vmor %vm2028_vm13, %vm2029_vm12  ;;  %vm2038_vm1 = vweird.f32 %v2009_v12 }
 0xf9e   :  { %v2021_v17 = vsel %vm2020_vm11, %v2769_v0, %v2017_v10  ;;  %v2024_v18 = vmul.f32 %v2771_v4, %v2023_v9 }
 0xf9f   :  { %v2062_v14 = vmul.f32 %v2021_v17, %v1977_v52 }
 0xfa0   :  { %v2025_v20 = vmul.f32 0.5, %v2024_v18  ;;  %v1998_v48 = vpop.xlane.xlu2 %1997 }
 0xfa1   :  { %v2070_v21 = vmul.f32 %v3710_v15, %v2062_v14  ;;  %v2005_v41 = vmul.f32 %v1998_v48, %v3237_v35 }
 0xfa2   :  { %v2026_v23 = vsub.f32 1.5, %v2025_v20 }
 0xfa3   :  { %v2773_v3 = vpop.eup %2772  ;;  %v3720_v49 = vadd.f32 %v3715_v51, %v2070_v21  ;;  %v2010_v25 = vadd.f32 1e-05, %v2005_v41 }
 0xfa4   :  { %v2027_v46 = vmul.f32 %v2771_v4, %v2026_v23  ;;  %v2033_v8 = vmul.f32 %v2773_v3, %v2009_v12  ;;  %vm2039_vm0 = vweird.f32 %v2773_v3 }
 0xfa5   :  { %2774 = vrsqrt.f32 %v2010_v25  ;;  %2609 = vmatmul.msk.f32.vlgmr.msrb.gmra.mxu3 %vm162_vm2, %v3720_v49  ;;  %vm2040_vm8 = vmor %vm2038_vm1, %vm2039_vm0  ;;  %vm2048_vm10 = vweird.f32 %v2010_v25 }
 0xfa6   :  { %v2031_v58 = vsel %vm2030_vm15, %v2771_v4, %v2027_v46  ;;  %v2034_v56 = vmul.f32 %v2773_v3, %v2033_v8  ;;  %v2662_v8 = vld [vmem:[%s3869_s19 + $0x1] ss:$0 sm:$0xff] }
 0xfa7   :  { %v2063_v13 = vmul.f32 %v2031_v58, %v3675_v29 }
 0xfa8   :  { %v2035_v52 = vmul.f32 0.5, %v2034_v56  ;;  %v2001_v26 = vpop.xlane.xlu0 %2000 }
 0xfa9   :  { %v2006_v28 = vmul.f32 %v2001_v26, %v3237_v35  ;;  %v2071_v16 = vmul.f32 %v3710_v15, %v2063_v13 }
 0xfaa   :  { %v2036_v53 = vsub.f32 1.5, %v2035_v52 }
 0xfab   :  { %v2775_v19 = vpop.eup %2774  ;;  %v2011_v29 = vadd.f32 1e-05, %v2006_v28  ;;  %v3740_v24 = vadd.f32 %v3715_v51, %v2071_v16 }
 0xfac   :  { %v2037_v32 = vmul.f32 %v2773_v3, %v2036_v53  ;;  %v2043_v33 = vmul.f32 %v2775_v19, %v2010_v25  ;;  %vm2049_vm9 = vweird.f32 %v2775_v19 }
 0xfad   :  { %2776 = vrsqrt.f32 %v2011_v29  ;;  %2610 = vmatmul.msk.f32.gmra.mxu3 %vm162_vm2, %v3740_v24  ;;  %vm2050_vm3 = vmor %vm2048_vm10, %vm2049_vm9  ;;  %vm2058_vm11 = vweird.f32 %v2011_v29 }
 0xfae   :  { %v2041_v30 = vsel %vm2040_vm8, %v2773_v3, %v2037_v32  ;;  %v2044_v36 = vmul.f32 %v2775_v19, %v2043_v33 }
 0xfaf   :  { %v2064_v37 = vmul.f32 %v2041_v30, %v3681_v31 }
 0xfb0   :  { %v2045_v38 = vmul.f32 0.5, %v2044_v36 }
 0xfb1   :  { %v2072_v34 = vmul.f32 %v3710_v15, %v2064_v37 }
 0xfb2   :  { %v2046_v39 = vsub.f32 1.5, %v2045_v38 }
 0xfb3   :  { %v2777_v42 = vpop.eup %2776  ;;  %v2080_v27 = vadd.f32 %v3715_v51, %v2072_v34 }
 0xfb4   :  { %v2047_v43 = vmul.f32 %v2775_v19, %v2046_v39  ;;  %v2053_v45 = vmul.f32 %v2777_v42, %v2011_v29  ;;  %vm2059_vm6 = vweird.f32 %v2777_v42 }
 0xfb5   :  { %2611 = vmatmul.msk.f32.gmra.mxu3 %vm162_vm2, %v2080_v27  ;;  %vm2060_vm12 = vmor %vm2058_vm11, %vm2059_vm6 }
 0xfb6   :  { %v2051_v47 = vsel %vm2050_vm3, %v2775_v19, %v2047_v43  ;;  %v2054_v44 = vmul.f32 %v2777_v42, %v2053_v45 }
 0xfb7   :  { %v2065_v54 = vmul.f32 %v2051_v47, %v3687_v62  ;;  %v2616_v62 = vld [vmem:[%s3868_s18 + $0x50] sm:$0xff] }
 0xfb8   :  { %v2055_v55 = vmul.f32 0.5, %v2054_v44  ;;  %2185 = vmatpush.msrb.mxu0 %v2616_v62 }
 0xfb9   :  { %v2073_v31 = vmul.f32 %v3710_v15, %v2065_v54 }
 0xfba   :  { %v2056_v63 = vsub.f32 1.5, %v2055_v55  ;;  %2186 = vmatpush.msrb.mxu0 %v2615_v11 }
 0xfbb   :  { %v2081_v0 = vadd.f32 %v3715_v51, %v2073_v31 }
 0xfbc   :  { %v2057_v1 = vmul.f32 %v2777_v42, %v2056_v63 }
 0xfbd   :  { %2612 = vmatmul.msk.f32.gmra.mxu3 %vm162_vm2, %v2081_v0 }
 0xfbe   :  { %v2061_v2 = vsel %vm2060_vm12, %v2777_v42, %v2057_v1 }
 0xfbf   :  { %v2066_v5 = vmul.f32 %v2061_v2, %v3693_v40  ;;  %v2614_v40 = vld [vmem:[%s3868_s18 + $0x40] sm:$0xff] }
 0xfc0   :  { %2187 = vmatpush.msrb.mxu0 %v2614_v40 }
 0xfc1   :  { %v2074_v7 = vmul.f32 %v3710_v15, %v2066_v5 }
 0xfc3   :  { %v2082_v57 = vadd.f32 %v3715_v51, %v2074_v7 }
 0xfc5   :  { %2613 = vmatmul.msk.f32.gmra.mxu3 %vm162_vm2, %v2082_v57 }
0x1028   :  { %v2123_v4 = vpop.f32.mrf.mxu3 }
0x1029   :  { %v2124_v12 = vadd.f32 %v2661_v6, %v2123_v4 }
0x102b   :  { %v2138_v10 = vmax.f32 %v2124_v12, 0.0 }
0x102d   :  { %2623 = vmatmul.msk.f32.vlgmr.msrb.gmra.mxu0 %vm1065_vm14, %v2138_v10 }
0x1030   :  { %v2126_v9 = vpop.f32.mrf.mxu3 }
0x1031   :  { %v2127_v15 = vadd.f32 %v2661_v6, %v2126_v9 }
0x1033   :  { %v2139_v17 = vmax.f32 %v2127_v15, 0.0 }
0x1035   :  { %2624 = vmatmul.msk.f32.gmra.mxu0 %vm1065_vm14, %v2139_v17 }
0x1038   :  { %v2129_v18 = vpop.f32.mrf.mxu3 }
0x1039   :  { %v2130_v51 = vadd.f32 %v2661_v6, %v2129_v18 }
0x103b   :  { %v2140_v14 = vmax.f32 %v2130_v51, 0.0 }
0x103d   :  { %2625 = vmatmul.msk.f32.gmra.mxu0 %vm1065_vm14, %v2140_v14 }
0x1040   :  { %v2132_v20 = vpop.f32.mrf.mxu3 }
0x1041   :  { %v2133_v48 = vadd.f32 %v2661_v6, %v2132_v20 }
0x1043   :  { %v2141_v21 = vmax.f32 %v2133_v48, 0.0 }
0x1045   :  { %2626 = vmatmul.msk.f32.gmra.mxu0 %vm1065_vm14, %v2141_v21 }
0x1048   :  { %v2135_v41 = vpop.f32.mrf.mxu3 }
0x1049   :  { %v2136_v23 = vadd.f32 %v2661_v6, %v2135_v41 }
0x104b   :  { %v2142_v3 = vmax.f32 %v2136_v23, 0.0 }
0x104d   :  { %2627 = vmatmul.msk.f32.gmra.mxu0 %vm1065_vm14, %v2142_v3 }
0x10aa   :  { %v2189_v25 = vpop.f32.mrf.mxu0 }
0x10ab   :  { %v2190_v26 = vadd.f32 %v2662_v8, %v2189_v25 }
0x10ad   :  { %v2204_v53 = vadd.f32 %v2190_v26, %v3720_v49 }
0x10af   :  { %v2213_v32 = vsel %vm162_vm2, %v2204_v53, 0.0 }
0x10b2   :  { %v2192_v46 = vpop.f32.mrf.mxu0 }
0x10b3   :  { %v2193_v29 = vadd.f32 %v2662_v8, %v2192_v46 }
0x10b5   :  { %v2205_v33 = vadd.f32 %v2193_v29, %v3740_v24 }
0x10b7   :  { %v2216_v30 = vsel %vm162_vm2, %v2205_v33, 0.0 }
0x10ba   :  { %v2195_v59 = vpop.f32.mrf.mxu0 }
0x10bb   :  { %v2196_v50 = vadd.f32 %v2662_v8, %v2195_v59  ;;  %v2367_v59 = vld [vmem:[%s3872_s22 + $0x8] sm:$0xff] }
0x10bc   :  { %2389 = vmatpush.msrb.mxu2 %v2367_v59 }
0x10bd   :  { %v2206_v58 = vadd.f32 %v2196_v50, %v2080_v27  ;;  %v2366_v50 = vld [vmem:[%s3872_s22] sm:$0xff] }
0x10be   :  { %2390 = vmatpush.msrb.mxu2 %v2366_v50 }
0x10bf   :  { %v2219_v56 = vsel %vm162_vm2, %v2206_v58, 0.0 }
0x10c0   :  { %2220 = vadd.xlane.f32.xlu0 %v2219_v56 }
0x10c2   :  { %v2198_v13 = vpop.f32.mrf.mxu0 }
0x10c3   :  { %v2199_v22 = vadd.f32 %v2662_v8, %v2198_v13 }
0x10c5   :  { %v2207_v52 = vadd.f32 %v2199_v22, %v2081_v0 }
0x10c7   :  { %v2222_v28 = vsel %vm162_vm2, %v2207_v52, 0.0 }
0x10c8   :  { %2223 = vadd.xlane.f32.xlu2 %v2222_v28 }
0x10ca   :  { %v2201_v16 = vpop.f32.mrf.mxu0 }
0x10cb   :  { %v2202_v60 = vadd.f32 %v2662_v8, %v2201_v16 }
0x10cd   :  { %v2208_v19 = vadd.f32 %v2202_v60, %v2082_v57 }
0x10cf   :  { %v2225_v61 = vsel %vm873_vm7, %v2208_v19, 0.0 }
0x10d0   :  { %2226 = vadd.xlane.f32.xlu1 %v2225_v61  ;;  %2214 = vadd.xlane.f32.xlu2 %v2213_v32 }
0x10d8   :  { %2217 = vadd.xlane.f32.xlu1 %v2216_v30 }
0x1133   :  { %v2221_v36 = vpop.xlane.xlu0 %2220 }
0x1134   :  { %v2230_v37 = vmul.f32 %v2221_v36, %v3237_v35 }
0x1136   :  { %v3787_v38 = vsub.f32 %v2206_v58, %v2230_v37 }
0x1138   :  { %v2240_v49 = vmul.f32 %v3787_v38, %v3787_v38 }
0x113a   :  { %v2249_v34 = vsel %vm162_vm2, %v2240_v49, 0.0 }
0x113b   :  { %v2224_v39 = vpop.xlane.xlu2 %2223  ;;  %2250 = vadd.xlane.f32.xlu2 %v2249_v34 }
0x113c   :  { %v2231_v42 = vmul.f32 %v2224_v39, %v3237_v35 }
0x113e   :  { %v3793_v27 = vsub.f32 %v2207_v52, %v2231_v42 }
0x1140   :  { %v2241_v24 = vmul.f32 %v3793_v27, %v3793_v27 }
0x1142   :  { %v2252_v43 = vsel %vm162_vm2, %v2241_v24, 0.0 }
0x1143   :  { %v2227_v45 = vpop.xlane.xlu1 %2226  ;;  %2253 = vadd.xlane.f32.xlu1 %v2252_v43  ;;  %v2215_v47 = vpop.xlane.xlu2 %2214 }
0x1144   :  { %v2232_v44 = vmul.f32 %v2227_v45, %v3237_v35  ;;  %v2228_v54 = vmul.f32 %v2215_v47, %v3237_v35  ;;  %v2663_v45 = vld [vmem:[%s3870_s20 + $0x1] ss:$0 sm:$0xff] }
0x1146   :  { %v3800_v55 = vsub.f32 %v2208_v19, %v2232_v44  ;;  %v3802_v31 = vsub.f32 %v2204_v53, %v2228_v54 }
0x1148   :  { %v2238_v63 = vmul.f32 %v3802_v31, %v3802_v31  ;;  %v2242_v0 = vmul.f32 %v3800_v55, %v3800_v55 }
0x114a   :  { %v2243_v1 = vsel %vm162_vm2, %v2238_v63, 0.0  ;;  %v2255_v2 = vsel %vm873_vm7, %v2242_v0, 0.0 }
0x114b   :  { %v2218_v5 = vpop.xlane.xlu1 %2217  ;;  %2244 = vadd.xlane.f32.xlu1 %v2243_v1  ;;  %2256 = vadd.xlane.f32.xlu0 %v2255_v2 }
0x114c   :  { %v2229_v7 = vmul.f32 %v2218_v5, %v3237_v35  ;;  %v2664_v5 = vld [vmem:[%s3871_s21 + $0x1] ss:$0 sm:$0xff] }
0x114e   :  { %v3811_v57 = vsub.f32 %v2205_v33, %v2229_v7 }
0x1150   :  { %v2239_v62 = vmul.f32 %v3811_v57, %v3811_v57 }
0x1152   :  { %v2246_v11 = vsel %vm162_vm2, %v2239_v62, 0.0 }
0x1153   :  { %2247 = vadd.xlane.f32.xlu0 %v2246_v11 }
0x11ae   :  { %v2251_v40 = vpop.xlane.xlu2 %2250 }
0x11af   :  { %v2260_v6 = vmul.f32 %v2251_v40, %v3237_v35 }
0x11b1   :  { %v2265_v4 = vadd.f32 1e-05, %v2260_v6 }
0x11b3   :  { %2778 = vrsqrt.f32 %v2265_v4  ;;  %vm2294_vm0 = vweird.f32 %v2265_v4 }
0x11b6   :  { %v2254_v12 = vpop.xlane.xlu1 %2253 }
0x11b7   :  { %v2261_v10 = vmul.f32 %v2254_v12, %v3237_v35 }
0x11b9   :  { %v2266_v9 = vadd.f32 1e-05, %v2261_v10  ;;  %v2779_v15 = vpop.eup %2778 }
0x11ba   :  { %v2289_v51 = vmul.f32 %v2779_v15, %v2265_v4  ;;  %vm2295_vm13 = vweird.f32 %v2779_v15 }
0x11bb   :  { %2780 = vrsqrt.f32 %v2266_v9  ;;  %vm2304_vm14 = vweird.f32 %v2266_v9  ;;  %vm2296_vm8 = vmor %vm2294_vm0, %vm2295_vm13 }
0x11bc   :  { %v2290_v3 = vmul.f32 %v2779_v15, %v2289_v51 }
0x11be   :  { %v2245_v17 = vpop.xlane.xlu1 %2244  ;;  %v2257_v18 = vpop.xlane.xlu0 %2256  ;;  %v2291_v58 = vmul.f32 0.5, %v2290_v3 }
0x11bf   :  { %v2258_v14 = vmul.f32 %v2245_v17, %v3237_v35  ;;  %v2262_v20 = vmul.f32 %v2257_v18, %v3237_v35  ;;  %v2339_v17 = vld [vmem:[%s3898_s15] sm:$0x3] }
0x11c0   :  { %v2292_v16 = vsub.f32 1.5, %v2291_v58 }
0x11c1   :  { %v2781_v48 = vpop.eup %2780  ;;  %v2263_v21 = vadd.f32 1e-05, %v2258_v14  ;;  %v2267_v41 = vadd.f32 1e-05, %v2262_v20 }
0x11c2   :  { %v2299_v23 = vmul.f32 %v2781_v48, %v2266_v9  ;;  %vm2305_vm7 = vweird.f32 %v2781_v48  ;;  %v2293_v32 = vmul.f32 %v2779_v15, %v2292_v16 }
0x11c3   :  { %2782 = vrsqrt.f32 %v2263_v21  ;;  %vm2306_vm15 = vmor %vm2304_vm14, %vm2305_vm7  ;;  %vm2314_vm9 = vweird.f32 %v2267_v41  ;;  %vm2274_vm6 = vweird.f32 %v2263_v21 }
0x11c4   :  { %v2300_v25 = vmul.f32 %v2781_v48, %v2299_v23  ;;  %2784 = vrsqrt.f32 %v2267_v41  ;;  %v2297_v34 = vsel %vm2296_vm8, %v2779_v15, %v2293_v32 }
0x11c5   :  { %v2320_v63 = vmul.f32 %v2297_v34, %v3787_v38 }
0x11c6   :  { %v2301_v46 = vmul.f32 0.5, %v2300_v25  ;;  %v2248_v8 = vpop.xlane.xlu0 %2247 }
0x11c7   :  { %v2259_v56 = vmul.f32 %v2248_v8, %v3237_v35  ;;  %v2328_v11 = vmul.f32 %v2663_v45, %v2320_v63 }
0x11c8   :  { %v2302_v13 = vsub.f32 1.5, %v2301_v46 }
0x11c9   :  { %v2783_v22 = vpop.eup %2782  ;;  %v2264_v52 = vadd.f32 1e-05, %v2259_v56  ;;  %v2336_v4 = vadd.f32 %v2664_v5, %v2328_v11 }
0x11ca   :  { %v2785_v26 = vpop.eup %2784  ;;  %v2269_v28 = vmul.f32 %v2783_v22, %v2263_v21  ;;  %v2303_v53 = vmul.f32 %v2781_v48, %v2302_v13  ;;  %vm2275_vm10 = vweird.f32 %v2783_v22 }
0x11cb   :  { %v2309_v60 = vmul.f32 %v2785_v26, %v2267_v41  ;;  %2786 = vrsqrt.f32 %v2264_v52  ;;  %vm2315_vm1 = vweird.f32 %v2785_v26  ;;  %vm2276_vm11 = vmor %vm2274_vm6, %vm2275_vm10  ;;  %vm2284_vm7 = vweird.f32 %v2264_v52 }
0x11cc   :  { %v2270_v19 = vmul.f32 %v2783_v22, %v2269_v28  ;;  %v2307_v33 = vsel %vm2306_vm15, %v2781_v48, %v2303_v53  ;;  %vm2316_vm3 = vmor %vm2314_vm9, %vm2315_vm1 }
0x11cd   :  { %v2310_v29 = vmul.f32 %v2785_v26, %v2309_v60  ;;  %v2321_v42 = vmul.f32 %v2307_v33, %v3793_v27 }
0x11ce   :  { %v2271_v61 = vmul.f32 0.5, %v2270_v19 }
0x11cf   :  { %v2311_v35 = vmul.f32 0.5, %v2310_v29  ;;  %v2329_v0 = vmul.f32 %v2663_v45, %v2321_v42 }
0x11d0   :  { %v2272_v30 = vsub.f32 1.5, %v2271_v61 }
0x11d1   :  { %v2787_v36 = vpop.eup %2786  ;;  %v2312_v37 = vsub.f32 1.5, %v2311_v35  ;;  %v2337_v38 = vadd.f32 %v2664_v5, %v2329_v0 }
0x11d2   :  { %v2279_v49 = vmul.f32 %v2787_v36, %v2264_v52  ;;  %v2273_v24 = vmul.f32 %v2783_v22, %v2272_v30  ;;  %vm2285_vm12 = vweird.f32 %v2787_v36 }
0x11d3   :  { %v2313_v39 = vmul.f32 %v2785_v26, %v2312_v37  ;;  %vm2286_vm14 = vmor %vm2284_vm7, %vm2285_vm12 }
0x11d4   :  { %v2280_v43 = vmul.f32 %v2787_v36, %v2279_v49  ;;  %v2277_v1 = vsel %vm2276_vm11, %v2783_v22, %v2273_v24 }
0x11d5   :  { %v2317_v47 = vsel %vm2316_vm3, %v2785_v26, %v2313_v39 }
0x11d6   :  { %v2322_v44 = vmul.f32 %v2317_v47, %v3800_v55  ;;  %v2281_v54 = vmul.f32 0.5, %v2280_v43  ;;  %v2318_v55 = vmul.f32 %v2277_v1, %v3802_v31 }
0x11d8   :  { %v2330_v2 = vmul.f32 %v2663_v45, %v2322_v44  ;;  %v2282_v27 = vsub.f32 1.5, %v2281_v54  ;;  %v2326_v10 = vmul.f32 %v2663_v45, %v2318_v55 }
0x11da   :  { %v2283_v7 = vmul.f32 %v2787_v36, %v2282_v27  ;;  %v2338_v62 = vadd.f32 %v2664_v5, %v2330_v2  ;;  %v2334_v15 = vadd.f32 %v2664_v5, %v2326_v10 }
0x11dc   :  { %v2287_v40 = vsel %vm2286_vm14, %v2787_v36, %v2283_v7  ;;  %2630 = vmatpush.msk.msra.mxu1 %vm421_vm4, %v2338_v62  ;;  %vm2395_vm4 = vcmask 9216  }
0x11dd   :  { %v2319_v6 = vmul.f32 %v2287_v40, %v3811_v57  ;;  %v2665_v57 = vld [vmem:[%s3873_s23] ss:$0 sm:$0xff] }
0x11de   :  { %2358 = vmatpush.msra.mxu1 %v2337_v38 }
0x11df   :  { %v2327_v12 = vmul.f32 %v2663_v45, %v2319_v6 }
0x11e0   :  { %2359 = vmatpush.msra.mxu1 %v2336_v4 }
0x11e1   :  { %v2335_v9 = vadd.f32 %v2664_v5, %v2327_v12 }
0x11e3   :  { %2360 = vmatpush.msra.mxu1 %v2335_v9 }
0x11e5   :  { %2361 = vmatpush.msra.mxu1 %v2334_v15 }
0x11e6   :  { %2631 = vmatmul.msk.f32.vlgmr.msra.gmra.mxu1 %vm349_vm5, %v2339_v17 }
0x1263   :  { %v2363_v31 = vpop.f32.mrf.mxu1 }
0x1264   :  { %2632 = vmatmul.msk.f32.vlgmr.msrb.gmra.mxu2 %vm162_vm2, %v2363_v31 }
0x12e7   :  { %v2392_v18 = vpop.f32.mrf.mxu2 }
0x12e8   :  { %v2393_v51 = vadd.f32 %v2665_v57, %v2392_v18 }
0x12ea   :  { %2396 = vst.msk [vmem:[#allocation2] sm:$0x3] %vm2395_vm4, %v2393_v51 }
0x12eb   :  { %2407 = dma.vmem_to_hbm [thread:$0]  %s2403_s3, 32, %s2405_s26, [#allocation3]  }
0x12ec   :  { %2817 = dma.done.wait [#allocation3], 32  }
0x12ed   :  { %2818 = vsyncadd [#allocation3], 4294967264 }
0x12ee   :  { %2412 = vsyncpa [#allocation3], 1 }

</bundles_post_ra>
